<compile_context>
chip_gen: v6e
topology: v6e:2x2x1
jax: 0.10.0
libtpu: 0.0.40
codegen_flags: <defaults>
</compile_context>

<pallas_src>
import functools

import jax
import jax.numpy as jnp
from jax.experimental import pallas as pl
from jax.experimental.pallas import tpu as pltpu


def _attention_kernel(x_ref, xt_ref,
                      wq_ref, wkt_ref, wv_ref,
                      bq_ref, bkt_ref, bv_ref,
                      wp_ref, bp_ref,
                      out_ref, attn_ref,
                      kt_scr, v_scr, q_scr, o_scr,
                      *, heads, scale, n_real, block_q):
    """One (batch, query-tile) grid step.

    x_ref   : (Np, C)   bf16  full padded sequence (resident per batch elem)
    xt_ref  : (C, Np)   bf16  transposed sequence (resident per batch elem)
    wq/wv   : (C, C)    bf16  full-width projection weights (y = x @ W)
    wkt     : (C, C)    bf16  W_k^T (so K^T = wkt @ x^T)
    bq/bv   : (1, C)    f32
    bkt     : (C, 1)    f32   k bias as a column (broadcast along Np)
    wp_ref  : (C, C)    bf16  output projection (in, out)
    bp_ref  : (1, C)    f32
    out_ref : (Tq, C)
    attn_ref: (H, Tq, Np)
    kt_scr  : (C, Np)   bf16  K^T cache, persists across query tiles
    v_scr   : (Np, C)   bf16  V cache, persists across query tiles
    q_scr   : (Tq, C)   bf16  per-tile Q
    o_scr   : (Tq, C)   bf16  per-tile concatenated per-head outputs
    """
    qi = pl.program_id(1)
    n_pad = v_scr.shape[0]
    c = q_scr.shape[1]
    hd = c // heads

    # --- K^T / V for the whole (padded) sequence: once per batch element.
    @pl.when(qi == 0)
    def _():
        kt = jnp.dot(wkt_ref[...], xt_ref[...],
                     preferred_element_type=jnp.float32) + bkt_ref[...]
        kt_scr[...] = kt.astype(jnp.bfloat16)                      # (C, Np)
        v = jnp.dot(x_ref[...], wv_ref[...],
                    preferred_element_type=jnp.float32) + bv_ref[...]
        v_scr[...] = v.astype(jnp.bfloat16)                        # (Np, C)

    # --- Q projection for this tile (full-width matmul), staged in VMEM.
    row0 = pl.multiple_of(qi * block_q, block_q)
    xq = x_ref[pl.ds(row0, block_q), :]                            # (Tq, C) bf16
    q = jnp.dot(xq, wq_ref[...],
                preferred_element_type=jnp.float32) + bq_ref[...]
    q_scr[...] = q.astype(jnp.bfloat16)

    key_mask = None
    if n_real != n_pad:                                            # static branch
        key_mask = jax.lax.broadcasted_iota(
            jnp.int32, (block_q, n_pad), 1) < n_real

    # --- per-head attention (static unroll over heads).
    for h in range(heads):
        lo = h * hd
        q_h = q_scr[:, lo:lo + hd]                                 # (Tq, hd) bf16
        kt_h = kt_scr[lo:lo + hd, :]                               # (hd, Np) bf16
        s = jnp.dot(q_h, kt_h, preferred_element_type=jnp.float32) * scale
        if key_mask is not None:
            s = jnp.where(key_mask, s, -1e30)

        # numerically stable softmax in f32; exact normalize (probs are output).
        s_max = jnp.max(s, axis=-1, keepdims=True)
        e = jnp.exp(s - s_max)
        denom = jnp.sum(e, axis=-1, keepdims=True)
        a = e * (1.0 / denom)                                      # (Tq, Np) f32

        attn_ref[h] = a.astype(attn_ref.dtype)                     # dense slab store

        o_h = jnp.dot(a.astype(jnp.bfloat16), v_scr[:, lo:lo + hd],
                      preferred_element_type=jnp.float32)          # (Tq, hd)
        o_scr[:, lo:lo + hd] = o_h.astype(jnp.bfloat16)

    # --- single full-width output projection over the concatenated heads.
    y = jnp.dot(o_scr[...], wp_ref[...],
                preferred_element_type=jnp.float32) + bp_ref[...]
    out_ref[...] = y.astype(out_ref.dtype)


def attention_forward(x, w_qkv, b_qkv, w_proj, b_proj, heads,
                      attn_dtype=jnp.float32):
    """x: (B, N, C).  Weights stored (in, out): y = x @ W + b (== torch Linear).

    Returns (out (B, N, C), attn (B, heads, N, N)), matching the PyTorch module.
    Pass attn_dtype=jnp.bfloat16 on v6e/v7x to halve attn HBM writeback.
    """
    B, N, C = x.shape
    assert C % heads == 0
    hd = C // heads
    scale = hd ** (-0.5)

    # Pad sequence to a multiple of 128 so attn stores are lane-dense.
    n_pad = ((N + 127) // 128) * 128

    # Generation-aware VMEM budget and query-tile size.
    try:
        vmem_cap = int(pltpu.get_tpu_info().vmem_capacity_bytes)
    except Exception:
        vmem_cap = 64 << 20
    vmem_limit = min(int(vmem_cap * 3 // 4), 100 << 20)   # ~48 MiB v7x, ~96 MiB v5e/v6e
    block_q = min(n_pad, 128)
    if vmem_cap >= (100 << 20) and n_pad % 256 == 0:       # 128 MiB chips, long seq
        block_q = min(n_pad, 256)
    num_q_tiles = n_pad // block_q

    x_p = x if n_pad == N else jnp.pad(x, ((0, 0), (0, n_pad - N), (0, 0)))
    x_b = x_p.astype(jnp.bfloat16)                         # (B, Np, C)
    x_t = jnp.swapaxes(x_b, 1, 2)                          # (B, C, Np)

    # Full-width weight views (one-time, wrapper side).
    w_q = w_qkv[:, 0 * C:1 * C].astype(jnp.bfloat16)               # (C, C)
    w_kT = w_qkv[:, 1 * C:2 * C].T.astype(jnp.bfloat16)            # (C, C) = W_k^T
    w_v = w_qkv[:, 2 * C:3 * C].astype(jnp.bfloat16)               # (C, C)
    b_q = b_qkv[0 * C:1 * C].reshape(1, C).astype(jnp.float32)
    b_kT = b_qkv[1 * C:2 * C].reshape(C, 1).astype(jnp.float32)
    b_v = b_qkv[2 * C:3 * C].reshape(1, C).astype(jnp.float32)
    w_p = w_proj.astype(jnp.bfloat16)                              # (C, C)
    b_p = b_proj.reshape(1, C).astype(jnp.float32)

    kernel = functools.partial(_attention_kernel, heads=heads, scale=scale,
                               n_real=N, block_q=block_q)

    out_shapes = (
        jax.ShapeDtypeStruct((B, n_pad, C), x.dtype),
        jax.ShapeDtypeStruct((B, heads, n_pad, n_pad), attn_dtype),
    )

    grid_spec = pltpu.PrefetchScalarGridSpec(
        num_scalar_prefetch=0,
        grid=(B, num_q_tiles),
        in_specs=[
            pl.BlockSpec((None, n_pad, C), lambda b, qi: (b, 0, 0)),   # x (resident)
            pl.BlockSpec((None, C, n_pad), lambda b, qi: (b, 0, 0)),   # x^T (resident)
            pl.BlockSpec((C, C), lambda b, qi: (0, 0)),                # w_q
            pl.BlockSpec((C, C), lambda b, qi: (0, 0)),                # w_k^T
            pl.BlockSpec((C, C), lambda b, qi: (0, 0)),                # w_v
            pl.BlockSpec((1, C), lambda b, qi: (0, 0)),                # b_q
            pl.BlockSpec((C, 1), lambda b, qi: (0, 0)),                # b_k (col)
            pl.BlockSpec((1, C), lambda b, qi: (0, 0)),                # b_v
            pl.BlockSpec((C, C), lambda b, qi: (0, 0)),                # w_proj
            pl.BlockSpec((1, C), lambda b, qi: (0, 0)),                # b_proj
        ],
        out_specs=[
            pl.BlockSpec((None, block_q, C), lambda b, qi: (b, qi, 0)),
            pl.BlockSpec((None, heads, block_q, n_pad), lambda b, qi: (b, 0, qi, 0)),
        ],
        scratch_shapes=[
            pltpu.VMEM((C, n_pad), jnp.bfloat16),       # K^T cache (per batch elem)
            pltpu.VMEM((n_pad, C), jnp.bfloat16),       # V cache   (per batch elem)
            pltpu.VMEM((block_q, C), jnp.bfloat16),     # Q tile
            pltpu.VMEM((block_q, C), jnp.bfloat16),     # concatenated per-head o
        ],
    )

    # Advisory cost estimate so XLA schedules surrounding ops around the kernel.
    flops = int(B * (8 * n_pad * C * C + 4 * n_pad * n_pad * C))
    transcendentals = int(B * heads * n_pad * n_pad)
    bytes_accessed = int(
        B * n_pad * C * 2 * 2                                   # x + x^T (bf16)
        + B * n_pad * C * jnp.dtype(x.dtype).itemsize           # out
        + B * heads * n_pad * n_pad * jnp.dtype(attn_dtype).itemsize
        + 4 * C * C * 2 + 6 * C * 4)                            # weights + biases

    out, attn = pl.pallas_call(
        kernel,
        out_shape=out_shapes,
        grid_spec=grid_spec,
        compiler_params=pltpu.CompilerParams(
            dimension_semantics=("parallel", "arbitrary"),
            vmem_limit_bytes=vmem_limit),
        cost_estimate=pl.CostEstimate(flops=flops,
                                      transcendentals=transcendentals,
                                      bytes_accessed=bytes_accessed),
    )(x_b, x_t, w_q, w_kT, w_v, b_q, b_kT, b_v, w_p, b_p)

    if n_pad != N:
        out = out[:, :N, :]
        attn = attn[:, :, :N, :N]
    return out, attn


def _reference(x, w_qkv, b_qkv, w_proj, b_proj, heads):
    """Pure-JAX f32 reference mirroring the PyTorch forward (eval mode)."""
    B, N, C = x.shape
    hd = C // heads
    scale = hd ** (-0.5)
    qkv = x @ w_qkv + b_qkv                                   # (B, N, 3C)
    qkv = qkv.reshape(B, N, 3, heads, hd).transpose(2, 0, 3, 1, 4)
    q, k, v = qkv[0], qkv[1], qkv[2]                          # (B, H, N, hd)
    attn = (q @ jnp.swapaxes(k, -2, -1)) * scale              # (B, H, N, N)
    attn = jax.nn.softmax(attn, axis=-1)
    o = (attn @ v).transpose(0, 2, 1, 3).reshape(B, N, C)
    y = o @ w_proj + b_proj
    return y, attn


if __name__ == "__main__":
    B, N, C, heads = 2, 8, 32, 4
    key = jax.random.PRNGKey(0)
    kx, k1, k2, k3, k4 = jax.random.split(key, 5)

    x = jax.random.normal(kx, (B, N, C), dtype=jnp.float32)

    # Deterministic parameter init (stored as (in, out) for y = x @ W + b).
    w_qkv = jax.random.normal(k1, (C, 3 * C), dtype=jnp.float32) * 0.05
    b_qkv = jax.random.normal(k2, (3 * C,), dtype=jnp.float32) * 0.01
    w_proj = jax.random.normal(k3, (C, C), dtype=jnp.float32) * 0.05
    b_proj = jax.random.normal(k4, (C,), dtype=jnp.float32) * 0.01

    out, attn = attention_forward(x, w_qkv, b_qkv, w_proj, b_proj, heads)
    out = jax.block_until_ready(out)
    attn = jax.block_until_ready(attn)

    ref_out, ref_attn = _reference(x, w_qkv, b_qkv, w_proj, b_proj, heads)
    assert out.shape == (B, N, C) and attn.shape == (B, heads, N, N)
    # bf16 matmul inputs -> slightly looser tolerances than pure f32.
    assert jnp.allclose(out, ref_out, atol=2e-2, rtol=2e-2)
    assert jnp.allclose(attn, ref_attn, atol=1e-2, rtol=1e-2)

    print("KERNEL_OK")
</pallas_src>

<mosaic_0001>
module attributes {stable_mosaic.version = 11 : i64} {
  func.func @_attention_kernel(%arg0: i32, %arg1: i32, %arg2: memref<1x128x32xbf16, #tpu.memory_space<vmem>>, %arg3: memref<1x32x128xbf16, #tpu.memory_space<vmem>>, %arg4: memref<32x32xbf16, #tpu.memory_space<vmem>>, %arg5: memref<32x32xbf16, #tpu.memory_space<vmem>>, %arg6: memref<32x32xbf16, #tpu.memory_space<vmem>>, %arg7: memref<1x32xf32, #tpu.memory_space<vmem>>, %arg8: memref<32x1xf32, #tpu.memory_space<vmem>>, %arg9: memref<1x32xf32, #tpu.memory_space<vmem>>, %arg10: memref<32x32xbf16, #tpu.memory_space<vmem>>, %arg11: memref<1x32xf32, #tpu.memory_space<vmem>>, %arg12: memref<1x128x32xf32, #tpu.memory_space<vmem>>, %arg13: memref<1x4x128x128xf32, #tpu.memory_space<vmem>>, %arg14: memref<32x128xbf16, #tpu.memory_space<vmem>>, %arg15: memref<128x32xbf16, #tpu.memory_space<vmem>>, %arg16: memref<128x32xbf16, #tpu.memory_space<vmem>>, %arg17: memref<128x32xbf16, #tpu.memory_space<vmem>>) attributes {dimension_semantics = [#tpu.dimension_semantics<parallel>, #tpu.dimension_semantics<arbitrary>], iteration_bounds = array<i64: 2, 1>, scalar_prefetch = 0 : i64, scratch_operands = 4 : i64, tpu.core_type = #tpu.core_type<tc>, window_params = [{transform_indices = @transform_0, window_bounds = array<i64: 1, 128, 32>}, {transform_indices = @transform_1, window_bounds = array<i64: 1, 32, 128>}, {pipeline_mode = #tpu.pipeline_mode<synchronous>, transform_indices = @transform_2, window_bounds = array<i64: 32, 32>}, {pipeline_mode = #tpu.pipeline_mode<synchronous>, transform_indices = @transform_3, window_bounds = array<i64: 32, 32>}, {pipeline_mode = #tpu.pipeline_mode<synchronous>, transform_indices = @transform_4, window_bounds = array<i64: 32, 32>}, {pipeline_mode = #tpu.pipeline_mode<synchronous>, transform_indices = @transform_5, window_bounds = array<i64: 1, 32>}, {pipeline_mode = #tpu.pipeline_mode<synchronous>, transform_indices = @transform_6, window_bounds = array<i64: 32, 1>}, {pipeline_mode = #tpu.pipeline_mode<synchronous>, transform_indices = @transform_7, window_bounds = array<i64: 1, 32>}, {pipeline_mode = #tpu.pipeline_mode<synchronous>, transform_indices = @transform_8, window_bounds = array<i64: 32, 32>}, {pipeline_mode = #tpu.pipeline_mode<synchronous>, transform_indices = @transform_9, window_bounds = array<i64: 1, 32>}, {transform_indices = @transform_10, window_bounds = array<i64: 1, 128, 32>}, {transform_indices = @transform_11, window_bounds = array<i64: 1, 4, 128, 128>}]} {
    %c0_i32 = arith.constant 0 : i32
    %0 = arith.cmpi eq, %arg1, %c0_i32 : i32
    %1 = arith.extui %0 : i1 to i32
    %c0_i32_0 = arith.constant 0 : i32
    %2 = arith.cmpi ne, %1, %c0_i32_0 : i32
    scf.if %2 {
      %c0_88 = arith.constant 0 : index
      %c0_89 = arith.constant 0 : index
      %131 = vector.load %arg5[%c0_88, %c0_89] : memref<32x32xbf16, #tpu.memory_space<vmem>>, vector<32x32xbf16>
      %c0_90 = arith.constant 0 : index
      %c0_91 = arith.constant 0 : index
      %c0_92 = arith.constant 0 : index
      %132 = vector.load %arg3[%c0_90, %c0_91, %c0_92] : memref<1x32x128xbf16, #tpu.memory_space<vmem>>, vector<1x32x128xbf16>
      %133 = vector.shape_cast %132 : vector<1x32x128xbf16> to vector<32x128xbf16>
      %cst_93 = arith.constant dense<0.000000e+00> : vector<32x128xf32>
      %134 = tpu.matmul %131, %133, %cst_93 {dimension_numbers = #tpu.dot_dimension_numbers<[1], [0], [0], [1], [0, 0, 1, 1], [], []>} : vector<32x32xbf16>, vector<32x128xbf16>, vector<32x128xf32> -> vector<32x128xf32>
      %c0_94 = arith.constant 0 : index
      %c0_95 = arith.constant 0 : index
      %135 = vector.load %arg8[%c0_94, %c0_95] : memref<32x1xf32, #tpu.memory_space<vmem>>, vector<32x1xf32>
      %136 = vector.broadcast %135 : vector<32x1xf32> to vector<32x128xf32>
      %137 = arith.addf %134, %136 : vector<32x128xf32>
      %138 = arith.truncf %137 : vector<32x128xf32> to vector<32x128xbf16>
      %c0_96 = arith.constant 0 : index
      %c0_97 = arith.constant 0 : index
      %139 = vector.load %arg14[%c0_96, %c0_97] : memref<32x128xbf16, #tpu.memory_space<vmem>>, vector<32x128xbf16>
      tpu.vector_store %arg14[%c0_96, %c0_97], %138 {strides = array<i32>} : memref<32x128xbf16, #tpu.memory_space<vmem>>, vector<32x128xbf16>,
      %c0_98 = arith.constant 0 : index
      %c0_99 = arith.constant 0 : index
      %c0_100 = arith.constant 0 : index
      %140 = vector.load %arg2[%c0_98, %c0_99, %c0_100] : memref<1x128x32xbf16, #tpu.memory_space<vmem>>, vector<1x128x32xbf16>
      %141 = vector.shape_cast %140 : vector<1x128x32xbf16> to vector<128x32xbf16>
      %c0_101 = arith.constant 0 : index
      %c0_102 = arith.constant 0 : index
      %142 = vector.load %arg6[%c0_101, %c0_102] : memref<32x32xbf16, #tpu.memory_space<vmem>>, vector<32x32xbf16>
      %cst_103 = arith.constant dense<0.000000e+00> : vector<128x32xf32>
      %143 = tpu.matmul %141, %142, %cst_103 {dimension_numbers = #tpu.dot_dimension_numbers<[1], [0], [0], [1], [0, 0, 1, 1], [], []>} : vector<128x32xbf16>, vector<32x32xbf16>, vector<128x32xf32> -> vector<128x32xf32>
      %c0_104 = arith.constant 0 : index
      %c0_105 = arith.constant 0 : index
      %144 = vector.load %arg9[%c0_104, %c0_105] : memref<1x32xf32, #tpu.memory_space<vmem>>, vector<1x32xf32>
      %145 = vector.broadcast %144 : vector<1x32xf32> to vector<128x32xf32>
      %146 = arith.addf %143, %145 : vector<128x32xf32>
      %147 = arith.truncf %146 : vector<128x32xf32> to vector<128x32xbf16>
      %c0_106 = arith.constant 0 : index
      %c0_107 = arith.constant 0 : index
      %148 = vector.load %arg15[%c0_106, %c0_107] : memref<128x32xbf16, #tpu.memory_space<vmem>>, vector<128x32xbf16>
      tpu.vector_store %arg15[%c0_106, %c0_107], %147 {strides = array<i32>} : memref<128x32xbf16, #tpu.memory_space<vmem>>, vector<128x32xbf16>,
    } else {
    }
    %c128_i32 = arith.constant 128 : i32
    %3 = arith.muli %arg1, %c128_i32 : i32
    %4 = tpu.assume_multiple %3, 128 : i32
    %c0 = arith.constant 0 : index
    %5 = arith.index_cast %4 : i32 to index
    %c0_1 = arith.constant 0 : index
    %6 = vector.load %arg2[%c0, %5, %c0_1] : memref<1x128x32xbf16, #tpu.memory_space<vmem>>, vector<1x128x32xbf16>
    %7 = vector.shape_cast %6 : vector<1x128x32xbf16> to vector<128x32xbf16>
    %c0_2 = arith.constant 0 : index
    %c0_3 = arith.constant 0 : index
    %8 = vector.load %arg4[%c0_2, %c0_3] : memref<32x32xbf16, #tpu.memory_space<vmem>>, vector<32x32xbf16>
    %cst = arith.constant dense<0.000000e+00> : vector<128x32xf32>
    %9 = tpu.matmul %7, %8, %cst {dimension_numbers = #tpu.dot_dimension_numbers<[1], [0], [0], [1], [0, 0, 1, 1], [], []>} : vector<128x32xbf16>, vector<32x32xbf16>, vector<128x32xf32> -> vector<128x32xf32>
    %c0_4 = arith.constant 0 : index
    %c0_5 = arith.constant 0 : index
    %10 = vector.load %arg7[%c0_4, %c0_5] : memref<1x32xf32, #tpu.memory_space<vmem>>, vector<1x32xf32>
    %11 = vector.broadcast %10 : vector<1x32xf32> to vector<128x32xf32>
    %12 = arith.addf %9, %11 : vector<128x32xf32>
    %13 = arith.truncf %12 : vector<128x32xf32> to vector<128x32xbf16>
    %c0_6 = arith.constant 0 : index
    %c0_7 = arith.constant 0 : index
    %14 = vector.load %arg16[%c0_6, %c0_7] : memref<128x32xbf16, #tpu.memory_space<vmem>>, vector<128x32xbf16>
    tpu.vector_store %arg16[%c0_6, %c0_7], %13 {strides = array<i32>} : memref<128x32xbf16, #tpu.memory_space<vmem>>, vector<128x32xbf16>,
    %15 = tpu.iota {dimensions = array<i32: 1>} : vector<128x128xi32>
    %c8_i32 = arith.constant 8 : i32
    %16 = vector.broadcast %c8_i32 : i32 to vector<128x128xi32>
    %17 = arith.cmpi slt, %15, %16 : vector<128x128xi32>
    %c0_8 = arith.constant 0 : index
    %c0_9 = arith.constant 0 : index
    %18 = vector.load %arg16[%c0_8, %c0_9] : memref<128x32xbf16, #tpu.memory_space<vmem>>, vector<128x8xbf16>
    %c0_10 = arith.constant 0 : index
    %c0_11 = arith.constant 0 : index
    %19 = vector.load %arg14[%c0_10, %c0_11] : memref<32x128xbf16, #tpu.memory_space<vmem>>, vector<8x128xbf16>
    %cst_12 = arith.constant dense<0.000000e+00> : vector<128x128xf32>
    %20 = tpu.matmul %18, %19, %cst_12 {dimension_numbers = #tpu.dot_dimension_numbers<[1], [0], [0], [1], [0, 0, 1, 1], [], []>} : vector<128x8xbf16>, vector<8x128xbf16>, vector<128x128xf32> -> vector<128x128xf32>
    %cst_13 = arith.constant 0.353553385 : f32
    %21 = vector.broadcast %cst_13 : f32 to vector<128x128xf32>
    %22 = arith.mulf %20, %21 : vector<128x128xf32>
    %cst_14 = arith.constant -1.000000e+30 : f32
    %23 = vector.broadcast %cst_14 : f32 to vector<128x128xf32>
    %24 = arith.select %17, %22, %23 : vector<128x128xi1>, vector<128x128xf32>
    %cst_15 = arith.constant dense<0xFF800000> : vector<128xf32>
    %25 = vector.multi_reduction <maximumf>, %24, %cst_15 [1] : vector<128x128xf32> to vector<128xf32>
    %26 = vector.shape_cast %25 : vector<128xf32> to vector<128x1xf32>
    %27 = vector.broadcast %26 : vector<128x1xf32> to vector<128x128xf32>
    %28 = arith.subf %24, %27 : vector<128x128xf32>
    %29 = math.exp %28 : vector<128x128xf32>
    %cst_16 = arith.constant dense<0.000000e+00> : vector<128xf32>
    %30 = vector.multi_reduction <add>, %29, %cst_16 [1] : vector<128x128xf32> to vector<128xf32>
    %31 = vector.shape_cast %30 : vector<128xf32> to vector<128x1xf32>
    %cst_17 = arith.constant 1.000000e+00 : f32
    %32 = vector.broadcast %cst_17 : f32 to vector<128x1xf32>
    %33 = arith.divf %32, %31 : vector<128x1xf32>
    %34 = vector.broadcast %33 : vector<128x1xf32> to vector<128x128xf32>
    %35 = arith.mulf %29, %34 : vector<128x128xf32>
    %c0_18 = arith.constant 0 : index
    %c0_19 = arith.constant 0 : index
    %c0_20 = arith.constant 0 : index
    %c0_21 = arith.constant 0 : index
    %36 = vector.load %arg13[%c0_18, %c0_19, %c0_20, %c0_21] : memref<1x4x128x128xf32, #tpu.memory_space<vmem>>, vector<1x1x128x128xf32>
    %37 = vector.shape_cast %36 : vector<1x1x128x128xf32> to vector<128x128xf32>
    %38 = vector.shape_cast %35 : vector<128x128xf32> to vector<1x1x128x128xf32>
    tpu.vector_store %arg13[%c0_18, %c0_19, %c0_20, %c0_21], %38 {strides = array<i32>} : memref<1x4x128x128xf32, #tpu.memory_space<vmem>>, vector<1x1x128x128xf32>,
    %39 = arith.truncf %35 : vector<128x128xf32> to vector<128x128xbf16>
    %c0_22 = arith.constant 0 : index
    %c0_23 = arith.constant 0 : index
    %40 = vector.load %arg15[%c0_22, %c0_23] : memref<128x32xbf16, #tpu.memory_space<vmem>>, vector<128x8xbf16>
    %cst_24 = arith.constant dense<0.000000e+00> : vector<128x8xf32>
    %41 = tpu.matmul %39, %40, %cst_24 {dimension_numbers = #tpu.dot_dimension_numbers<[1], [0], [0], [1], [0, 0, 1, 1], [], []>} : vector<128x128xbf16>, vector<128x8xbf16>, vector<128x8xf32> -> vector<128x8xf32>
    %42 = arith.truncf %41 : vector<128x8xf32> to vector<128x8xbf16>
    %c0_25 = arith.constant 0 : index
    %c0_26 = arith.constant 0 : index
    %43 = vector.load %arg17[%c0_25, %c0_26] : memref<128x32xbf16, #tpu.memory_space<vmem>>, vector<128x8xbf16>
    tpu.vector_store %arg17[%c0_25, %c0_26], %42 {strides = array<i32>} : memref<128x32xbf16, #tpu.memory_space<vmem>>, vector<128x8xbf16>,
    %c0_27 = arith.constant 0 : index
    %c8 = arith.constant 8 : index
    %44 = vector.load %arg16[%c0_27, %c8] : memref<128x32xbf16, #tpu.memory_space<vmem>>, vector<128x8xbf16>
    %c8_28 = arith.constant 8 : index
    %c0_29 = arith.constant 0 : index
    %45 = vector.load %arg14[%c8_28, %c0_29] : memref<32x128xbf16, #tpu.memory_space<vmem>>, vector<8x128xbf16>
    %cst_30 = arith.constant dense<0.000000e+00> : vector<128x128xf32>
    %46 = tpu.matmul %44, %45, %cst_30 {dimension_numbers = #tpu.dot_dimension_numbers<[1], [0], [0], [1], [0, 0, 1, 1], [], []>} : vector<128x8xbf16>, vector<8x128xbf16>, vector<128x128xf32> -> vector<128x128xf32>
    %cst_31 = arith.constant 0.353553385 : f32
    %47 = vector.broadcast %cst_31 : f32 to vector<128x128xf32>
    %48 = arith.mulf %46, %47 : vector<128x128xf32>
    %cst_32 = arith.constant -1.000000e+30 : f32
    %49 = vector.broadcast %cst_32 : f32 to vector<128x128xf32>
    %50 = arith.select %17, %48, %49 : vector<128x128xi1>, vector<128x128xf32>
    %cst_33 = arith.constant dense<0xFF800000> : vector<128xf32>
    %51 = vector.multi_reduction <maximumf>, %50, %cst_33 [1] : vector<128x128xf32> to vector<128xf32>
    %52 = vector.shape_cast %51 : vector<128xf32> to vector<128x1xf32>
    %53 = vector.broadcast %52 : vector<128x1xf32> to vector<128x128xf32>
    %54 = arith.subf %50, %53 : vector<128x128xf32>
    %55 = math.exp %54 : vector<128x128xf32>
    %cst_34 = arith.constant dense<0.000000e+00> : vector<128xf32>
    %56 = vector.multi_reduction <add>, %55, %cst_34 [1] : vector<128x128xf32> to vector<128xf32>
    %57 = vector.shape_cast %56 : vector<128xf32> to vector<128x1xf32>
    %cst_35 = arith.constant 1.000000e+00 : f32
    %58 = vector.broadcast %cst_35 : f32 to vector<128x1xf32>
    %59 = arith.divf %58, %57 : vector<128x1xf32>
    %60 = vector.broadcast %59 : vector<128x1xf32> to vector<128x128xf32>
    %61 = arith.mulf %55, %60 : vector<128x128xf32>
    %c0_36 = arith.constant 0 : index
    %c1 = arith.constant 1 : index
    %c0_37 = arith.constant 0 : index
    %c0_38 = arith.constant 0 : index
    %62 = vector.load %arg13[%c0_36, %c1, %c0_37, %c0_38] : memref<1x4x128x128xf32, #tpu.memory_space<vmem>>, vector<1x1x128x128xf32>
    %63 = vector.shape_cast %62 : vector<1x1x128x128xf32> to vector<128x128xf32>
    %64 = vector.shape_cast %61 : vector<128x128xf32> to vector<1x1x128x128xf32>
    tpu.vector_store %arg13[%c0_36, %c1, %c0_37, %c0_38], %64 {strides = array<i32>} : memref<1x4x128x128xf32, #tpu.memory_space<vmem>>, vector<1x1x128x128xf32>,
    %65 = arith.truncf %61 : vector<128x128xf32> to vector<128x128xbf16>
    %c0_39 = arith.constant 0 : index
    %c8_40 = arith.constant 8 : index
    %66 = vector.load %arg15[%c0_39, %c8_40] : memref<128x32xbf16, #tpu.memory_space<vmem>>, vector<128x8xbf16>
    %cst_41 = arith.constant dense<0.000000e+00> : vector<128x8xf32>
    %67 = tpu.matmul %65, %66, %cst_41 {dimension_numbers = #tpu.dot_dimension_numbers<[1], [0], [0], [1], [0, 0, 1, 1], [], []>} : vector<128x128xbf16>, vector<128x8xbf16>, vector<128x8xf32> -> vector<128x8xf32>
    %68 = arith.truncf %67 : vector<128x8xf32> to vector<128x8xbf16>
    %c0_42 = arith.constant 0 : index
    %c8_43 = arith.constant 8 : index
    %69 = vector.load %arg17[%c0_42, %c8_43] : memref<128x32xbf16, #tpu.memory_space<vmem>>, vector<128x8xbf16>
    tpu.vector_store %arg17[%c0_42, %c8_43], %68 {strides = array<i32>} : memref<128x32xbf16, #tpu.memory_space<vmem>>, vector<128x8xbf16>,
    %c0_44 = arith.constant 0 : index
    %c16 = arith.constant 16 : index
    %70 = vector.load %arg16[%c0_44, %c16] : memref<128x32xbf16, #tpu.memory_space<vmem>>, vector<128x8xbf16>
    %c16_45 = arith.constant 16 : index
    %c0_46 = arith.constant 0 : index
    %71 = vector.load %arg14[%c16_45, %c0_46] : memref<32x128xbf16, #tpu.memory_space<vmem>>, vector<8x128xbf16>
    %cst_47 = arith.constant dense<0.000000e+00> : vector<128x128xf32>
    %72 = tpu.matmul %70, %71, %cst_47 {dimension_numbers = #tpu.dot_dimension_numbers<[1], [0], [0], [1], [0, 0, 1, 1], [], []>} : vector<128x8xbf16>, vector<8x128xbf16>, vector<128x128xf32> -> vector<128x128xf32>
    %cst_48 = arith.constant 0.353553385 : f32
    %73 = vector.broadcast %cst_48 : f32 to vector<128x128xf32>
    %74 = arith.mulf %72, %73 : vector<128x128xf32>
    %cst_49 = arith.constant -1.000000e+30 : f32
    %75 = vector.broadcast %cst_49 : f32 to vector<128x128xf32>
    %76 = arith.select %17, %74, %75 : vector<128x128xi1>, vector<128x128xf32>
    %cst_50 = arith.constant dense<0xFF800000> : vector<128xf32>
    %77 = vector.multi_reduction <maximumf>, %76, %cst_50 [1] : vector<128x128xf32> to vector<128xf32>
    %78 = vector.shape_cast %77 : vector<128xf32> to vector<128x1xf32>
    %79 = vector.broadcast %78 : vector<128x1xf32> to vector<128x128xf32>
    %80 = arith.subf %76, %79 : vector<128x128xf32>
    %81 = math.exp %80 : vector<128x128xf32>
    %cst_51 = arith.constant dense<0.000000e+00> : vector<128xf32>
    %82 = vector.multi_reduction <add>, %81, %cst_51 [1] : vector<128x128xf32> to vector<128xf32>
    %83 = vector.shape_cast %82 : vector<128xf32> to vector<128x1xf32>
    %cst_52 = arith.constant 1.000000e+00 : f32
    %84 = vector.broadcast %cst_52 : f32 to vector<128x1xf32>
    %85 = arith.divf %84, %83 : vector<128x1xf32>
    %86 = vector.broadcast %85 : vector<128x1xf32> to vector<128x128xf32>
    %87 = arith.mulf %81, %86 : vector<128x128xf32>
    %c0_53 = arith.constant 0 : index
    %c2 = arith.constant 2 : index
    %c0_54 = arith.constant 0 : index
    %c0_55 = arith.constant 0 : index
    %88 = vector.load %arg13[%c0_53, %c2, %c0_54, %c0_55] : memref<1x4x128x128xf32, #tpu.memory_space<vmem>>, vector<1x1x128x128xf32>
    %89 = vector.shape_cast %88 : vector<1x1x128x128xf32> to vector<128x128xf32>
    %90 = vector.shape_cast %87 : vector<128x128xf32> to vector<1x1x128x128xf32>
    tpu.vector_store %arg13[%c0_53, %c2, %c0_54, %c0_55], %90 {strides = array<i32>} : memref<1x4x128x128xf32, #tpu.memory_space<vmem>>, vector<1x1x128x128xf32>,
    %91 = arith.truncf %87 : vector<128x128xf32> to vector<128x128xbf16>
    %c0_56 = arith.constant 0 : index
    %c16_57 = arith.constant 16 : index
    %92 = vector.load %arg15[%c0_56, %c16_57] : memref<128x32xbf16, #tpu.memory_space<vmem>>, vector<128x8xbf16>
    %cst_58 = arith.constant dense<0.000000e+00> : vector<128x8xf32>
    %93 = tpu.matmul %91, %92, %cst_58 {dimension_numbers = #tpu.dot_dimension_numbers<[1], [0], [0], [1], [0, 0, 1, 1], [], []>} : vector<128x128xbf16>, vector<128x8xbf16>, vector<128x8xf32> -> vector<128x8xf32>
    %94 = arith.truncf %93 : vector<128x8xf32> to vector<128x8xbf16>
    %c0_59 = arith.constant 0 : index
    %c16_60 = arith.constant 16 : index
    %95 = vector.load %arg17[%c0_59, %c16_60] : memref<128x32xbf16, #tpu.memory_space<vmem>>, vector<128x8xbf16>
    tpu.vector_store %arg17[%c0_59, %c16_60], %94 {strides = array<i32>} : memref<128x32xbf16, #tpu.memory_space<vmem>>, vector<128x8xbf16>,
    %c0_61 = arith.constant 0 : index
    %c24 = arith.constant 24 : index
    %96 = vector.load %arg16[%c0_61, %c24] : memref<128x32xbf16, #tpu.memory_space<vmem>>, vector<128x8xbf16>
    %c24_62 = arith.constant 24 : index
    %c0_63 = arith.constant 0 : index
    %97 = vector.load %arg14[%c24_62, %c0_63] : memref<32x128xbf16, #tpu.memory_space<vmem>>, vector<8x128xbf16>
    %cst_64 = arith.constant dense<0.000000e+00> : vector<128x128xf32>
    %98 = tpu.matmul %96, %97, %cst_64 {dimension_numbers = #tpu.dot_dimension_numbers<[1], [0], [0], [1], [0, 0, 1, 1], [], []>} : vector<128x8xbf16>, vector<8x128xbf16>, vector<128x128xf32> -> vector<128x128xf32>
    %cst_65 = arith.constant 0.353553385 : f32
    %99 = vector.broadcast %cst_65 : f32 to vector<128x128xf32>
    %100 = arith.mulf %98, %99 : vector<128x128xf32>
    %cst_66 = arith.constant -1.000000e+30 : f32
    %101 = vector.broadcast %cst_66 : f32 to vector<128x128xf32>
    %102 = arith.select %17, %100, %101 : vector<128x128xi1>, vector<128x128xf32>
    %cst_67 = arith.constant dense<0xFF800000> : vector<128xf32>
    %103 = vector.multi_reduction <maximumf>, %102, %cst_67 [1] : vector<128x128xf32> to vector<128xf32>
    %104 = vector.shape_cast %103 : vector<128xf32> to vector<128x1xf32>
    %105 = vector.broadcast %104 : vector<128x1xf32> to vector<128x128xf32>
    %106 = arith.subf %102, %105 : vector<128x128xf32>
    %107 = math.exp %106 : vector<128x128xf32>
    %cst_68 = arith.constant dense<0.000000e+00> : vector<128xf32>
    %108 = vector.multi_reduction <add>, %107, %cst_68 [1] : vector<128x128xf32> to vector<128xf32>
    %109 = vector.shape_cast %108 : vector<128xf32> to vector<128x1xf32>
    %cst_69 = arith.constant 1.000000e+00 : f32
    %110 = vector.broadcast %cst_69 : f32 to vector<128x1xf32>
    %111 = arith.divf %110, %109 : vector<128x1xf32>
    %112 = vector.broadcast %111 : vector<128x1xf32> to vector<128x128xf32>
    %113 = arith.mulf %107, %112 : vector<128x128xf32>
    %c0_70 = arith.constant 0 : index
    %c3 = arith.constant 3 : index
    %c0_71 = arith.constant 0 : index
    %c0_72 = arith.constant 0 : index
    %114 = vector.load %arg13[%c0_70, %c3, %c0_71, %c0_72] : memref<1x4x128x128xf32, #tpu.memory_space<vmem>>, vector<1x1x128x128xf32>
    %115 = vector.shape_cast %114 : vector<1x1x128x128xf32> to vector<128x128xf32>
    %116 = vector.shape_cast %113 : vector<128x128xf32> to vector<1x1x128x128xf32>
    tpu.vector_store %arg13[%c0_70, %c3, %c0_71, %c0_72], %116 {strides = array<i32>} : memref<1x4x128x128xf32, #tpu.memory_space<vmem>>, vector<1x1x128x128xf32>,
    %117 = arith.truncf %113 : vector<128x128xf32> to vector<128x128xbf16>
    %c0_73 = arith.constant 0 : index
    %c24_74 = arith.constant 24 : index
    %118 = vector.load %arg15[%c0_73, %c24_74] : memref<128x32xbf16, #tpu.memory_space<vmem>>, vector<128x8xbf16>
    %cst_75 = arith.constant dense<0.000000e+00> : vector<128x8xf32>
    %119 = tpu.matmul %117, %118, %cst_75 {dimension_numbers = #tpu.dot_dimension_numbers<[1], [0], [0], [1], [0, 0, 1, 1], [], []>} : vector<128x128xbf16>, vector<128x8xbf16>, vector<128x8xf32> -> vector<128x8xf32>
    %120 = arith.truncf %119 : vector<128x8xf32> to vector<128x8xbf16>
    %c0_76 = arith.constant 0 : index
    %c24_77 = arith.constant 24 : index
    %121 = vector.load %arg17[%c0_76, %c24_77] : memref<128x32xbf16, #tpu.memory_space<vmem>>, vector<128x8xbf16>
    tpu.vector_store %arg17[%c0_76, %c24_77], %120 {strides = array<i32>} : memref<128x32xbf16, #tpu.memory_space<vmem>>, vector<128x8xbf16>,
    %c0_78 = arith.constant 0 : index
    %c0_79 = arith.constant 0 : index
    %122 = vector.load %arg17[%c0_78, %c0_79] : memref<128x32xbf16, #tpu.memory_space<vmem>>, vector<128x32xbf16>
    %c0_80 = arith.constant 0 : index
    %c0_81 = arith.constant 0 : index
    %123 = vector.load %arg10[%c0_80, %c0_81] : memref<32x32xbf16, #tpu.memory_space<vmem>>, vector<32x32xbf16>
    %cst_82 = arith.constant dense<0.000000e+00> : vector<128x32xf32>
    %124 = tpu.matmul %122, %123, %cst_82 {dimension_numbers = #tpu.dot_dimension_numbers<[1], [0], [0], [1], [0, 0, 1, 1], [], []>} : vector<128x32xbf16>, vector<32x32xbf16>, vector<128x32xf32> -> vector<128x32xf32>
    %c0_83 = arith.constant 0 : index
    %c0_84 = arith.constant 0 : index
    %125 = vector.load %arg11[%c0_83, %c0_84] : memref<1x32xf32, #tpu.memory_space<vmem>>, vector<1x32xf32>
    %126 = vector.broadcast %125 : vector<1x32xf32> to vector<128x32xf32>
    %127 = arith.addf %124, %126 : vector<128x32xf32>
    %c0_85 = arith.constant 0 : index
    %c0_86 = arith.constant 0 : index
    %c0_87 = arith.constant 0 : index
    %128 = vector.load %arg12[%c0_85, %c0_86, %c0_87] : memref<1x128x32xf32, #tpu.memory_space<vmem>>, vector<1x128x32xf32>
    %129 = vector.shape_cast %128 : vector<1x128x32xf32> to vector<128x32xf32>
    %130 = vector.shape_cast %127 : vector<128x32xf32> to vector<1x128x32xf32>
    tpu.vector_store %arg12[%c0_85, %c0_86, %c0_87], %130 {strides = array<i32>} : memref<1x128x32xf32, #tpu.memory_space<vmem>>, vector<1x128x32xf32>,
    return
  }
  func.func @transform_0(%arg0: i32, %arg1: i32) -> (i32, i32, i32) {
    %c0_i32 = arith.constant 0 : i32
    %c0_i32_0 = arith.constant 0 : i32
    %c0_i32_1 = arith.constant 0 : i32
    return %arg0, %c0_i32, %c0_i32_0 : i32, i32, i32
  }
  func.func @transform_1(%arg0: i32, %arg1: i32) -> (i32, i32, i32) {
    %c0_i32 = arith.constant 0 : i32
    %c0_i32_0 = arith.constant 0 : i32
    %c0_i32_1 = arith.constant 0 : i32
    return %arg0, %c0_i32, %c0_i32_0 : i32, i32, i32
  }
  func.func @transform_2(%arg0: i32, %arg1: i32) -> (i32, i32) {
    %c0_i32 = arith.constant 0 : i32
    %c0_i32_0 = arith.constant 0 : i32
    %c0_i32_1 = arith.constant 0 : i32
    return %c0_i32, %c0_i32_0 : i32, i32
  }
  func.func @transform_3(%arg0: i32, %arg1: i32) -> (i32, i32) {
    %c0_i32 = arith.constant 0 : i32
    %c0_i32_0 = arith.constant 0 : i32
    %c0_i32_1 = arith.constant 0 : i32
    return %c0_i32, %c0_i32_0 : i32, i32
  }
  func.func @transform_4(%arg0: i32, %arg1: i32) -> (i32, i32) {
    %c0_i32 = arith.constant 0 : i32
    %c0_i32_0 = arith.constant 0 : i32
    %c0_i32_1 = arith.constant 0 : i32
    return %c0_i32, %c0_i32_0 : i32, i32
  }
  func.func @transform_5(%arg0: i32, %arg1: i32) -> (i32, i32) {
    %c0_i32 = arith.constant 0 : i32
    %c0_i32_0 = arith.constant 0 : i32
    %c0_i32_1 = arith.constant 0 : i32
    return %c0_i32, %c0_i32_0 : i32, i32
  }
  func.func @transform_6(%arg0: i32, %arg1: i32) -> (i32, i32) {
    %c0_i32 = arith.constant 0 : i32
    %c0_i32_0 = arith.constant 0 : i32
    %c0_i32_1 = arith.constant 0 : i32
    return %c0_i32, %c0_i32_0 : i32, i32
  }
  func.func @transform_7(%arg0: i32, %arg1: i32) -> (i32, i32) {
    %c0_i32 = arith.constant 0 : i32
    %c0_i32_0 = arith.constant 0 : i32
    %c0_i32_1 = arith.constant 0 : i32
    return %c0_i32, %c0_i32_0 : i32, i32
  }
  func.func @transform_8(%arg0: i32, %arg1: i32) -> (i32, i32) {
    %c0_i32 = arith.constant 0 : i32
    %c0_i32_0 = arith.constant 0 : i32
    %c0_i32_1 = arith.constant 0 : i32
    return %c0_i32, %c0_i32_0 : i32, i32
  }
  func.func @transform_9(%arg0: i32, %arg1: i32) -> (i32, i32) {
    %c0_i32 = arith.constant 0 : i32
    %c0_i32_0 = arith.constant 0 : i32
    %c0_i32_1 = arith.constant 0 : i32
    return %c0_i32, %c0_i32_0 : i32, i32
  }
  func.func @transform_10(%arg0: i32, %arg1: i32) -> (i32, i32, i32) {
    %c0_i32 = arith.constant 0 : i32
    %c0_i32_0 = arith.constant 0 : i32
    return %arg0, %arg1, %c0_i32 : i32, i32, i32
  }
  func.func @transform_11(%arg0: i32, %arg1: i32) -> (i32, i32, i32, i32) {
    %c0_i32 = arith.constant 0 : i32
    %c0_i32_0 = arith.constant 0 : i32
    %c0_i32_1 = arith.constant 0 : i32
    return %arg0, %c0_i32, %arg1, %c0_i32_0 : i32, i32, i32, i32
  }
}

</mosaic_0001>

<bundles_post_ra>
// kernel: tpu_custom_call.1
= control target key start
LH: loop header
LB: loop body
LE: loop exit
PB: predicated region body
PF: predicated region fallthrough
CT: control target
= control target key end

     0   :  { %s7032_s0 = inlined_call_operand.vmem [shape: bf16[2,128,32], index: 0, kind: input, shape index: {}]   ;;  %s7033_s1 = inlined_call_operand.vmem [shape: bf16[2,32,128], index: 1, kind: input, shape index: {}]   ;;  %s7034_s2 = inlined_call_operand.vmem [shape: bf16[32,32], index: 2, kind: input, shape index: {}]   ;;  %s7035_s3 = inlined_call_operand.vmem [shape: bf16[32,32], index: 3, kind: input, shape index: {}]   ;;  %s7036_s4 = inlined_call_operand.vmem [shape: bf16[32,32], index: 4, kind: input, shape index: {}]   ;;  %s7037_s5 = inlined_call_operand.vmem [shape: f32[1,32], index: 5, kind: input, shape index: {}]   ;;  %s7038_s6 = inlined_call_operand.vmem [shape: f32[32,1], index: 6, kind: input, shape index: {}]   ;;  %s7039_s7 = inlined_call_operand.vmem [shape: f32[1,32], index: 7, kind: input, shape index: {}]   ;;  %s7040_s8 = inlined_call_operand.vmem [shape: bf16[32,32], index: 8, kind: input, shape index: {}]   ;;  %s7041_s9 = inlined_call_operand.vmem [shape: f32[1,32], index: 9, kind: input, shape index: {}]   ;;  %s7042_s10 = inlined_call_operand.vmem [shape: f32[2,128,32], index: 10, kind: output, shape index: {0}]   ;;  %s7043_s11 = inlined_call_operand.hbm [shape: f32[2,4,128,128], index: 11, kind: output, shape index: {1}]  }
   0x1   :  { %7080 = sst [smem:[#allocation44_spill]] %s7032_s0 }
   0x2   :  { %7081 = sst [smem:[#allocation45_spill]] %s7033_s1 }
   0x3   :  { %7082 = sst [smem:[#allocation46_spill]] %s7036_s4 }
   0x4   :  { %17 = vsyncpa [#allocation7], 0 }
   0x5   :  { %19 = vsyncpa [#allocation7 + $0x1], 0  ;;  %s5687_s17 = smov 0   ;;  %s5689_s18 = smov 0  }
   0x6   :  { %s5691_s19 = smov 0   ;;  %s5693_s20 = smov 0  }
   0x7   :  { %s5695_s21 = smov 0   ;;  %s5697_s22 = smov 0  }
   0x8 LB: > { %s4272_s23 = sadd.s32 4294967295, %s5616_s22   ;;  %s4273_s24 = sadd.s32 4294967294, %s5616_s22   ;;  %s5616_s22 = sphi %s5697_s22, %s25_s22   ;;  %s5612_s21 = sphi %s5695_s21, %s7163_s21   ;;  %s5608_s20 = sphi %s5693_s20, %s7162_s20   ;;  %s5604_s19 = sphi %s5691_s19, %s7161_s19   ;;  %s5600_s18 = sphi %s5689_s18, %s7160_s18   ;;  %s5596_s17 = sphi %s5687_s17, %s7159_s17  }
   0x9   : > { %s37_s25 = sadd.s32 1, %s5612_s21  ;;  %s294_s26 = sadd.s32 1, %s5604_s19 }
   0xa   : > { %p39_p0 = scmp.ge.s32.totalorder %s37_s25, 2  ;;  %p304_p1 = scmp.ne.s32.totalorder %s5604_s19, %s5600_s18 }
   0xb   : > { %p305_p2 = scmp.eq.s32.totalorder %s4272_s23, 1  ;;  %p310_p3 = scmp.ne.s32.totalorder %s5600_s18, %s5596_s17 }
   0xc   : > { %s7165_s25 = smov (%p39_p0, %s37_s25), 0  ;;  %p311_p5 = scmp.eq.s32.totalorder %s4273_s24, 1 }
   0xd   : > { %p5727_p4 = por %p305_p2, %p304_p1  ;;  %s289_s28 = ssub.s32 %s5612_s21, %s7165_s25 }
   0xe   : > { %p4276_p6 = scmp.ge.s32.totalorder %s5616_s22, 1  ;;  %p292_p7 = scmp.eq.s32.totalorder %s289_s28, 0 }
   0xf   : > { %p5734_p8 = por %p311_p5, %p310_p3  ;;  %p369_p9 = scmp.lt.s32.totalorder %s5616_s22, 3 }
  0x10   : > { %s5740_s30 = scalar_select %p292_p7, %s5604_s19, %s294_s26  }
  0x11   : > { %p370_p10 = pnand %p4276_p6, %p369_p9 }
  0x13   : > { %373 = sbr.rel (%p370_p10) target bundleno = 1612 (0x64c), region = 60 }
  0x18   : > { %s7085_s4 = sld [smem:[#allocation46_spill]]  ;;  %p423_p11 = scmp.lt.s32.totalorder %s5608_s20, 1  ;;  %v5192_v2 = vld [vmem:[%s7035_s3] sm:$0xff]   ;;  %vm503_vm0 = vcmask 261120   ;;  %v5618_v3 = vmov 0   ;;  %v5193_v9 = vld [vmem:[%s7035_s3 + $0x8] sm:$0xff]  }
  0x19   : > { %4849 = vmatprep.mubr.msk.bf16.mxu0 %vm503_vm0, %v5192_v2  ;;  %s7086_s0 = sld [smem:[#allocation44_spill]]  ;;  %5184 = vset.pattern.permute.xlu0 %v5618_v3  ;;  %v5198_v13 = vld [vmem:[%s7034_s2 + $0x8] sm:$0xff]   ;;  %v5201_v17 = vld [vmem:[%s7034_s2] sm:$0xff]   ;;  %vm843_vm1 = vcmask 257024   ;;  %vm1232_vm2 = vcmask 1043456   ;;  %vm1207_vm3 = vcmask 64512  }
  0x1a   : > { %s5750_s16 = scalar_select %p423_p11, %s5608_s20, 1  ;;  %5185 = vset.pattern.permute.xlu1 %v5618_v3  ;;  %v457_v18 = vld [vmem:[%s7038_s6] sm:$0xff]  ;;  %v458_v20 = vld [vmem:[%s7038_s6 + $0x8] sm:$0xff]  ;;  %vm1774_vm5 = vcmask 60416   ;;  %vm2478_vm6 = vcmask 126016   ;;  %vm3182_vm7 = vcmask 191616  }
  0x1b   : > { %s7087_s1 = sld [smem:[#allocation45_spill]]  ;;  %463 = vperm.xlu0 %5184, %v457_v18   ;;  %v5817_v27 = vld [vmem:[%s7039_s7] ss:$0 sm:$0xff]  ;;  %s5619_s13 = smov 120   ;;  %vm3886_vm8 = vcmask 257216  }
  0x1c   : > { %s4596_s26 = sshll.u32 %s5750_s16, 6  ;;  %s4597_s28 = sshll.u32 %s5750_s16, 4 }
  0x1d   : > { %s7079_s15 = smov 8  }
  0x1e   : > { %v5186_v0 = vld [vmem:[%s7085_s4 + $0x8] sm:$0xff]   ;;  %v5187_v1 = vld [vmem:[%s7085_s4] sm:$0xff]  }
  0x1f   : > { %5113 = vmatprep.subr.bf16.mxu1 %v5186_v0  ;;  %s5761_s14 = scalar_lea.vmem %s7086_s0, %s4596_s26  ;;  %468 = vperm.xlu0 %5184, %v458_v20   ;;  %s5620_s26 = smov 112  }
  0x20   : > { %5115 = vmatpush3.bf16.msra.mxu1 %v5186_v0  ;;  %v5189_v5 = vld [vmem:[%s5761_s14 + $0x10] sm:$0xff]   ;;  %v5190_v6 = vld [vmem:[%s5761_s14 + $0x18] sm:$0xff]   ;;  %v5194_v8 = vld [vmem:[%s5761_s14 + $0x20] sm:$0xff]  }
  0x21   : > { %5114 = vmatprep.subr.bf16.mxu1 %v5187_v1  ;;  %s432_s23 = scalar_lea.vmem %s7087_s1, %s4597_s28  ;;  %4861 = vmatprep.mubr.msk.bf16.mxu1 %vm503_vm0, %v5189_v5  ;;  %v5196_v10 = vld [vmem:[%s5761_s14] sm:$0xff]   ;;  %v5195_v11 = vld [vmem:[%s5761_s14 + $0x28] sm:$0xff]   ;;  %v5199_v12 = vld [vmem:[%s5761_s14 + $0x30] sm:$0xff]   ;;  %s5621_s28 = smov 104  }
  0x22   : > { %v5188_v4 = vld [vmem:[%s432_s23 + $0x8] sm:$0xff]   ;;  %v5191_v7 = vld [vmem:[%s432_s23] sm:$0xff]   ;;  %v5200_v15 = vld [vmem:[%s5761_s14 + $0x38] sm:$0xff]   ;;  %s5623_s23 = smov 16  }
  0x23   : > { %4845 = vmatprep.subr.bf16.mxu0 %v5188_v4  ;;  %v5197_v14 = vld [vmem:[%s5761_s14 + $0x8] sm:$0xff]   ;;  %v5202_v16 = vld [vmem:[%s5761_s14] sm:$0xff]   ;;  %v5204_v21 = vld [vmem:[%s5761_s14 + $0x10] sm:$0xff]  }
  0x24   : > { %5116 = vmatpush3.bf16.msra.mxu1 %v5187_v1  ;;  %4846 = vmatpush3.bf16.msra.mxu0 %v5188_v4  ;;  %v5203_v19 = vld [vmem:[%s5761_s14 + $0x8] sm:$0xff]   ;;  %v5205_v22 = vld [vmem:[%s5761_s14 + $0x18] sm:$0xff]   ;;  %v5206_v23 = vld [vmem:[%s5761_s14 + $0x20] sm:$0xff]  }
  0x25   : > { %4847 = vmatprep.subr.bf16.mxu0 %v5191_v7  ;;  %v5207_v24 = vld [vmem:[%s5761_s14 + $0x28] sm:$0xff]   ;;  %v5208_v25 = vld [vmem:[%s5761_s14 + $0x30] sm:$0xff]   ;;  %v5209_v26 = vld [vmem:[%s5761_s14 + $0x38] sm:$0xff]   ;;  %s420_s14 = sand.u32 1, %s5600_s18  }
  0x26   : > { %s4277_s12 = sshll.u32 %s420_s14, 9 }
  0x27   : > { %4862 = vmatmul.mubr.msk.bf16.vlgmr.msra.gmra.mxu1 %vm503_vm0, %v5190_v6 }
  0x28   : > { %4865 = vmatprep.mubr.msk.bf16.mxu1 %vm503_vm0, %v5194_v8  ;;  %4848 = vmatpush3.bf16.msra.mxu0 %v5191_v7 }
  0x29   : > { %4853 = vmatprep.subr.bf16.mxu0 %v5186_v0 }
  0x2b   : > { %4850 = vmatmul.mubr.msk.bf16.vlgmr.msra.gmra.mxu0 %vm503_vm0, %v5193_v9 }
  0x2c   : > { %4854 = vmatpush3.bf16.msra.mxu0 %v5186_v0  ;;  %4857 = vmatprep.mubr.msk.bf16.mxu0 %vm503_vm0, %v5196_v10  ;;  %v5848_v10 = vld [vmem:[%s7037_s5] ss:$0 sm:$0xff] }
  0x2d   : > { %4855 = vmatprep.subr.bf16.mxu0 %v5187_v1 }
  0x2f   : > { %4866 = vmatmul.mubr.msk.bf16.gmra.mxu1 %vm503_vm0, %v5195_v11 }
  0x30   : > { %4869 = vmatprep.mubr.msk.bf16.mxu1 %vm503_vm0, %v5199_v12  ;;  %4856 = vmatpush3.bf16.msra.mxu0 %v5187_v1 }
  0x31   : > { %4873 = vmatprep.subr.bf16.mxu0 %v5198_v13 }
  0x33   : > { %4858 = vmatmul.mubr.msk.bf16.vlgmr.msra.gmra.mxu0 %vm503_vm0, %v5197_v14 }
  0x34   : > { %4874 = vmatpush3.bf16.msra.mxu0 %v5198_v13  ;;  %4877 = vmatprep.mubr.msk.bf16.mxu0 %vm503_vm0, %v5202_v16 }
  0x35   : > { %4875 = vmatprep.subr.bf16.mxu0 %v5201_v17 }
  0x37   : > { %4870 = vmatmul.mubr.msk.bf16.gmra.mxu1 %vm503_vm0, %v5200_v15 }
  0x38   : > { %4876 = vmatpush3.bf16.msra.mxu0 %v5201_v17 }
  0x3b   : > { %4878 = vmatmul.mubr.msk.bf16.vlgmr.msra.gmra.mxu0 %vm503_vm0, %v5203_v19 }
  0x3c   : > { %4881 = vmatprep.mubr.msk.bf16.mxu0 %vm503_vm0, %v5204_v21 }
  0x43   : > { %4882 = vmatmul.mubr.msk.bf16.gmra.mxu0 %vm503_vm0, %v5205_v22 }
  0x44   : > { %4885 = vmatprep.mubr.msk.bf16.mxu0 %vm503_vm0, %v5206_v23 }
  0x4b   : > { %4886 = vmatmul.mubr.msk.bf16.gmra.mxu0 %vm503_vm0, %v5207_v24 }
  0x4c   : > { %4889 = vmatprep.mubr.msk.bf16.mxu0 %vm503_vm0, %v5208_v25 }
  0x53   : > { %4890 = vmatmul.mubr.msk.bf16.gmra.mxu0 %vm503_vm0, %v5209_v26 }
  0x96   : > { %v464_v33 = vpop.permute.xlu0 %463 }
  0x9a   : > { %v469_v45 = vpop.permute.xlu0 %468 }
  0xe7   : > { %v4863_v28 = vpop.f32.mrf.mxu1 }
  0xe8   : > { %v741_v29 = vadd.f32 %v4863_v28, %v5817_v27 }
  0xe9   : > { %v732_v30 = vpop.f32.mrf.mxu1 }
  0xea   : > { %v4609_v31 = vpack.c.bf16 %v741_v29, %v741_v29  ;;  %v733_v32 = vadd.f32 %v5817_v27, %v732_v30 }
  0xeb   : > { %v4864_v34 = vpop.f32.mrf.mxu1  ;;  %v5823_v37 = vpop.f32.mrf.mxu0 }
  0xec   : > { %850 = vst.msk [vmem:[#allocation3 + $0x18] sm:$0xf] %vm843_vm1, %v4609_v31  ;;  %v4607_v35 = vpack.c.bf16 %v733_v32, %v733_v32  ;;  %v744_v36 = vadd.f32 %v4864_v34, %v5817_v27 }
  0xed   : > { %v735_v38 = vpop.f32.mrf.mxu1  ;;  %v544_v41 = vpop.f32.mrf.mxu0 }
  0xee   : > { %848 = vst.msk [vmem:[#allocation3 + $0x10] sm:$0xf] %vm843_vm1, %v4607_v35  ;;  %v4610_v39 = vpack.c.bf16 %v744_v36, %v744_v36  ;;  %v736_v40 = vadd.f32 %v5817_v27, %v735_v38  ;;  %v545_v52 = vadd.f32 %v544_v41, %v464_v33 }
  0xef   : > { %v4867_v42 = vpop.f32.mrf.mxu1  ;;  %v5829_v46 = vpop.f32.mrf.mxu0 }
  0xf0   : > { %851 = vst.msk [vmem:[#allocation3 + $0x1c] sm:$0xf] %vm843_vm1, %v4610_v39  ;;  %v4608_v43 = vpack.c.bf16 %v736_v40, %v736_v40  ;;  %v757_v44 = vadd.f32 %v4867_v42, %v5817_v27 }
  0xf1   : > { %v748_v47 = vpop.f32.mrf.mxu1  ;;  %v547_v50 = vpop.f32.mrf.mxu0 }
  0xf2   : > { %849 = vst.msk [vmem:[#allocation3 + $0x14] sm:$0xf] %vm843_vm1, %v4608_v43  ;;  %v4613_v48 = vpack.c.bf16 %v757_v44, %v757_v44  ;;  %v749_v49 = vadd.f32 %v5817_v27, %v748_v47  ;;  %v548_v54 = vadd.f32 %v547_v50, %v469_v45 }
  0xf3   : > { %v4868_v51 = vpop.f32.mrf.mxu1  ;;  %v4859_v56 = vpop.f32.mrf.mxu0 }
  0xf4   : > { %854 = vst.msk [vmem:[#allocation3 + $0x28] sm:$0xf] %vm843_vm1, %v4613_v48  ;;  %v4611_v53 = vpack.c.bf16 %v749_v49, %v749_v49  ;;  %v760_v55 = vadd.f32 %v4868_v51, %v5817_v27  ;;  %v4703_v58 = vpack.c.bf16 %v548_v54, %v545_v52  ;;  %v725_v60 = vadd.f32 %v4859_v56, %v5817_v27 }
  0xf5   : > { %v751_v57 = vpop.f32.mrf.mxu1  ;;  %v716_v62 = vpop.f32.mrf.mxu0 }
  0xf6   : > { %852 = vst.msk [vmem:[#allocation3 + $0x20] sm:$0xf] %vm843_vm1, %v4611_v53  ;;  %v4614_v59 = vpack.c.bf16 %v760_v55, %v760_v55  ;;  %v752_v61 = vadd.f32 %v5817_v27, %v751_v57  ;;  %4704 = vst [vmem:[#allocation2] sm:$0xff] %v4703_v58   ;;  %v4605_v0 = vpack.c.bf16 %v725_v60, %v725_v60 }
  0xf7   : > { %v4871_v63 = vpop.f32.mrf.mxu1  ;;  %v717_v2 = vadd.f32 %v5817_v27, %v716_v62  ;;  %v4860_v4 = vpop.f32.mrf.mxu0 }
  0xf8   : > { %855 = vst.msk [vmem:[#allocation3 + $0x2c] sm:$0xf] %vm843_vm1, %v4614_v59  ;;  %v4612_v1 = vpack.c.bf16 %v752_v61, %v752_v61  ;;  %v773_v3 = vadd.f32 %v4871_v63, %v5817_v27  ;;  %846 = vst.msk [vmem:[#allocation3 + $0x8] sm:$0xf] %vm843_vm1, %v4605_v0  ;;  %v728_v8 = vadd.f32 %v4860_v4, %v5817_v27  ;;  %v5218_v0 = vld [vmem:[#allocation3 + $0x18] sm:$0xff]  }
  0xf9   : > { %v764_v5 = vpop.f32.mrf.mxu1  ;;  %v4603_v6 = vpack.c.bf16 %v717_v2, %v717_v2  ;;  %v719_v11 = vpop.f32.mrf.mxu0 }
  0xfa   : > { %853 = vst.msk [vmem:[#allocation3 + $0x24] sm:$0xf] %vm843_vm1, %v4612_v1  ;;  %v4617_v7 = vpack.c.bf16 %v773_v3, %v773_v3  ;;  %v765_v9 = vadd.f32 %v5817_v27, %v764_v5  ;;  %v4606_v13 = vpack.c.bf16 %v728_v8, %v728_v8  ;;  %v720_v15 = vadd.f32 %v5817_v27, %v719_v11 }
  0xfb   : > { %v4872_v12 = vpop.f32.mrf.mxu1  ;;  %844 = vst.msk [vmem:[#allocation3] sm:$0xf] %vm843_vm1, %v4603_v6  ;;  %v4879_v17 = vpop.f32.mrf.mxu0 }
  0xfc   : > { %858 = vst.msk [vmem:[#allocation3 + $0x38] sm:$0xf] %vm843_vm1, %v4617_v7  ;;  %v4615_v14 = vpack.c.bf16 %v765_v9, %v765_v9  ;;  %v776_v16 = vadd.f32 %v4872_v12, %v5817_v27  ;;  %847 = vst.msk [vmem:[#allocation3 + $0xc] sm:$0xf] %vm843_vm1, %v4606_v13  ;;  %v4604_v19 = vpack.c.bf16 %v720_v15, %v720_v15  ;;  %v5223_v13 = vld [vmem:[#allocation3 + $0x10] sm:$0xff]  }
  0xfd   : > { %v767_v18 = vpop.f32.mrf.mxu1  ;;  %v1012_v21 = vadd.f32 %v4879_v17, %v5848_v10  ;;  %v1003_v23 = vpop.f32.mrf.mxu0  ;;  %v1166_v24 = vld [vmem:[#allocation2] sm:$0xf]  ;;  %v1807_v31 = vld [vmem:[#allocation2 + $0x4] sm:$0xf] }
  0xfe   : > { %856 = vst.msk [vmem:[#allocation3 + $0x30] sm:$0xf] %vm843_vm1, %v4615_v14  ;;  %v4618_v20 = vpack.c.bf16 %v776_v16, %v776_v16  ;;  %v768_v22 = vadd.f32 %v5817_v27, %v767_v18  ;;  %845 = vst.msk [vmem:[#allocation3 + $0x4] sm:$0xf] %vm843_vm1, %v4604_v19  ;;  %v1004_v28 = vadd.f32 %v5848_v10, %v1003_v23  ;;  %5117 = vmatprep.subr.msk.bf16.mxu1 %vm1232_vm2, %v1166_v24 }
  0xff   : > { %v4621_v25 = vpack.c.bf16 %v1012_v21, %v1012_v21  ;;  %v1234_v29 = vsel %vm1232_vm2, %v1166_v24, 0  ;;  %v4880_v30 = vpop.f32.mrf.mxu0  ;;  %v5212_v47 = vld [vmem:[#allocation3 + $0x28] sm:$0xff]   ;;  %v1889_v3 = vsel %vm1232_vm2, %v1807_v31, 0 }
 0x100   : > { %859 = vst.msk [vmem:[#allocation3 + $0x3c] sm:$0xf] %vm843_vm1, %v4618_v20  ;;  %v4616_v26 = vpack.c.bf16 %v768_v22, %v768_v22  ;;  %4894 = vmatpush3.bf16.msra.mxu1 %v1234_v29  ;;  %v4619_v27 = vpack.c.bf16 %v1004_v28, %v1004_v28  ;;  %v1015_v32 = vadd.f32 %v4880_v30, %v5848_v10  ;;  %v459_v20 = vld [vmem:[%s7038_s6 + $0x10] sm:$0xff]  ;;  %v460_v24 = vld [vmem:[%s7038_s6 + $0x18] sm:$0xff] }
 0x101   : > { %1133 = vst.msk [vmem:[#allocation4 + $0x8] sm:$0xf] %vm843_vm1, %v4621_v25  ;;  %5118 = vmatprep.subr.msk.bf16.mxu1 %vm1232_vm2, %v1807_v31  ;;  %v1006_v33 = vpop.f32.mrf.mxu0  ;;  %v5216_v56 = vld [vmem:[#allocation3 + $0x20] sm:$0xff]  }
 0x102   : > { %857 = vst.msk [vmem:[#allocation3 + $0x34] sm:$0xf] %vm843_vm1, %v4616_v26  ;;  %1131 = vst.msk [vmem:[#allocation4] sm:$0xf] %vm843_vm1, %v4619_v27  ;;  %v4622_v34 = vpack.c.bf16 %v1015_v32, %v1015_v32  ;;  %v1007_v35 = vadd.f32 %v5848_v10, %v1006_v33 }
 0x103   : > { %v4883_v36 = vpop.f32.mrf.mxu0  ;;  %v5224_v29 = vld [vmem:[#allocation3 + $0x8] sm:$0xff]  }
 0x104   : > { %1134 = vst.msk [vmem:[#allocation4 + $0xc] sm:$0xf] %vm843_vm1, %v4622_v34  ;;  %v4620_v38 = vpack.c.bf16 %v1007_v35, %v1007_v35  ;;  %v1028_v39 = vadd.f32 %v4883_v36, %v5848_v10 }
 0x105   : > { %v1019_v40 = vpop.f32.mrf.mxu0  ;;  %v5228_v33 = vld [vmem:[#allocation3] sm:$0xff]  }
 0x106   : > { %1132 = vst.msk [vmem:[#allocation4 + $0x4] sm:$0xf] %vm843_vm1, %v4620_v38  ;;  %v4625_v42 = vpack.c.bf16 %v1028_v39, %v1028_v39  ;;  %v1020_v43 = vadd.f32 %v5848_v10, %v1019_v40 }
 0x107   : > { %v5210_v41 = vld [vmem:[#allocation3 + $0x38] sm:$0xff]   ;;  %v4884_v44 = vpop.f32.mrf.mxu0 }
 0x108   : > { %4911 = vmatprep.subr.bf16.mxu0 %v5210_v41  ;;  %1137 = vst.msk [vmem:[#allocation4 + $0x18] sm:$0xf] %vm843_vm1, %v4625_v42  ;;  %v4623_v48 = vpack.c.bf16 %v1020_v43, %v1020_v43  ;;  %v1031_v49 = vadd.f32 %v4884_v44, %v5848_v10 }
 0x109   : > { %v5211_v45 = vld [vmem:[#allocation3 + $0x30] sm:$0xff]   ;;  %4912 = vmatpush3.bf16.msra.mxu0 %v5210_v41  ;;  %v1022_v50 = vpop.f32.mrf.mxu0 }
 0x10a   : > { %4913 = vmatprep.subr.bf16.mxu0 %v5211_v45  ;;  %1135 = vst.msk [vmem:[#allocation4 + $0x10] sm:$0xf] %vm843_vm1, %v4623_v48  ;;  %v4626_v51 = vpack.c.bf16 %v1031_v49, %v1031_v49  ;;  %v1023_v52 = vadd.f32 %v5848_v10, %v1022_v50 }
 0x10b   : > { %v4887_v53 = vpop.f32.mrf.mxu0  ;;  %v5215_v62 = vld [vmem:[#allocation4 + $0x8] sm:$0xff]  }
 0x10c   : > { %1138 = vst.msk [vmem:[#allocation4 + $0x1c] sm:$0xf] %vm843_vm1, %v4626_v51  ;;  %v4624_v54 = vpack.c.bf16 %v1023_v52, %v1023_v52  ;;  %v1044_v55 = vadd.f32 %v4887_v53, %v5848_v10  ;;  %v5217_v4 = vld [vmem:[#allocation4 + $0x8] sm:$0xff]  }
 0x10d   : > { %4914 = vmatpush3.bf16.msra.mxu0 %v5211_v45  ;;  %v1035_v57 = vpop.f32.mrf.mxu0  ;;  %v5213_v58 = vld [vmem:[#allocation4] sm:$0xff]   ;;  %v5234_v39 = vld [vmem:[#allocation4 + $0x8] sm:$0xff]  }
 0x10e   : > { %4915 = vmatprep.subr.bf16.mxu0 %v5212_v47  ;;  %1136 = vst.msk [vmem:[#allocation4 + $0x14] sm:$0xf] %vm843_vm1, %v4624_v54  ;;  %v4629_v59 = vpack.c.bf16 %v1044_v55, %v1044_v55  ;;  %v1036_v60 = vadd.f32 %v5848_v10, %v1035_v57  ;;  %v5214_v61 = vld [vmem:[#allocation4] sm:$0xff]   ;;  %1848 = vrot.lane.b32.xlu1 %v5213_v58, %s5619_s13  ;;  %v5242_v48 = vld [vmem:[#allocation4 + $0x8] sm:$0xff]   ;;  %v5249_v55 = vld [vmem:[#allocation3 + $0x30] sm:$0xff]  }
 0x10f   : > { %v4888_v63 = vpop.f32.mrf.mxu0  ;;  %4895 = vmatprep.mubr.msk.bf16.mxu1 %vm1207_vm3, %v5214_v61  ;;  %v5235_v40 = vld [vmem:[#allocation4] sm:$0xff]   ;;  %v5251_v57 = vld [vmem:[#allocation3 + $0x28] sm:$0xff]  }
 0x110   : > { %1141 = vst.msk [vmem:[#allocation4 + $0x28] sm:$0xf] %vm843_vm1, %v4629_v59  ;;  %v4627_v1 = vpack.c.bf16 %v1036_v60, %v1036_v60  ;;  %v1047_v2 = vadd.f32 %v4888_v63, %v5848_v10  ;;  %4896 = vmatmul.mubr.msk.bf16.vlgmr.msra.gmra.mxu1 %vm1207_vm3, %v5215_v62  ;;  %v5252_v58 = vld [vmem:[#allocation3 + $0x20] sm:$0xff]   ;;  %v5253_v59 = vld [vmem:[#allocation3 + $0x10] sm:$0xff]   ;;  %v5254_v60 = vld [vmem:[#allocation3 + $0x18] sm:$0xff]  }
 0x111   : > { %4916 = vmatpush3.bf16.msra.mxu0 %v5212_v47  ;;  %v1038_v5 = vpop.f32.mrf.mxu0  ;;  %4944 = vmatpush3.bf16.msra.mxu1 %v1889_v3  ;;  %v5241_v47 = vld [vmem:[#allocation4] sm:$0xff]   ;;  %v5255_v61 = vld [vmem:[#allocation3 + $0x8] sm:$0xff]   ;;  %v5257_v63 = vld [vmem:[#allocation3 + $0x30] sm:$0xff]  }
 0x112   : > { %4917 = vmatprep.subr.bf16.mxu0 %v5216_v56  ;;  %1139 = vst.msk [vmem:[#allocation4 + $0x20] sm:$0xf] %vm843_vm1, %v4627_v1  ;;  %v4630_v6 = vpack.c.bf16 %v1047_v2, %v1047_v2  ;;  %v1039_v7 = vadd.f32 %v5848_v10, %v1038_v5  ;;  %1850 = vrot.lane.b32.xlu1 %v5217_v4, %s5619_s13  ;;  %v5256_v62 = vld [vmem:[#allocation3] sm:$0xff]   ;;  %v5259_v1 = vld [vmem:[#allocation3 + $0x28] sm:$0xff]   ;;  %v5261_v3 = vld [vmem:[#allocation3 + $0x10] sm:$0xff]  }
 0x113   : > { %v4891_v8 = vpop.f32.mrf.mxu0  ;;  %v5220_v12 = vld [vmem:[#allocation4 + $0x18] sm:$0xff]   ;;  %v5260_v2 = vld [vmem:[#allocation3 + $0x20] sm:$0xff]  }
 0x114   : > { %1142 = vst.msk [vmem:[#allocation4 + $0x2c] sm:$0xf] %vm843_vm1, %v4630_v6  ;;  %v4628_v9 = vpack.c.bf16 %v1039_v7, %v1039_v7  ;;  %v1060_v11 = vadd.f32 %v4891_v8, %v5848_v10  ;;  %v5222_v19 = vld [vmem:[#allocation4 + $0x18] sm:$0xff]   ;;  %v5264_v6 = vld [vmem:[#allocation3] sm:$0xff]   ;;  %v5265_v7 = vld [vmem:[#allocation3 + $0x8] sm:$0xff]  }
 0x115   : > { %4918 = vmatpush3.bf16.msra.mxu0 %v5216_v56  ;;  %v1051_v14 = vpop.f32.mrf.mxu0  ;;  %v5219_v15 = vld [vmem:[#allocation4 + $0x10] sm:$0xff]   ;;  %v5236_v41 = vld [vmem:[#allocation4 + $0x18] sm:$0xff]  }
 0x116   : > { %4919 = vmatprep.subr.bf16.mxu0 %v5218_v0  ;;  %1140 = vst.msk [vmem:[#allocation4 + $0x24] sm:$0xf] %vm843_vm1, %v4628_v9  ;;  %v4633_v16 = vpack.c.bf16 %v1060_v11, %v1060_v11  ;;  %v1052_v17 = vadd.f32 %v5848_v10, %v1051_v14  ;;  %v5221_v18 = vld [vmem:[#allocation4 + $0x10] sm:$0xff]   ;;  %1852 = vrot.lane.b32.xlu0 %v5219_v15, %s5619_s13  ;;  %v5244_v50 = vld [vmem:[#allocation4 + $0x18] sm:$0xff]   ;;  %v5269_v11 = vld [vmem:[#allocation3 + $0x20] sm:$0xff]  }
 0x117   : > { %v4892_v21 = vpop.f32.mrf.mxu0  ;;  %1854 = vrot.lane.b32.xlu1 %v5220_v12, %s5619_s13  ;;  %4899 = vmatprep.mubr.msk.bf16.mxu1 %vm1207_vm3, %v5221_v18  ;;  %v5237_v42 = vld [vmem:[#allocation4 + $0x10] sm:$0xff]   ;;  %v5250_v56 = vld [vmem:[#allocation3 + $0x38] sm:$0xff]   ;;  %v5268_v12 = vld [vmem:[#allocation3 + $0x28] sm:$0xff]  }
 0x118   : > { %1145 = vst.msk [vmem:[#allocation4 + $0x38] sm:$0xf] %vm843_vm1, %v4633_v16  ;;  %v4631_v22 = vpack.c.bf16 %v1052_v17, %v1052_v17  ;;  %v1063_v23 = vadd.f32 %v4892_v21, %v5848_v10  ;;  %4900 = vmatmul.mubr.msk.bf16.gmra.mxu1 %vm1207_vm3, %v5222_v19  ;;  %v5243_v49 = vld [vmem:[#allocation4 + $0x10] sm:$0xff]   ;;  %v5262_v4 = vld [vmem:[#allocation3 + $0x18] sm:$0xff]  }
 0x119   : > { %4920 = vmatpush3.bf16.msra.mxu0 %v5218_v0  ;;  %v1054_v25 = vpop.f32.mrf.mxu0  ;;  %v5258_v0 = vld [vmem:[#allocation3 + $0x38] sm:$0xff]   ;;  %v5266_v9 = vld [vmem:[#allocation3 + $0x30] sm:$0xff]  }
 0x11a   : > { %4921 = vmatprep.subr.bf16.mxu0 %v5223_v13  ;;  %1143 = vst.msk [vmem:[#allocation4 + $0x30] sm:$0xf] %vm843_vm1, %v4631_v22  ;;  %v4634_v26 = vpack.c.bf16 %v1063_v23, %v1063_v23  ;;  %v1055_v28 = vadd.f32 %v5848_v10, %v1054_v25  ;;  %473 = vperm.xlu0 %5184, %v459_v20   ;;  %v5267_v8 = vld [vmem:[#allocation3 + $0x38] sm:$0xff]   ;;  %v5270_v14 = vld [vmem:[#allocation3 + $0x10] sm:$0xff]  }
 0x11b   : > { %478 = vperm.xlu1 %5185, %v460_v24   ;;  %v5226_v31 = vld [vmem:[#allocation4 + $0x28] sm:$0xff]  }
 0x11c   : > { %1146 = vst.msk [vmem:[#allocation4 + $0x3c] sm:$0xf] %vm843_vm1, %v4634_v26  ;;  %v4632_v30 = vpack.c.bf16 %v1055_v28, %v1055_v28  ;;  %v5227_v27 = vld [vmem:[#allocation4 + $0x28] sm:$0xff]  }
 0x11d   : > { %4922 = vmatpush3.bf16.msra.mxu0 %v5223_v13  ;;  %v5225_v32 = vld [vmem:[#allocation4 + $0x20] sm:$0xff]   ;;  %v5238_v43 = vld [vmem:[#allocation4 + $0x28] sm:$0xff]   ;;  %v5271_v13 = vld [vmem:[#allocation3 + $0x18] sm:$0xff]  }
 0x11e   : > { %4923 = vmatprep.subr.bf16.mxu0 %v5224_v29  ;;  %1144 = vst.msk [vmem:[#allocation4 + $0x34] sm:$0xf] %vm843_vm1, %v4632_v30  ;;  %v5229_v34 = vld [vmem:[#allocation4 + $0x20] sm:$0xff]   ;;  %4903 = vmatprep.mubr.msk.bf16.mxu1 %vm1207_vm3, %v5225_v32  ;;  %v5246_v52 = vld [vmem:[#allocation4 + $0x28] sm:$0xff]  }
 0x11f   : > { %1858 = vrot.lane.b32.xlu1 %v5227_v27, %s5619_s13  ;;  %1856 = vrot.lane.b32.xlu0 %v5229_v34, %s5619_s13  ;;  %v5239_v44 = vld [vmem:[#allocation4 + $0x20] sm:$0xff]  }
 0x120   : > { %4904 = vmatmul.mubr.msk.bf16.gmra.mxu1 %vm1207_vm3, %v5226_v31  ;;  %v5245_v51 = vld [vmem:[#allocation4 + $0x20] sm:$0xff]  }
 0x121   : > { %4924 = vmatpush3.bf16.msra.mxu0 %v5224_v29 }
 0x122   : > { %4925 = vmatprep.subr.bf16.mxu0 %v5228_v33 }
 0x123   : > { %v5230_v10 = vld [vmem:[#allocation4 + $0x38] sm:$0xff]  }
 0x124   : > { %v5233_v35 = vld [vmem:[#allocation4 + $0x38] sm:$0xff]   ;;  %1862 = vrot.lane.b32.xlu1 %v5230_v10, %s5619_s13 }
 0x125   : > { %4926 = vmatpush3.bf16.msra.mxu0 %v5228_v33  ;;  %v5231_v36 = vld [vmem:[#allocation4 + $0x30] sm:$0xff]   ;;  %v5240_v45 = vld [vmem:[#allocation4 + $0x38] sm:$0xff]  }
 0x126   : > { %v5232_v38 = vld [vmem:[#allocation4 + $0x30] sm:$0xff]   ;;  %1860 = vrot.lane.b32.xlu0 %v5231_v36, %s5619_s13  ;;  %v5248_v54 = vld [vmem:[#allocation4 + $0x38] sm:$0xff]  }
 0x127   : > { %4907 = vmatprep.mubr.msk.bf16.mxu1 %vm1207_vm3, %v5232_v38  ;;  %v5247_v53 = vld [vmem:[#allocation4 + $0x30] sm:$0xff]  }
 0x128   : > { %4908 = vmatmul.mubr.msk.bf16.gmra.mxu1 %vm1207_vm3, %v5233_v35  ;;  %2554 = vrot.lane.b32.xlu1 %v5234_v39, %s5620_s26  ;;  %v5263_v5 = vld [vmem:[#allocation4 + $0x30] sm:$0xff]  }
 0x12a   : > { %2552 = vrot.lane.b32.xlu0 %v5235_v40, %s5620_s26 }
 0x12c   : > { %2558 = vrot.lane.b32.xlu1 %v5236_v41, %s5620_s26 }
 0x12e   : > { %2556 = vrot.lane.b32.xlu0 %v5237_v42, %s5620_s26 }
 0x130   : > { %2562 = vrot.lane.b32.xlu1 %v5238_v43, %s5620_s26 }
 0x132   : > { %2560 = vrot.lane.b32.xlu0 %v5239_v44, %s5620_s26 }
 0x134   : > { %2566 = vrot.lane.b32.xlu1 %v5240_v45, %s5620_s26 }
 0x136   : > { %3256 = vrot.lane.b32.xlu0 %v5241_v47, %s5621_s28 }
 0x138   : > { %3258 = vrot.lane.b32.xlu1 %v5242_v48, %s5621_s28 }
 0x13a   : > { %3260 = vrot.lane.b32.xlu0 %v5243_v49, %s5621_s28 }
 0x13c   : > { %3262 = vrot.lane.b32.xlu1 %v5244_v50, %s5621_s28  ;;  %v1147_v50 = vlaneseq }
 0x13e   : > { %3264 = vrot.lane.b32.xlu0 %v5245_v51, %s5621_s28 }
 0x140   : > { %3266 = vrot.lane.b32.xlu1 %v5246_v52, %s5621_s28  ;;  %v5992_v52 = vand.u32 127, %v1147_v50 }
 0x142   : > { %2564 = vrot.lane.b32.xlu0 %v5247_v53, %s5620_s26  ;;  %vm1149_vm4 = vcmp.lt.s32.totalorder %v5992_v52, 8 }
 0x144   : > { %3270 = vrot.lane.b32.xlu1 %v5248_v54, %s5621_s28 }
 0x146   : > { %2273 = vrot.lane.b32.xlu0 %v5249_v55, %s5619_s13 }
 0x148   : > { %2275 = vrot.lane.b32.xlu1 %v5250_v56, %s5619_s13 }
 0x14a   : > { %2271 = vrot.lane.b32.xlu0 %v5251_v57, %s5619_s13 }
 0x14c   : > { %2269 = vrot.lane.b32.xlu1 %v5252_v58, %s5619_s13 }
 0x14e   : > { %2265 = vrot.lane.b32.xlu0 %v5253_v59, %s5619_s13 }
 0x150   : > { %2267 = vrot.lane.b32.xlu1 %v5254_v60, %s5619_s13 }
 0x152   : > { %2263 = vrot.lane.b32.xlu0 %v5255_v61, %s5619_s13 }
 0x154   : > { %2261 = vrot.lane.b32.xlu1 %v5256_v62, %s5619_s13  ;;  %s6511_s13 = scalar_lea.vmem [#allocation6], %s4277_s12  ;;  %s5624_s12 = smov 24  }
 0x156   : > { %2977 = vrot.lane.b32.xlu0 %v5257_v63, %s5620_s26 }
 0x158   : > { %2979 = vrot.lane.b32.xlu1 %v5258_v0, %s5620_s26 }
 0x15a   : > { %2975 = vrot.lane.b32.xlu0 %v5259_v1, %s5620_s26 }
 0x15c   : > { %2973 = vrot.lane.b32.xlu1 %v5260_v2, %s5620_s26 }
 0x15e   : > { %2969 = vrot.lane.b32.xlu0 %v5261_v3, %s5620_s26 }
 0x160   : > { %2971 = vrot.lane.b32.xlu1 %v5262_v4, %s5620_s26 }
 0x162   : > { %3268 = vrot.lane.b32.xlu0 %v5263_v5, %s5621_s28 }
 0x164   : > { %2965 = vrot.lane.b32.xlu1 %v5264_v6, %s5620_s26 }
 0x166   : > { %2967 = vrot.lane.b32.xlu0 %v5265_v7, %s5620_s26 }
 0x168   : > { %3683 = vrot.lane.b32.xlu1 %v5267_v8, %s5621_s28 }
 0x16a   : > { %3681 = vrot.lane.b32.xlu0 %v5266_v9, %s5621_s28 }
 0x16c   : > { %3677 = vrot.lane.b32.xlu1 %v5269_v11, %s5621_s28 }
 0x16e   : > { %3679 = vrot.lane.b32.xlu0 %v5268_v12, %s5621_s28 }
 0x170   : > { %3675 = vrot.lane.b32.xlu1 %v5271_v13, %s5621_s28 }
 0x172   : > { %3673 = vrot.lane.b32.xlu0 %v5270_v14, %s5621_s28 }
 0x180   : > { %v1849_v15 = vpop.permute.xlu1 %1848 }
 0x181   : > { %4945 = vmatprep.mubr.msk.bf16.mxu1 %vm1207_vm3, %v1849_v15 }
 0x184   : > { %v1851_v16 = vpop.permute.xlu1 %1850 }
 0x185   : > { %4946 = vmatmul.mubr.msk.bf16.vlgmr.msra.gmra.mxu1 %vm1207_vm3, %v1851_v16 }
 0x188   : > { %v1853_v17 = vpop.permute.xlu0 %1852 }
 0x189   : > { %4949 = vmatprep.mubr.msk.bf16.mxu1 %vm1207_vm3, %v1853_v17  ;;  %v1855_v18 = vpop.permute.xlu1 %1854 }
 0x18d   : > { %4950 = vmatmul.mubr.msk.bf16.gmra.mxu1 %vm1207_vm3, %v1855_v18 }
 0x195   : > { %v474_v19 = vpop.permute.xlu0 %473 }
 0x196   : > { %v479_v20 = vpop.permute.xlu1 %478  ;;  %v553_v21 = vadd.f32 %v5823_v37, %v474_v19 }
 0x197   : > { %v556_v22 = vadd.f32 %v5829_v46, %v479_v20 }
 0x199   : > { %v4708_v23 = vpack.c.bf16 %v556_v22, %v553_v21  ;;  %v1857_v24 = vpop.permute.xlu0 %1856 }
 0x19a   : > { %v1859_v25 = vpop.permute.xlu1 %1858  ;;  %4953 = vmatprep.mubr.msk.bf16.mxu1 %vm1207_vm3, %v1857_v24 }
 0x19b   : > { %4710 = vst [vmem:[#allocation2 + $0x8] sm:$0xff] %v4708_v23   ;;  %4954 = vmatmul.mubr.msk.bf16.gmra.mxu1 %vm1207_vm3, %v1859_v25 }
 0x19d   : > { %v1861_v26 = vpop.permute.xlu0 %1860 }
 0x19e   : > { %v1863_v28 = vpop.permute.xlu1 %1862  ;;  %4957 = vmatprep.mubr.msk.bf16.mxu1 %vm1207_vm3, %v1861_v26 }
 0x1a1   : > { %v2553_v29 = vpop.permute.xlu0 %2552 }
 0x1a2   : > { %v2555_v30 = vpop.permute.xlu1 %2554  ;;  %v2511_v31 = vld [vmem:[#allocation2 + $0x8] sm:$0xf]  ;;  %v3215_v46 = vld [vmem:[#allocation2 + $0xc] sm:$0xf] }
 0x1a3   : > { %5119 = vmatprep.subr.msk.bf16.mxu1 %vm1232_vm2, %v2511_v31  ;;  %v2593_v37 = vsel %vm1232_vm2, %v2511_v31, 0  ;;  %4958 = vmatmul.mubr.msk.bf16.gmra.mxu1 %vm1207_vm3, %v1863_v28  ;;  %v3297_v10 = vsel %vm1232_vm2, %v3215_v46, 0 }
 0x1a4   : > { %4994 = vmatpush3.bf16.msra.mxu1 %v2593_v37  ;;  %4995 = vmatprep.mubr.msk.bf16.mxu1 %vm1207_vm3, %v2553_v29 }
 0x1a5   : > { %5120 = vmatprep.subr.msk.bf16.mxu1 %vm1232_vm2, %v3215_v46  ;;  %v2557_v27 = vpop.permute.xlu0 %2556 }
 0x1a6   : > { %v2559_v32 = vpop.permute.xlu1 %2558 }
 0x1a9   : > { %v2561_v33 = vpop.permute.xlu0 %2560 }
 0x1aa   : > { %v2563_v34 = vpop.permute.xlu1 %2562 }
 0x1ab   : > { %4996 = vmatmul.mubr.msk.bf16.vlgmr.msra.gmra.mxu1 %vm1207_vm3, %v2555_v30 }
 0x1ac   : > { %5044 = vmatpush3.bf16.msra.mxu1 %v3297_v10  ;;  %4999 = vmatprep.mubr.msk.bf16.mxu1 %vm1207_vm3, %v2557_v27 }
 0x1ad   : > { %v3257_v35 = vpop.permute.xlu0 %3256 }
 0x1ae   : > { %v2567_v36 = vpop.permute.xlu1 %2566 }
 0x1b1   : > { %v3261_v38 = vpop.permute.xlu0 %3260 }
 0x1b2   : > { %v3259_v39 = vpop.permute.xlu1 %3258 }
 0x1b3   : > { %5000 = vmatmul.mubr.msk.bf16.gmra.mxu1 %vm1207_vm3, %v2559_v32 }
 0x1b4   : > { %5003 = vmatprep.mubr.msk.bf16.mxu1 %vm1207_vm3, %v2561_v33 }
 0x1b5   : > { %v3265_v40 = vpop.permute.xlu0 %3264 }
 0x1b6   : > { %v3263_v41 = vpop.permute.xlu1 %3262 }
 0x1b9   : > { %v2565_v42 = vpop.permute.xlu0 %2564 }
 0x1ba   : > { %v3267_v43 = vpop.permute.xlu1 %3266 }
 0x1bb   : > { %5004 = vmatmul.mubr.msk.bf16.gmra.mxu1 %vm1207_vm3, %v2563_v34 }
 0x1bc   : > { %5007 = vmatprep.mubr.msk.bf16.mxu1 %vm1207_vm3, %v2565_v42 }
 0x1bd   : > { %v5977_v44 = vpop.permute.xlu0 %2273 }
 0x1be   : > { %v3271_v45 = vpop.permute.xlu1 %3270 }
 0x1c1   : > { %v5979_v47 = vpop.permute.xlu0 %2271 }
 0x1c2   : > { %v5981_v48 = vpop.permute.xlu1 %2275 }
 0x1c3   : > { %4961 = vmatprep.subr.bf16.mxu0 %v5981_v48  ;;  %5008 = vmatmul.mubr.msk.bf16.gmra.mxu1 %vm1207_vm3, %v2567_v36 }
 0x1c4   : > { %5045 = vmatprep.mubr.msk.bf16.mxu1 %vm1207_vm3, %v3257_v35 }
 0x1c5   : > { %v5986_v49 = vpop.permute.xlu0 %2265 }
 0x1c9   : > { %v5988_v51 = vpop.permute.xlu0 %2263 }
 0x1ca   : > { %7088 = vst [vmem:[#allocation9_spill] sm:$0xff] %v5988_v51 }
 0x1cb   : > { %5046 = vmatmul.mubr.msk.bf16.vlgmr.msra.gmra.mxu1 %vm1207_vm3, %v3259_v39 }
 0x1cc   : > { %5049 = vmatprep.mubr.msk.bf16.mxu1 %vm1207_vm3, %v3261_v38 }
 0x1cd   : > { %v5994_v53 = vpop.permute.xlu0 %2977 }
 0x1ce   : > { %7089 = vst [vmem:[#allocation10_spill] sm:$0xff] %v5994_v53 }
 0x1d0   : > { %v4897_v54 = vpop.f32.mrf.mxu1 }
 0x1d1   : > { %v1335_v55 = vmul.f32 0.35355338, %v4897_v54  ;;  %v5997_v56 = vpop.permute.xlu0 %2975 }
 0x1d2   : > { %7090 = vst [vmem:[#allocation11_spill] sm:$0xff] %v5997_v56  ;;  %v1270_v57 = vpop.f32.mrf.mxu1 }
 0x1d3   : > { %v1333_v58 = vmul.f32 0.35355338, %v1270_v57  ;;  %5050 = vmatmul.mubr.msk.bf16.gmra.mxu1 %vm1207_vm3, %v3263_v41  ;;  %v6002_v59 = vsel %vm1149_vm4, %v1335_v55, -1e+30 }
 0x1d4   : > { %1369 = vmax.xlane.f32.xlu0 %v6002_v59  ;;  %v4898_v60 = vpop.f32.mrf.mxu1  ;;  %5053 = vmatprep.mubr.msk.bf16.mxu1 %vm1207_vm3, %v3265_v40  ;;  %v6086_v40 = vpop.permute.xlu1 %2269 }
 0x1d5   : > { %v6006_v61 = vpop.permute.xlu0 %2969  ;;  %v1336_v63 = vmul.f32 0.35355338, %v4898_v60  ;;  %v6010_v1 = vsel %vm1149_vm4, %v1333_v58, -1e+30 }
 0x1d6   : > { %7091 = vst [vmem:[#allocation12_spill] sm:$0xff] %v6006_v61  ;;  %v1273_v62 = vpop.f32.mrf.mxu1 }
 0x1d7   : > { %v1334_v0 = vmul.f32 0.35355338, %v1273_v62  ;;  %v6021_v7 = vsel %vm1149_vm4, %v1336_v63, -1e+30 }
 0x1d8   : > { %1365 = vmax.xlane.f32.xlu0 %v6010_v1  ;;  %v4901_v2 = vpop.f32.mrf.mxu1  ;;  %v6088_v41 = vpop.permute.xlu1 %2267 }
 0x1d9   : > { %v1339_v3 = vmul.f32 0.35355338, %v4901_v2  ;;  %v6015_v4 = vsel %vm1149_vm4, %v1334_v0, -1e+30  ;;  %v3269_v6 = vpop.permute.xlu0 %3268 }
 0x1da   : > { %v1286_v5 = vpop.f32.mrf.mxu1  ;;  %1367 = vmax.xlane.f32.xlu1 %v6015_v4 }
 0x1db   : > { %5054 = vmatmul.mubr.msk.bf16.gmra.mxu1 %vm1207_vm3, %v3267_v43  ;;  %v1337_v9 = vmul.f32 0.35355338, %v1286_v5  ;;  %v6027_v12 = vsel %vm1149_vm4, %v1339_v3, -1e+30 }
 0x1dc   : > { %1371 = vmax.xlane.f32.xlu0 %v6021_v7  ;;  %v4902_v8 = vpop.f32.mrf.mxu1  ;;  %5057 = vmatprep.mubr.msk.bf16.mxu1 %vm1207_vm3, %v3269_v6  ;;  %v6090_v42 = vpop.permute.xlu1 %2261 }
 0x1dd   : > { %v1340_v11 = vmul.f32 0.35355338, %v4902_v8  ;;  %v6037_v18 = vsel %vm1149_vm4, %v1337_v9, -1e+30  ;;  %7092 = vst [vmem:[#allocation13_spill] sm:$0xff] %v6090_v42  ;;  %v6098_v58 = vpop.permute.xlu0 %2967 }
 0x1de   : > { %v1289_v13 = vpop.f32.mrf.mxu1  ;;  %1377 = vmax.xlane.f32.xlu1 %v6027_v12  ;;  %7094 = vst [vmem:[#allocation15_spill] sm:$0xff] %v6098_v58 }
 0x1df   : > { %v1338_v14 = vmul.f32 0.35355338, %v1289_v13  ;;  %v6032_v15 = vsel %vm1149_vm4, %v1340_v11, -1e+30 }
 0x1e0   : > { %1379 = vmax.xlane.f32.xlu0 %v6032_v15  ;;  %v4905_v16 = vpop.f32.mrf.mxu1 }
 0x1e1   : > { %v1343_v17 = vmul.f32 0.35355338, %v4905_v16  ;;  %v6043_v20 = vsel %vm1149_vm4, %v1338_v14, -1e+30  ;;  %v6111_v6 = vpop.permute.xlu0 %3681 }
 0x1e2   : > { %v1302_v19 = vpop.f32.mrf.mxu1  ;;  %1373 = vmax.xlane.f32.xlu1 %v6037_v18  ;;  %7096 = vst [vmem:[#allocation17_spill] sm:$0xff] %v6111_v6 }
 0x1e3   : > { %5058 = vmatmul.mubr.msk.bf16.gmra.mxu1 %vm1207_vm3, %v3271_v45  ;;  %v6047_v21 = vsel %vm1149_vm4, %v1343_v17, -1e+30  ;;  %v1341_v23 = vmul.f32 0.35355338, %v1302_v19  ;;  %v6092_v45 = vpop.permute.xlu1 %2979 }
 0x1e4   : > { %1375 = vmax.xlane.f32.xlu0 %v6043_v20  ;;  %v4906_v22 = vpop.f32.mrf.mxu1  ;;  %7093 = vst [vmem:[#allocation14_spill] sm:$0xff] %v6092_v45 }
 0x1e5   : > { %v1344_v24 = vmul.f32 0.35355338, %v4906_v22  ;;  %v6058_v31 = vsel %vm1149_vm4, %v1341_v23, -1e+30  ;;  %v6127_v23 = vpop.permute.xlu0 %3679 }
 0x1e6   : > { %v1305_v25 = vpop.f32.mrf.mxu1  ;;  %1385 = vmax.xlane.f32.xlu1 %v6047_v21  ;;  %7098 = vst [vmem:[#allocation19_spill] sm:$0xff] %v6127_v23 }
 0x1e7   : > { %v1342_v26 = vmul.f32 0.35355338, %v1305_v25  ;;  %v6053_v28 = vsel %vm1149_vm4, %v1344_v24, -1e+30  ;;  %v6101_v0 = vpop.permute.xlu1 %2973 }
 0x1e8   : > { %1387 = vmax.xlane.f32.xlu0 %v6053_v28  ;;  %v4909_v29 = vpop.f32.mrf.mxu1  ;;  %7095 = vst [vmem:[#allocation16_spill] sm:$0xff] %v6101_v0 }
 0x1e9   : > { %v1347_v30 = vmul.f32 0.35355338, %v4909_v29  ;;  %v6063_v46 = vsel %vm1149_vm4, %v1342_v26, -1e+30 }
 0x1ea   : > { %v1318_v37 = vpop.f32.mrf.mxu1  ;;  %1381 = vmax.xlane.f32.xlu1 %v6058_v31 }
 0x1eb   : > { %v6067_v27 = vsel %vm1149_vm4, %v1347_v30, -1e+30  ;;  %v1345_v33 = vmul.f32 0.35355338, %v1318_v37  ;;  %v6125_v19 = vpop.permute.xlu1 %2971 }
 0x1ec   : > { %1383 = vmax.xlane.f32.xlu0 %v6063_v46  ;;  %v4910_v32 = vpop.f32.mrf.mxu1  ;;  %7097 = vst [vmem:[#allocation18_spill] sm:$0xff] %v6125_v19 }
 0x1ed   : > { %v1348_v34 = vmul.f32 0.35355338, %v4910_v32  ;;  %v6078_v38 = vsel %vm1149_vm4, %v1345_v33, -1e+30  ;;  %v6145_v32 = vpop.permute.xlu0 %3673 }
 0x1ee   : > { %1393 = vmax.xlane.f32.xlu1 %v6067_v27  ;;  %v1321_v10 = vpop.f32.mrf.mxu1  ;;  %7100 = vst [vmem:[#allocation21_spill] sm:$0xff] %v6145_v32 }
 0x1ef   : > { %v6073_v35 = vsel %vm1149_vm4, %v1348_v34, -1e+30  ;;  %v1346_v36 = vmul.f32 0.35355338, %v1321_v10  ;;  %v6139_v30 = vpop.permute.xlu1 %2965 }
 0x1f0   : > { %1395 = vmax.xlane.f32.xlu0 %v6073_v35  ;;  %7099 = vst [vmem:[#allocation20_spill] sm:$0xff] %v6139_v30 }
 0x1f1   : > { %v6083_v39 = vsel %vm1149_vm4, %v1346_v36, -1e+30 }
 0x1f2   : > { %1389 = vmax.xlane.f32.xlu1 %v6078_v38 }
 0x1f3   : > { %v6148_v34 = vpop.permute.xlu1 %3683 }
 0x1f4   : > { %1391 = vmax.xlane.f32.xlu0 %v6083_v39  ;;  %7101 = vst [vmem:[#allocation22_spill] sm:$0xff] %v6148_v34 }
 0x245   : > { %v4947_v43 = vpop.f32.mrf.mxu1 }
 0x246   : > { %v1990_v50 = vmul.f32 0.35355338, %v4947_v43 }
 0x247   : > { %v1925_v54 = vpop.f32.mrf.mxu1 }
 0x248   : > { %v1988_v55 = vmul.f32 0.35355338, %v1925_v54  ;;  %v6096_v57 = vsel %vm1149_vm4, %v1990_v50, -1e+30 }
 0x249   : > { %v4948_v60 = vpop.f32.mrf.mxu1  ;;  %2024 = vmax.xlane.f32.xlu1 %v6096_v57 }
 0x24a   : > { %v1991_v62 = vmul.f32 0.35355338, %v4948_v60  ;;  %v6109_v5 = vsel %vm1149_vm4, %v1988_v55, -1e+30 }
 0x24b   : > { %v1928_v63 = vpop.f32.mrf.mxu1 }
 0x24c   : > { %v1989_v2 = vmul.f32 0.35355338, %v1928_v63  ;;  %v6105_v3 = vsel %vm1149_vm4, %v1991_v62, -1e+30 }
 0x24d   : > { %v4951_v8 = vpop.f32.mrf.mxu1  ;;  %2026 = vmax.xlane.f32.xlu0 %v6105_v3  ;;  %2020 = vmax.xlane.f32.xlu1 %v6109_v5 }
 0x24e   : > { %v1994_v9 = vmul.f32 0.35355338, %v4951_v8  ;;  %v6117_v14 = vsel %vm1149_vm4, %v1989_v2, -1e+30 }
 0x24f   : > { %v1941_v11 = vpop.f32.mrf.mxu1 }
 0x250   : > { %v1992_v13 = vmul.f32 0.35355338, %v1941_v11  ;;  %v6121_v16 = vsel %vm1149_vm4, %v1994_v9, -1e+30  ;;  %v6163_v11 = vpop.permute.xlu1 %3677 }
 0x251   : > { %v4952_v17 = vpop.f32.mrf.mxu1  ;;  %2022 = vmax.xlane.f32.xlu0 %v6117_v14  ;;  %2032 = vmax.xlane.f32.xlu1 %v6121_v16  ;;  %7102 = vst [vmem:[#allocation23_spill] sm:$0xff] %v6163_v11 }
 0x252   : > { %v1995_v22 = vmul.f32 0.35355338, %v4952_v17  ;;  %v6135_v29 = vsel %vm1149_vm4, %v1992_v13, -1e+30 }
 0x253   : > { %v1944_v24 = vpop.f32.mrf.mxu1 }
 0x254   : > { %v1993_v25 = vmul.f32 0.35355338, %v1944_v24  ;;  %v6131_v26 = vsel %vm1149_vm4, %v1995_v22, -1e+30 }
 0x255   : > { %2034 = vmax.xlane.f32.xlu0 %v6131_v26  ;;  %2028 = vmax.xlane.f32.xlu1 %v6135_v29 }
 0x256   : > { %v6143_v37 = vsel %vm1149_vm4, %v1993_v25, -1e+30 }
 0x259   : > { %2030 = vmax.xlane.f32.xlu0 %v6143_v37 }
 0x25b   : > { %v4955_v33 = vpop.f32.mrf.mxu1 }
 0x25c   : > { %v1998_v10 = vmul.f32 0.35355338, %v4955_v33 }
 0x25d   : > { %v1370_v36 = vpop.xlane.xlu0 %1369  ;;  %v1957_v43 = vpop.f32.mrf.mxu1 }
 0x25e   : > { %v1996_v50 = vmul.f32 0.35355338, %v1957_v43  ;;  %v6152_v54 = vsel %vm1149_vm4, %v1998_v10, -1e+30  ;;  %v1399_v24 = vsub.f32 %v6002_v59, %v1370_v36 }
 0x25f   : > { %v4956_v55 = vpop.f32.mrf.mxu1  ;;  %2040 = vmax.xlane.f32.xlu1 %v6152_v54 }
 0x260   : > { %v1999_v60 = vmul.f32 0.35355338, %v4956_v55  ;;  %v6161_v9 = vsel %vm1149_vm4, %v1996_v50, -1e+30  ;;  %v1417_v59 = vmul.f32 1.442695, %v1399_v24 }
 0x261   : > { %v1366_v62 = vpop.xlane.xlu0 %1365  ;;  %v1960_v63 = vpop.f32.mrf.mxu1 }
 0x262   : > { %v1997_v2 = vmul.f32 0.35355338, %v1960_v63  ;;  %v6157_v8 = vsel %vm1149_vm4, %v1999_v60, -1e+30  ;;  %v6178_v60 = vpop.permute.xlu1 %3675  ;;  %5284 = vpow2.f32 %v1417_v59 }
 0x263   : > { %v4959_v13 = vpop.f32.mrf.mxu1  ;;  %2042 = vmax.xlane.f32.xlu0 %v6157_v8  ;;  %2036 = vmax.xlane.f32.xlu1 %v6161_v9  ;;  %7103 = vst [vmem:[#allocation24_spill] sm:$0xff] %v6178_v60 }
 0x264   : > { %v2002_v17 = vmul.f32 0.35355338, %v4959_v13  ;;  %v6170_v25 = vsel %vm1149_vm4, %v1997_v2, -1e+30 }
 0x265   : > { %v1973_v22 = vpop.f32.mrf.mxu1  ;;  %v1372_v33 = vpop.xlane.xlu0 %1371 }
 0x266   : > { %v2000_v10 = vmul.f32 0.35355338, %v1973_v22  ;;  %v6175_v50 = vsel %vm1149_vm4, %v2002_v17, -1e+30  ;;  %v1400_v36 = vsub.f32 %v6021_v7, %v1372_v33  ;;  %v1397_v7 = vsub.f32 %v6010_v1, %v1366_v62 }
 0x267   : > { %v4960_v43 = vpop.f32.mrf.mxu1  ;;  %2038 = vmax.xlane.f32.xlu0 %v6170_v25  ;;  %2048 = vmax.xlane.f32.xlu1 %v6175_v50 }
 0x268   : > { %v2003_v55 = vmul.f32 0.35355338, %v4960_v43  ;;  %v6187_v32 = vsel %vm1149_vm4, %v2000_v10, -1e+30  ;;  %v1368_v43 = vpop.xlane.xlu1 %1367  ;;  %v1419_v24 = vmul.f32 1.442695, %v1400_v36 }
 0x269   : > { %v1976_v63 = vpop.f32.mrf.mxu1  ;;  %v1413_v59 = vmul.f32 1.442695, %v1397_v7  ;;  %v1398_v1 = vsub.f32 %v6015_v4, %v1368_v43 }
 0x26a   : > { %v2001_v2 = vmul.f32 0.35355338, %v1976_v63  ;;  %v6183_v22 = vsel %vm1149_vm4, %v2003_v55, -1e+30  ;;  %5286 = vpow2.f32 %v1419_v24 }
 0x26b   : > { %v4997_v13 = vpop.f32.mrf.mxu1  ;;  %2050 = vmax.xlane.f32.xlu0 %v6183_v22  ;;  %2044 = vmax.xlane.f32.xlu1 %v6187_v32  ;;  %5288 = vpow2.f32 %v1413_v59  ;;  %v1415_v4 = vmul.f32 1.442695, %v1398_v1 }
 0x26c   : > { %v2694_v17 = vmul.f32 0.35355338, %v4997_v13  ;;  %v6194_v55 = vsel %vm1149_vm4, %v2001_v2, -1e+30  ;;  %v1378_v62 = vpop.xlane.xlu1 %1377 }
 0x26d   : > { %v2629_v60 = vpop.f32.mrf.mxu1  ;;  %v1403_v43 = vsub.f32 %v6027_v12, %v1378_v62  ;;  %5290 = vpow2.f32 %v1415_v4 }
 0x26e   : > { %v2692_v33 = vmul.f32 0.35355338, %v2629_v60  ;;  %v6198_v10 = vsel %vm1149_vm4, %v2694_v17, -1e+30 }
 0x26f   : > { %v4998_v63 = vpop.f32.mrf.mxu1  ;;  %2046 = vmax.xlane.f32.xlu0 %v6194_v55  ;;  %2728 = vmax.xlane.f32.xlu1 %v6198_v10  ;;  %v1425_v59 = vmul.f32 1.442695, %v1403_v43  ;;  %v6225_v1 = vpop.eup %5284 }
 0x270   : > { %v2695_v13 = vmul.f32 0.35355338, %v4998_v63  ;;  %v6209_v17 = vsel %vm1149_vm4, %v2692_v33, -1e+30  ;;  %v1374_v62 = vpop.xlane.xlu1 %1373 }
 0x271   : > { %v2632_v11 = vpop.f32.mrf.mxu1  ;;  %5292 = vpow2.f32 %v1425_v59  ;;  %v1401_v4 = vsub.f32 %v6037_v18, %v1374_v62 }
 0x272   : > { %v2693_v60 = vmul.f32 0.35355338, %v2632_v11  ;;  %v6205_v2 = vsel %vm1149_vm4, %v2695_v13, -1e+30  ;;  %v1380_v11 = vpop.xlane.xlu0 %1379 }
 0x273   : > { %v5001_v36 = vpop.f32.mrf.mxu1  ;;  %2730 = vmax.xlane.f32.xlu0 %v6205_v2  ;;  %2724 = vmax.xlane.f32.xlu1 %v6209_v17  ;;  %v1404_v12 = vsub.f32 %v6032_v15, %v1380_v11  ;;  %v1421_v58 = vmul.f32 1.442695, %v1401_v4 }
 0x274   : > { %v2698_v63 = vmul.f32 0.35355338, %v5001_v36  ;;  %v6216_v13 = vsel %vm1149_vm4, %v2693_v60, -1e+30  ;;  %v1386_v18 = vpop.xlane.xlu1 %1385 }
 0x275   : > { %v2645_v7 = vpop.f32.mrf.mxu1 }
 0x276   : > { %v6220_v33 = vsel %vm1149_vm4, %v2698_v63, -1e+30  ;;  %v2696_v6 = vmul.f32 0.35355338, %v2645_v7  ;;  %v1376_v15 = vpop.xlane.xlu0 %1375 }
 0x277   : > { %v5002_v24 = vpop.f32.mrf.mxu1  ;;  %2726 = vmax.xlane.f32.xlu0 %v6216_v13  ;;  %2736 = vmax.xlane.f32.xlu1 %v6220_v33  ;;  %v6234_v43 = vpop.eup %5286  ;;  %v1402_v59 = vsub.f32 %v6043_v20, %v1376_v15 }
 0x278   : > { %v2699_v36 = vmul.f32 0.35355338, %v5002_v24  ;;  %v1427_v24 = vmul.f32 1.442695, %v1404_v12  ;;  %v6238_v7 = vsel %vm1149_vm4, %v2696_v6, -1e+30  ;;  %v6243_v12 = vpop.eup %5288 }
 0x279   : > { %v2648_v23 = vpop.f32.mrf.mxu1  ;;  %v1423_v6 = vmul.f32 1.442695, %v1402_v59 }
 0x27a   : > { %v6229_v34 = vsel %vm1149_vm4, %v2699_v36, -1e+30  ;;  %v2697_v11 = vmul.f32 0.35355338, %v2648_v23  ;;  %5294 = vpow2.f32 %v1427_v24  ;;  %v1407_v24 = vsub.f32 %v6047_v21, %v1386_v18  ;;  %v6252_v4 = vpop.eup %5290  ;;  %v1388_v20 = vpop.xlane.xlu0 %1387 }
 0x27b   : > { %v5005_v60 = vpop.f32.mrf.mxu1  ;;  %2738 = vmax.xlane.f32.xlu0 %v6229_v34  ;;  %1449 = vadd.xlane.f32.xlu1 %v6225_v1  ;;  %5296 = vpow2.f32 %v1421_v58  ;;  %v1408_v58 = vsub.f32 %v6053_v28, %v1388_v20  ;;  %v1382_v21 = vpop.xlane.xlu1 %1381 }
 0x27c   : > { %v2702_v62 = vmul.f32 0.35355338, %v5005_v60  ;;  %v6247_v23 = vsel %vm1149_vm4, %v2697_v11, -1e+30  ;;  %5298 = vpow2.f32 %v1423_v6  ;;  %v1433_v11 = vmul.f32 1.442695, %v1407_v24 }
 0x27d   : > { %v2661_v63 = vpop.f32.mrf.mxu1  ;;  %v1405_v6 = vsub.f32 %v6058_v31, %v1382_v21 }
 0x27e   : > { %v6256_v60 = vsel %vm1149_vm4, %v2702_v62, -1e+30  ;;  %v6261_v59 = vpop.eup %5292  ;;  %v2700_v18 = vmul.f32 0.35355338, %v2661_v63  ;;  %5300 = vpow2.f32 %v1433_v11  ;;  %v1435_v62 = vmul.f32 1.442695, %v1408_v58  ;;  %v1384_v28 = vpop.xlane.xlu0 %1383 }
 0x27f   : > { %v5006_v30 = vpop.f32.mrf.mxu1  ;;  %1451 = vadd.xlane.f32.xlu0 %v6234_v43  ;;  %2732 = vmax.xlane.f32.xlu1 %v6238_v7  ;;  %v1406_v11 = vsub.f32 %v6063_v46, %v1384_v28  ;;  %v1394_v31 = vpop.xlane.xlu1 %1393 }
 0x280   : > { %v2703_v15 = vmul.f32 0.35355338, %v5006_v30  ;;  %v6274_v63 = vsel %vm1149_vm4, %v2700_v18, -1e+30  ;;  %5302 = vpow2.f32 %v1435_v62  ;;  %v1411_v62 = vsub.f32 %v6067_v27, %v1394_v31 }
 0x281   : > { %v2664_v36 = vpop.f32.mrf.mxu1  ;;  %v1431_v18 = vmul.f32 1.442695, %v1406_v11 }
 0x282   : > { %v6265_v30 = vsel %vm1149_vm4, %v2703_v15, -1e+30  ;;  %v2701_v20 = vmul.f32 0.35355338, %v2664_v36  ;;  %v1429_v15 = vmul.f32 1.442695, %v1405_v6  ;;  %v1396_v46 = vpop.xlane.xlu0 %1395 }
 0x283   : > { %v5009_v61 = vpop.f32.mrf.mxu1  ;;  %2734 = vmax.xlane.f32.xlu0 %v6247_v23  ;;  %1445 = vadd.xlane.f32.xlu1 %v6243_v12  ;;  %v1390_v27 = vpop.xlane.xlu1 %1389 }
 0x284   : > { %v2706_v21 = vmul.f32 0.35355338, %v5009_v61  ;;  %v6283_v36 = vsel %vm1149_vm4, %v2701_v20, -1e+30  ;;  %5304 = vpow2.f32 %v1429_v15  ;;  %v1441_v20 = vmul.f32 1.442695, %v1411_v62 }
 0x285   : > { %v2677_v19 = vpop.f32.mrf.mxu1  ;;  %5306 = vpow2.f32 %v1431_v18  ;;  %v1412_v15 = vsub.f32 %v6073_v35, %v1396_v46  ;;  %v1409_v18 = vsub.f32 %v6078_v38, %v1390_v27 }
 0x286   : > { %v6292_v61 = vsel %vm1149_vm4, %v2706_v21, -1e+30  ;;  %v2704_v31 = vmul.f32 0.35355338, %v2677_v19  ;;  %5308 = vpow2.f32 %v1441_v20  ;;  %v1392_v35 = vpop.xlane.xlu0 %1391 }
 0x287   : > { %2744 = vmax.xlane.f32.xlu1 %v6256_v60  ;;  %1447 = vadd.xlane.f32.xlu0 %v6252_v4  ;;  %v5010_v0 = vpop.f32.mrf.mxu1  ;;  %v6270_v24 = vpop.eup %5294  ;;  %v1443_v21 = vmul.f32 1.442695, %v1412_v15  ;;  %v1410_v20 = vsub.f32 %v6083_v39, %v1392_v35 }
 0x288   : > { %v6279_v58 = vpop.eup %5296  ;;  %v2707_v28 = vmul.f32 0.35355338, %v5010_v0  ;;  %v6310_v19 = vsel %vm1149_vm4, %v2704_v31, -1e+30 }
 0x289   : > { %v2680_v56 = vpop.f32.mrf.mxu1  ;;  %v6288_v6 = vpop.eup %5298  ;;  %5310 = vpow2.f32 %v1443_v21  ;;  %v1439_v31 = vmul.f32 1.442695, %v1410_v20 }
 0x28a   : > { %v6301_v0 = vsel %vm1149_vm4, %v2707_v28, -1e+30  ;;  %v2705_v46 = vmul.f32 0.35355338, %v2680_v56  ;;  %v1437_v28 = vmul.f32 1.442695, %v1409_v18 }
 0x28b   : > { %2746 = vmax.xlane.f32.xlu0 %v6265_v30  ;;  %1457 = vadd.xlane.f32.xlu1 %v6261_v59  ;;  %v5047_v53 = vpop.f32.mrf.mxu1  ;;  %v6297_v11 = vpop.eup %5300 }
 0x28c   : > { %v3398_v38 = vmul.f32 0.35355338, %v5047_v53  ;;  %v6319_v27 = vsel %vm1149_vm4, %v2705_v46, -1e+30  ;;  %5312 = vpow2.f32 %v1437_v28 }
 0x28d   : > { %v3333_v45 = vpop.f32.mrf.mxu1  ;;  %v6306_v62 = vpop.eup %5302  ;;  %5314 = vpow2.f32 %v1439_v31 }
 0x28e   : > { %7104 = vst [vmem:[#allocation25_spill] sm:$0xff] %v6306_v62  ;;  %v6327_v39 = vsel %vm1149_vm4, %v3398_v38, -1e+30  ;;  %v3396_v35 = vmul.f32 0.35355338, %v3333_v45 }
 0x28f   : > { %1459 = vadd.xlane.f32.xlu0 %v6270_v24  ;;  %2740 = vmax.xlane.f32.xlu1 %v6274_v63  ;;  %v5048_v42 = vpop.f32.mrf.mxu1 }
 0x290   : > { %v3399_v21 = vmul.f32 0.35355338, %v5048_v42  ;;  %v6343_v38 = vsel %vm1149_vm4, %v3396_v35, -1e+30 }
 0x291   : > { %v3336_v51 = vpop.f32.mrf.mxu1  ;;  %v6315_v15 = vpop.eup %5304  ;;  %7109 = vst [vmem:[#allocation30_spill] sm:$0xff] %v6343_v38 }
 0x292   : > { %7105 = vst [vmem:[#allocation26_spill] sm:$0xff] %v6315_v15  ;;  %v6335_v46 = vsel %vm1149_vm4, %v3399_v21, -1e+30  ;;  %v3397_v20 = vmul.f32 0.35355338, %v3336_v51 }
 0x293   : > { %2742 = vmax.xlane.f32.xlu0 %v6283_v36  ;;  %1453 = vadd.xlane.f32.xlu1 %v6279_v58  ;;  %v5051_v56 = vpop.f32.mrf.mxu1 }
 0x294   : > { %v3402_v21 = vmul.f32 0.35355338, %v5051_v56 }
 0x295   : > { %v3349_v18 = vpop.f32.mrf.mxu1 }
 0x296   : > { %v3400_v35 = vmul.f32 0.35355338, %v3349_v18 }
 0x297   : > { %1455 = vadd.xlane.f32.xlu0 %v6288_v6  ;;  %2752 = vmax.xlane.f32.xlu1 %v6292_v61  ;;  %v5052_v28 = vpop.f32.mrf.mxu1 }
 0x299   : > { %v3352_v31 = vpop.f32.mrf.mxu1 }
 0x29a   : > { %v3401_v56 = vmul.f32 0.35355338, %v3352_v31 }
 0x29b   : > { %2754 = vmax.xlane.f32.xlu0 %v6301_v0  ;;  %1465 = vadd.xlane.f32.xlu1 %v6297_v11 }
 0x29f   : > { %1467 = vadd.xlane.f32.xlu0 %v6306_v62  ;;  %2748 = vmax.xlane.f32.xlu1 %v6310_v19  ;;  %v6323_v62 = vpop.eup %5306 }
 0x2a0   : > { %7106 = vst [vmem:[#allocation27_spill] sm:$0xff] %v6323_v62  ;;  %v6331_v53 = vpop.eup %5308 }
 0x2a1   : > { %7107 = vst [vmem:[#allocation28_spill] sm:$0xff] %v6331_v53  ;;  %v6339_v42 = vpop.eup %5310 }
 0x2a2   : > { %7108 = vst [vmem:[#allocation29_spill] sm:$0xff] %v6339_v42  ;;  %v6347_v45 = vpop.eup %5312 }
 0x2a3   : > { %2750 = vmax.xlane.f32.xlu0 %v6319_v27  ;;  %1461 = vadd.xlane.f32.xlu1 %v6315_v15  ;;  %7110 = vst [vmem:[#allocation31_spill] sm:$0xff] %v6347_v45  ;;  %v6355_v51 = vpop.eup %5314  ;;  %v3403_v15 = vmul.f32 0.35355338, %v5052_v28  ;;  %v6375_v28 = vsel %vm1149_vm4, %v3401_v56, -1e+30 }
 0x2a4   : > { %7112 = vst [vmem:[#allocation33_spill] sm:$0xff] %v6355_v51  ;;  %7115 = vst [vmem:[#allocation36_spill] sm:$0xff] %v6375_v28 }
 0x2a7   : > { %1463 = vadd.xlane.f32.xlu0 %v6323_v62  ;;  %3432 = vmax.xlane.f32.xlu1 %v6327_v39  ;;  %v6351_v62 = vsel %vm1149_vm4, %v3397_v20, -1e+30 }
 0x2a8   : > { %7111 = vst [vmem:[#allocation32_spill] sm:$0xff] %v6351_v62 }
 0x2ab   : > { %3434 = vmax.xlane.f32.xlu0 %v6335_v46  ;;  %1473 = vadd.xlane.f32.xlu1 %v6331_v53  ;;  %v5055_v53 = vpop.f32.mrf.mxu1 }
 0x2ac   : > { %v3406_v20 = vmul.f32 0.35355338, %v5055_v53 }
 0x2ae   : > { %v6379_v53 = vsel %vm1149_vm4, %v3406_v20, -1e+30 }
 0x2af   : > { %1475 = vadd.xlane.f32.xlu0 %v6339_v42  ;;  %3428 = vmax.xlane.f32.xlu1 %v6343_v38  ;;  %v6359_v42 = vsel %vm1149_vm4, %v3402_v21, -1e+30  ;;  %v3365_v38 = vpop.f32.mrf.mxu1  ;;  %7116 = vst [vmem:[#allocation37_spill] sm:$0xff] %v6379_v53 }
 0x2b0   : > { %v3404_v21 = vmul.f32 0.35355338, %v3365_v38 }
 0x2b1   : > { %v5056_v18 = vpop.f32.mrf.mxu1 }
 0x2b2   : > { %v3407_v31 = vmul.f32 0.35355338, %v5056_v18  ;;  %v6389_v56 = vsel %vm1149_vm4, %v3404_v21, -1e+30 }
 0x2b3   : > { %3430 = vmax.xlane.f32.xlu0 %v6351_v62  ;;  %1469 = vadd.xlane.f32.xlu1 %v6347_v45  ;;  %v6365_v62 = vsel %vm1149_vm4, %v3403_v15, -1e+30  ;;  %v6369_v45 = vsel %vm1149_vm4, %v3400_v35, -1e+30  ;;  %v3368_v15 = vpop.f32.mrf.mxu1  ;;  %7118 = vst [vmem:[#allocation39_spill] sm:$0xff] %v6389_v56 }
 0x2b4   : > { %7113 = vst [vmem:[#allocation34_spill] sm:$0xff] %v6365_v62  ;;  %7114 = vst [vmem:[#allocation35_spill] sm:$0xff] %v6369_v45  ;;  %v3405_v35 = vmul.f32 0.35355338, %v3368_v15 }
 0x2b5   : > { %v5059_v38 = vpop.f32.mrf.mxu1 }
 0x2b6   : > { %v3410_v20 = vmul.f32 0.35355338, %v5059_v38  ;;  %v6395_v18 = vsel %vm1149_vm4, %v3405_v35, -1e+30 }
 0x2b7   : > { %1471 = vadd.xlane.f32.xlu0 %v6355_v51  ;;  %3440 = vmax.xlane.f32.xlu1 %v6359_v42  ;;  %v6385_v51 = vsel %vm1149_vm4, %v3407_v31, -1e+30  ;;  %7119 = vst [vmem:[#allocation40_spill] sm:$0xff] %v6395_v18 }
 0x2b8   : > { %7117 = vst [vmem:[#allocation38_spill] sm:$0xff] %v6385_v51  ;;  %v6400_v31 = vsel %vm1149_vm4, %v3410_v20, -1e+30 }
 0x2b9   : > { %7120 = vst [vmem:[#allocation41_spill] sm:$0xff] %v6400_v31 }
 0x2bb   : > { %3442 = vmax.xlane.f32.xlu0 %v6365_v62  ;;  %3436 = vmax.xlane.f32.xlu1 %v6369_v45 }
 0x2bf   : > { %3438 = vmax.xlane.f32.xlu0 %v6375_v28  ;;  %3448 = vmax.xlane.f32.xlu1 %v6379_v53  ;;  %v3381_v53 = vpop.f32.mrf.mxu1 }
 0x2c0   : > { %v3408_v15 = vmul.f32 0.35355338, %v3381_v53 }
 0x2c1   : > { %v5060_v21 = vpop.f32.mrf.mxu1 }
 0x2c2   : > { %v3411_v28 = vmul.f32 0.35355338, %v5060_v21 }
 0x2c3   : > { %3450 = vmax.xlane.f32.xlu0 %v6385_v51  ;;  %3444 = vmax.xlane.f32.xlu1 %v6389_v56  ;;  %v6405_v56 = vsel %vm1149_vm4, %v3408_v15, -1e+30  ;;  %v3384_v38 = vpop.f32.mrf.mxu1 }
 0x2c4   : > { %7121 = vst [vmem:[#allocation42_spill] sm:$0xff] %v6405_v56  ;;  %v3409_v51 = vmul.f32 0.35355338, %v3384_v38  ;;  %v6411_v53 = vsel %vm1149_vm4, %v3411_v28, -1e+30 }
 0x2c5   : > { %7122 = vst [vmem:[#allocation43_spill] sm:$0xff] %v6411_v53 }
 0x2c7   : > { %3446 = vmax.xlane.f32.xlu0 %v6395_v18 }
 0x2cb   : > { %3456 = vmax.xlane.f32.xlu0 %v6400_v31 }
 0x2cf   : > { %3452 = vmax.xlane.f32.xlu0 %v6405_v56  ;;  %v6418_v56 = vsel %vm1149_vm4, %v3409_v51, -1e+30 }
 0x2d2   : > { %v2025_v35 = vpop.xlane.xlu1 %2024 }
 0x2d3   : > { %v2054_v18 = vsub.f32 %v6096_v57, %v2025_v35  ;;  %3458 = vmax.xlane.f32.xlu0 %v6411_v53 }
 0x2d5   : > { %v2072_v20 = vmul.f32 1.442695, %v2054_v18 }
 0x2d6   : > { %v2027_v31 = vpop.xlane.xlu0 %2026  ;;  %v2021_v21 = vpop.xlane.xlu1 %2020 }
 0x2d7   : > { %5316 = vpow2.f32 %v2072_v20  ;;  %v2055_v15 = vsub.f32 %v6105_v3, %v2027_v31  ;;  %v2052_v62 = vsub.f32 %v6109_v5, %v2021_v21  ;;  %3454 = vmax.xlane.f32.xlu0 %v6418_v56 }
 0x2d9   : > { %v2068_v57 = vmul.f32 1.442695, %v2052_v62  ;;  %v2074_v35 = vmul.f32 1.442695, %v2055_v15 }
 0x2da   : > { %v2023_v38 = vpop.xlane.xlu0 %2022  ;;  %v2033_v28 = vpop.xlane.xlu1 %2032 }
 0x2db   : > { %v2053_v53 = vsub.f32 %v6117_v14, %v2023_v38  ;;  %v2058_v18 = vsub.f32 %v6121_v16, %v2033_v28  ;;  %5318 = vpow2.f32 %v2068_v57 }
 0x2dc   : > { %5320 = vpow2.f32 %v2074_v35 }
 0x2dd   : > { %v2080_v20 = vmul.f32 1.442695, %v2058_v18  ;;  %v2070_v5 = vmul.f32 1.442695, %v2053_v53 }
 0x2de   : > { %v2035_v45 = vpop.xlane.xlu0 %2034  ;;  %v2029_v3 = vpop.xlane.xlu1 %2028 }
 0x2df   : > { %v2056_v52 = vsub.f32 %v6135_v29, %v2029_v3  ;;  %5322 = vpow2.f32 %v2080_v20  ;;  %v2059_v51 = vsub.f32 %v6131_v26, %v2035_v45 }
 0x2e0   : > { %5324 = vpow2.f32 %v2070_v5 }
 0x2e1   : > { %v2076_v31 = vmul.f32 1.442695, %v2056_v52  ;;  %v2082_v14 = vmul.f32 1.442695, %v2059_v51 }
 0x2e2   : > { %v2031_v62 = vpop.xlane.xlu0 %2030 }
 0x2e3   : > { %v2057_v21 = vsub.f32 %v6143_v37, %v2031_v62  ;;  %5326 = vpow2.f32 %v2076_v31 }
 0x2e4   : > { %v6426_v15 = vpop.eup %5316 }
 0x2e5   : > { %v2078_v16 = vmul.f32 1.442695, %v2057_v21  ;;  %2104 = vadd.xlane.f32.xlu1 %v6426_v15 }
 0x2e7   : > { %5328 = vpow2.f32 %v2078_v16 }
 0x2e8   : > { %5330 = vpow2.f32 %v2082_v14  ;;  %v2041_v53 = vpop.xlane.xlu1 %2040  ;;  %v6429_v57 = vpop.eup %5318 }
 0x2e9   : > { %v2062_v29 = vsub.f32 %v6152_v54, %v2041_v53  ;;  %2100 = vadd.xlane.f32.xlu0 %v6429_v57  ;;  %v6433_v45 = vpop.eup %5320 }
 0x2eb   : > { %v2088_v26 = vmul.f32 1.442695, %v2062_v29 }
 0x2ec   : > { %v2043_v37 = vpop.xlane.xlu0 %2042  ;;  %v2037_v38 = vpop.xlane.xlu1 %2036 }
 0x2ed   : > { %v6435_v28 = vpop.eup %5322  ;;  %5332 = vpow2.f32 %v2088_v26  ;;  %v2063_v35 = vsub.f32 %v6157_v8, %v2043_v37  ;;  %v2060_v18 = vsub.f32 %v6161_v9, %v2037_v38  ;;  %2106 = vadd.xlane.f32.xlu0 %v6433_v45 }
 0x2ee   : > { %2112 = vadd.xlane.f32.xlu1 %v6435_v28  ;;  %v6441_v3 = vpop.eup %5324 }
 0x2ef   : > { %v2090_v20 = vmul.f32 1.442695, %v2063_v35  ;;  %v2084_v54 = vmul.f32 1.442695, %v2060_v18 }
 0x2f0   : > { %v2039_v5 = vpop.xlane.xlu0 %2038  ;;  %v6443_v52 = vpop.eup %5326 }
 0x2f1   : > { %5334 = vpow2.f32 %v2090_v20  ;;  %v2061_v51 = vsub.f32 %v6170_v25, %v2039_v5  ;;  %v2049_v31 = vpop.xlane.xlu1 %2048  ;;  %2102 = vadd.xlane.f32.xlu0 %v6441_v3 }
 0x2f2   : > { %5336 = vpow2.f32 %v2084_v54  ;;  %v2066_v8 = vsub.f32 %v6175_v50, %v2049_v31  ;;  %2108 = vadd.xlane.f32.xlu1 %v6443_v52 }
 0x2f3   : > { %v2086_v9 = vmul.f32 1.442695, %v2061_v51 }
 0x2f4   : > { %v6449_v62 = vpop.eup %5328  ;;  %v2096_v21 = vmul.f32 1.442695, %v2066_v8  ;;  %v2051_v16 = vpop.xlane.xlu0 %2050 }
 0x2f5   : > { %v6451_v14 = vpop.eup %5330  ;;  %5338 = vpow2.f32 %v2086_v9  ;;  %v2045_v53 = vpop.xlane.xlu1 %2044  ;;  %2110 = vadd.xlane.f32.xlu0 %v6449_v62  ;;  %v2067_v50 = vsub.f32 %v6183_v22, %v2051_v16 }
 0x2f6   : > { %5340 = vpow2.f32 %v2096_v21  ;;  %v2064_v25 = vsub.f32 %v6187_v32, %v2045_v53  ;;  %2114 = vadd.xlane.f32.xlu1 %v6451_v14 }
 0x2f7   : > { %v2098_v20 = vmul.f32 1.442695, %v2067_v50 }
 0x2f8   : > { %v2092_v29 = vmul.f32 1.442695, %v2064_v25  ;;  %v2047_v26 = vpop.xlane.xlu0 %2046 }
 0x2f9   : > { %v2729_v37 = vpop.xlane.xlu1 %2728  ;;  %v2065_v35 = vsub.f32 %v6194_v55, %v2047_v26 }
 0x2fa   : > { %v6457_v38 = vpop.eup %5332  ;;  %v2758_v18 = vsub.f32 %v6198_v10, %v2729_v37  ;;  %5342 = vpow2.f32 %v2092_v29 }
 0x2fb   : > { %2120 = vadd.xlane.f32.xlu0 %v6457_v38  ;;  %v2094_v32 = vmul.f32 1.442695, %v2065_v35 }
 0x2fc   : > { %v2731_v54 = vpop.xlane.xlu0 %2730  ;;  %v2776_v22 = vmul.f32 1.442695, %v2758_v18 }
 0x2fd   : > { %v2725_v5 = vpop.xlane.xlu1 %2724  ;;  %5344 = vpow2.f32 %v2094_v32  ;;  %v2759_v31 = vsub.f32 %v6205_v2, %v2731_v54 }
 0x2fe   : > { %v6462_v51 = vpop.eup %5334  ;;  %v2756_v8 = vsub.f32 %v6209_v17, %v2725_v5  ;;  %5346 = vpow2.f32 %v2098_v20 }
 0x2ff   : > { %v6466_v9 = vpop.eup %5336  ;;  %2122 = vadd.xlane.f32.xlu0 %v6462_v51  ;;  %5348 = vpow2.f32 %v2776_v22  ;;  %v2778_v53 = vmul.f32 1.442695, %v2759_v31 }
 0x300   : > { %v2772_v55 = vmul.f32 1.442695, %v2756_v8  ;;  %2116 = vadd.xlane.f32.xlu1 %v6466_v9  ;;  %v2727_v10 = vpop.xlane.xlu0 %2726 }
 0x301   : > { %v2737_v21 = vpop.xlane.xlu1 %2736  ;;  %v2757_v25 = vsub.f32 %v6216_v13, %v2727_v10 }
 0x302   : > { %v6470_v16 = vpop.eup %5338  ;;  %v2762_v2 = vsub.f32 %v6220_v33, %v2737_v21  ;;  %5350 = vpow2.f32 %v2772_v55 }
 0x303   : > { %v6474_v50 = vpop.eup %5340  ;;  %2118 = vadd.xlane.f32.xlu0 %v6470_v16  ;;  %5352 = vpow2.f32 %v2778_v53  ;;  %v2774_v37 = vmul.f32 1.442695, %v2757_v25 }
 0x304   : > { %v2784_v17 = vmul.f32 1.442695, %v2762_v2  ;;  %2128 = vadd.xlane.f32.xlu1 %v6474_v50  ;;  %v2739_v29 = vpop.xlane.xlu0 %2738 }
 0x305   : > { %v1450_v26 = vpop.xlane.xlu1 %1449  ;;  %v2763_v13 = vsub.f32 %v6229_v34, %v2739_v29 }
 0x306   : > { %5354 = vpow2.f32 %v2784_v17 }
 0x307   : > { %v6478_v35 = vpop.eup %5342  ;;  %5356 = vrcp.f32 %v1450_v26  ;;  %v2786_v22 = vmul.f32 1.442695, %v2763_v13 }
 0x308   : > { %2124 = vadd.xlane.f32.xlu1 %v6478_v35  ;;  %v1452_v33 = vpop.xlane.xlu0 %1451  ;;  %5358 = vpow2.f32 %v2774_v37 }
 0x309   : > { %v2733_v18 = vpop.xlane.xlu1 %2732  ;;  %5360 = vrcp.f32 %v1452_v33 }
 0x30a   : > { %v2760_v20 = vsub.f32 %v6238_v7, %v2733_v18  ;;  %v6483_v32 = vpop.eup %5344 }
 0x30b   : > { %v6485_v54 = vpop.eup %5346  ;;  %2126 = vadd.xlane.f32.xlu0 %v6483_v32 }
 0x30c   : > { %v2780_v5 = vmul.f32 1.442695, %v2760_v20  ;;  %2130 = vadd.xlane.f32.xlu1 %v6485_v54  ;;  %v2735_v34 = vpop.xlane.xlu0 %2734  ;;  %v6490_v55 = vpop.eup %5348 }
 0x30d   : > { %v1446_v31 = vpop.xlane.xlu1 %1445  ;;  %v2761_v8 = vsub.f32 %v6247_v23, %v2735_v34 }
 0x30e   : > { %5362 = vpow2.f32 %v2780_v5 }
 0x30f   : > { %5364 = vrcp.f32 %v1446_v31  ;;  %v6493_v7 = vpop.eup %5350  ;;  %v2782_v10 = vmul.f32 1.442695, %v2761_v8  ;;  %2808 = vadd.xlane.f32.xlu0 %v6490_v55 }
 0x310   : > { %5366 = vpow2.f32 %v2786_v22  ;;  %2804 = vadd.xlane.f32.xlu1 %v6493_v7  ;;  %v1448_v21 = vpop.xlane.xlu0 %1447  ;;  %v6500_v23 = vpop.eup %5352 }
 0x311   : > { %v2745_v53 = vpop.xlane.xlu1 %2744  ;;  %5368 = vpow2.f32 %v2782_v10 }
 0x312   : > { %v2766_v25 = vsub.f32 %v6256_v60, %v2745_v53  ;;  %5370 = vrcp.f32 %v1448_v21 }
 0x313   : > { %v6502_v2 = vpop.eup %5354  ;;  %2810 = vadd.xlane.f32.xlu0 %v6500_v23 }
 0x314   : > { %v2792_v17 = vmul.f32 1.442695, %v2766_v25  ;;  %v5357_v29 = vpop.eup %5356  ;;  %2816 = vadd.xlane.f32.xlu1 %v6502_v2  ;;  %v2747_v26 = vpop.xlane.xlu0 %2746 }
 0x315   : > { %v1458_v37 = vpop.xlane.xlu1 %1457  ;;  %v2767_v13 = vsub.f32 %v6265_v30, %v2747_v26  ;;  %v1511_v60 = vmul.f32 %v5357_v29, %v6225_v1  ;;  %v6508_v33 = vpop.eup %5358 }
 0x316   : > { %5372 = vpow2.f32 %v2792_v17  ;;  %v5361_v18 = vpop.eup %5360 }
 0x317   : > { %5374 = vrcp.f32 %v1458_v37  ;;  %v2794_v20 = vmul.f32 1.442695, %v2767_v13  ;;  %2806 = vadd.xlane.f32.xlu0 %v6508_v33  ;;  %1527 = vst [vmem:[%s6511_s13 + $0x10] sm:$0xff] %v1511_v60  ;;  %v1512_v34 = vmul.f32 %v5361_v18, %v6234_v43 }
 0x318   : > { %v1460_v5 = vpop.xlane.xlu0 %1459 }
 0x319   : > { %v2741_v22 = vpop.xlane.xlu1 %2740  ;;  %5376 = vpow2.f32 %v2794_v20  ;;  %1528 = vst [vmem:[%s6511_s13 + $0x18] sm:$0xff] %v1512_v34 }
 0x31a   : > { %v2764_v1 = vsub.f32 %v6274_v63, %v2741_v22  ;;  %5378 = vrcp.f32 %v1460_v5  ;;  %v1542_v22 = vpack.c.bf16 %v1512_v34, %v1511_v60 }
 0x31b   : > { %v6516_v30 = vpop.eup %5362 }
 0x31c   : > { %v5365_v31 = vpop.eup %5364  ;;  %v2788_v8 = vmul.f32 1.442695, %v2764_v1  ;;  %2812 = vadd.xlane.f32.xlu1 %v6516_v30  ;;  %v2743_v10 = vpop.xlane.xlu0 %2742 }
 0x31d   : > { %v1454_v21 = vpop.xlane.xlu1 %1453  ;;  %v1509_v53 = vmul.f32 %v5365_v31, %v6243_v12  ;;  %v6521_v25 = vpop.eup %5366  ;;  %v2765_v43 = vsub.f32 %v6283_v36, %v2743_v10 }
 0x31e   : > { %5380 = vpow2.f32 %v2788_v8  ;;  %v6524_v17 = vpop.eup %5368 }
 0x31f   : > { %5382 = vrcp.f32 %v1454_v21  ;;  %1525 = vst [vmem:[%s6511_s13] sm:$0xff] %v1509_v53  ;;  %v5371_v63 = vpop.eup %5370  ;;  %v2790_v29 = vmul.f32 1.442695, %v2765_v43  ;;  %2814 = vadd.xlane.f32.xlu0 %v6524_v17 }
 0x320   : > { %2818 = vadd.xlane.f32.xlu1 %v6521_v25  ;;  %v1456_v26 = vpop.xlane.xlu0 %1455  ;;  %v1510_v12 = vmul.f32 %v5371_v63, %v6252_v4 }
 0x321   : > { %v2753_v37 = vpop.xlane.xlu1 %2752  ;;  %5384 = vpow2.f32 %v2790_v29 }
 0x322   : > { %v2770_v13 = vsub.f32 %v6292_v61, %v2753_v37  ;;  %5386 = vrcp.f32 %v1456_v26  ;;  %1526 = vst [vmem:[%s6511_s13 + $0x8] sm:$0xff] %v1510_v12  ;;  %v1541_v36 = vpack.c.bf16 %v1510_v12, %v1509_v53 }
 0x323   : > { %v6531_v18 = vpop.eup %5372 }
 0x324   : > { %v5375_v20 = vpop.eup %5374  ;;  %v2800_v5 = vmul.f32 1.442695, %v2770_v13  ;;  %2824 = vadd.xlane.f32.xlu0 %v6531_v18  ;;  %4927 = vmatprep.mubr.bf16.mxu0 %v1541_v36  ;;  %v2755_v1 = vpop.xlane.xlu0 %2754 }
 0x325   : > { %v1466_v31 = vpop.xlane.xlu1 %1465  ;;  %v1515_v8 = vmul.f32 %v5375_v20, %v6261_v59  ;;  %4928 = vmatmul.mubr.bf16.vlgmr.msra.gmra.mxu0 %v1542_v22  ;;  %v2771_v60 = vsub.f32 %v6301_v0, %v2755_v1 }
 0x326   : > { %5388 = vpow2.f32 %v2800_v5  ;;  %v6536_v4 = vpop.eup %5376  ;;  %4962 = vmatpush3.bf16.msra.mxu0 %v5981_v48 }
 0x327   : > { %5390 = vrcp.f32 %v1466_v31  ;;  %1531 = vst [vmem:[%s6511_s13 + $0x30] sm:$0xff] %v1515_v8  ;;  %v5379_v61 = vpop.eup %5378  ;;  %4963 = vmatprep.subr.bf16.mxu0 %v5977_v44  ;;  %v2802_v0 = vmul.f32 1.442695, %v2771_v60 }
 0x328   : > { %2826 = vadd.xlane.f32.xlu0 %v6536_v4  ;;  %v1468_v34 = vpop.xlane.xlu0 %1467  ;;  %v1516_v59 = vmul.f32 %v5379_v61, %v6270_v24 }
 0x329   : > { %v2749_v10 = vpop.xlane.xlu1 %2748  ;;  %5392 = vrcp.f32 %v1468_v34  ;;  %v7123_v34 = vld [vmem:[#allocation25_spill] sm:$0xff] }
 0x32a   : > { %v2768_v21 = vsub.f32 %v6310_v19, %v2749_v10  ;;  %4964 = vmatpush3.bf16.msra.mxu0 %v5977_v44  ;;  %1532 = vst [vmem:[%s6511_s13 + $0x38] sm:$0xff] %v1516_v59  ;;  %v1544_v22 = vpack.c.bf16 %v1516_v59, %v1515_v8  ;;  %v7124_v59 = vld [vmem:[#allocation30_spill] sm:$0xff] }
 0x32b   : > { %v6545_v53 = vpop.eup %5380  ;;  %4965 = vmatprep.subr.bf16.mxu0 %v5979_v47 }
 0x32c   : > { %v5383_v48 = vpop.eup %5382  ;;  %v2796_v43 = vmul.f32 1.442695, %v2768_v21  ;;  %2820 = vadd.xlane.f32.xlu1 %v6545_v53  ;;  %v2751_v63 = vpop.xlane.xlu0 %2750 }
 0x32d   : > { %v1462_v29 = vpop.xlane.xlu1 %1461  ;;  %v1513_v24 = vmul.f32 %v5383_v48, %v6279_v58  ;;  %v2769_v19 = vsub.f32 %v6319_v27, %v2751_v63  ;;  %v7125_v48 = vld [vmem:[#allocation9_spill] sm:$0xff]  ;;  %v7126_v63 = vld [vmem:[#allocation26_spill] sm:$0xff] }
 0x32e   : > { %5394 = vpow2.f32 %v2796_v43  ;;  %v6553_v26 = vpop.eup %5384  ;;  %4966 = vmatpush3.bf16.msra.mxu0 %v5979_v47 }
 0x32f   : > { %5396 = vrcp.f32 %v1462_v29  ;;  %1529 = vst [vmem:[%s6511_s13 + $0x20] sm:$0xff] %v1513_v24  ;;  %v5387_v44 = vpop.eup %5386  ;;  %v2798_v37 = vmul.f32 1.442695, %v2769_v19  ;;  %4967 = vmatprep.subr.bf16.mxu0 %v6086_v40  ;;  %2822 = vadd.xlane.f32.xlu0 %v6553_v26  ;;  %v7127_v19 = vld [vmem:[#allocation32_spill] sm:$0xff] }
 0x330   : > { %5398 = vpow2.f32 %v2802_v0  ;;  %v1464_v12 = vpop.xlane.xlu0 %1463  ;;  %v1514_v58 = vmul.f32 %v5387_v44, %v6288_v6 }
 0x331   : > { %v3433_v13 = vpop.xlane.xlu1 %3432  ;;  %5400 = vpow2.f32 %v2798_v37 }
 0x332   : > { %v3462_v27 = vsub.f32 %v6327_v39, %v3433_v13  ;;  %5402 = vrcp.f32 %v1464_v12  ;;  %4968 = vmatpush3.bf16.msra.mxu0 %v6086_v40  ;;  %1530 = vst [vmem:[%s6511_s13 + $0x28] sm:$0xff] %v1514_v58  ;;  %v1543_v47 = vpack.c.bf16 %v1514_v58, %v1513_v24  ;;  %v7128_v13 = vld [vmem:[#allocation13_spill] sm:$0xff] }
 0x333   : > { %v6561_v36 = vpop.eup %5388  ;;  %4969 = vmatprep.subr.bf16.mxu0 %v6088_v41 }
 0x334   : > { %v5391_v20 = vpop.eup %5390  ;;  %v3480_v5 = vmul.f32 1.442695, %v3462_v27  ;;  %2832 = vadd.xlane.f32.xlu1 %v6561_v36  ;;  %4931 = vmatprep.mubr.bf16.mxu0 %v1543_v47  ;;  %v3435_v6 = vpop.xlane.xlu0 %3434  ;;  %v7129_v47 = vld [vmem:[#allocation27_spill] sm:$0xff] }
 0x335   : > { %v1474_v1 = vpop.xlane.xlu1 %1473  ;;  %v1519_v39 = vmul.f32 %v5391_v20, %v6297_v11  ;;  %v3463_v31 = vsub.f32 %v6335_v46, %v3435_v6  ;;  %4932 = vmatmul.mubr.bf16.gmra.mxu0 %v1544_v22 }
 0x336   : > { %5404 = vpow2.f32 %v3480_v5  ;;  %4970 = vmatpush3.bf16.msra.mxu0 %v6088_v41  ;;  %v5393_v40 = vpop.eup %5392 }
 0x337   : > { %5406 = vrcp.f32 %v1474_v1  ;;  %1535 = vst [vmem:[%s6511_s13 + $0x50] sm:$0xff] %v1519_v39  ;;  %v3482_v61 = vmul.f32 1.442695, %v3463_v31  ;;  %4971 = vmatprep.subr.bf16.mxu0 %v5986_v49  ;;  %v1520_v10 = vmul.f32 %v5393_v40, %v7123_v34  ;;  %v7130_v40 = vld [vmem:[#allocation14_spill] sm:$0xff]  ;;  %v7131_v34 = vld [vmem:[#allocation28_spill] sm:$0xff] }
 0x338   : > { %v1476_v60 = vpop.xlane.xlu0 %1475 }
 0x339   : > { %v3429_v8 = vpop.xlane.xlu1 %3428  ;;  %5408 = vpow2.f32 %v3482_v61  ;;  %1536 = vst [vmem:[%s6511_s13 + $0x58] sm:$0xff] %v1520_v10  ;;  %v1546_v61 = vpack.c.bf16 %v1520_v10, %v1519_v39 }
 0x33a   : > { %v3460_v11 = vsub.f32 %v7124_v59, %v3429_v8  ;;  %5410 = vrcp.f32 %v1476_v60  ;;  %4972 = vmatpush3.bf16.msra.mxu0 %v5986_v49  ;;  %v7132_v59 = vld [vmem:[#allocation35_spill] sm:$0xff] }
 0x33b   : > { %v6574_v21 = vpop.eup %5394  ;;  %4973 = vmatprep.subr.bf16.mxu0 %v7125_v48 }
 0x33c   : > { %v5397_v41 = vpop.eup %5396  ;;  %v3476_v46 = vmul.f32 1.442695, %v3460_v11  ;;  %2828 = vadd.xlane.f32.xlu1 %v6574_v21  ;;  %v3431_v43 = vpop.xlane.xlu0 %3430 }
 0x33d   : > { %v1470_v0 = vpop.xlane.xlu1 %1469  ;;  %v1517_v29 = vmul.f32 %v5397_v41, %v7126_v63  ;;  %v6581_v24 = vpop.eup %5398  ;;  %v3461_v44 = vsub.f32 %v7127_v19, %v3431_v43  ;;  %v7134_v63 = vld [vmem:[#allocation29_spill] sm:$0xff]  ;;  %v7135_v19 = vld [vmem:[#allocation36_spill] sm:$0xff] }
 0x33e   : > { %5412 = vpow2.f32 %v3476_v46  ;;  %v6584_v37 = vpop.eup %5400  ;;  %4974 = vmatpush3.bf16.msra.mxu0 %v7125_v48  ;;  %v7133_v46 = vld [vmem:[#allocation34_spill] sm:$0xff] }
 0x33f   : > { %5414 = vrcp.f32 %v1470_v0  ;;  %1533 = vst [vmem:[%s6511_s13 + $0x40] sm:$0xff] %v1517_v29  ;;  %v5403_v49 = vpop.eup %5402  ;;  %v3478_v12 = vmul.f32 1.442695, %v3461_v44  ;;  %4975 = vmatprep.subr.bf16.mxu0 %v7128_v13  ;;  %2830 = vadd.xlane.f32.xlu0 %v6584_v37 }
 0x340   : > { %2834 = vadd.xlane.f32.xlu1 %v6581_v24  ;;  %v1472_v58 = vpop.xlane.xlu0 %1471  ;;  %v1518_v20 = vmul.f32 %v5403_v49, %v7129_v47  ;;  %v7136_v49 = vld [vmem:[#allocation37_spill] sm:$0xff] }
 0x341   : > { %v3441_v27 = vpop.xlane.xlu1 %3440  ;;  %5416 = vpow2.f32 %v3478_v12 }
 0x342   : > { %v3466_v5 = vsub.f32 %v6359_v42, %v3441_v27  ;;  %5418 = vrcp.f32 %v1472_v58  ;;  %4976 = vmatpush3.bf16.msra.mxu0 %v7128_v13  ;;  %1534 = vst [vmem:[%s6511_s13 + $0x48] sm:$0xff] %v1518_v20  ;;  %v1545_v6 = vpack.c.bf16 %v1518_v20, %v1517_v29 }
 0x343   : > { %v6593_v22 = vpop.eup %5404  ;;  %5011 = vmatprep.subr.bf16.mxu0 %v7130_v40 }
 0x344   : > { %v5407_v1 = vpop.eup %5406  ;;  %v3488_v31 = vmul.f32 1.442695, %v3466_v5  ;;  %3512 = vadd.xlane.f32.xlu0 %v6593_v22  ;;  %4935 = vmatprep.mubr.bf16.mxu0 %v1545_v6  ;;  %v3443_v60 = vpop.xlane.xlu0 %3442  ;;  %v7137_v6 = vld [vmem:[#allocation31_spill] sm:$0xff] }
 0x345   : > { %v3437_v8 = vpop.xlane.xlu1 %3436  ;;  %v1523_v42 = vmul.f32 %v5407_v1, %v7131_v34  ;;  %4936 = vmatmul.mubr.bf16.gmra.mxu0 %v1546_v61  ;;  %v3467_v48 = vsub.f32 %v7133_v46, %v3443_v60  ;;  %v7138_v61 = vld [vmem:[#allocation38_spill] sm:$0xff] }
 0x346   : > { %5420 = vpow2.f32 %v3488_v31  ;;  %v3464_v11 = vsub.f32 %v7132_v59, %v3437_v8  ;;  %v6601_v41 = vpop.eup %5408  ;;  %v7139_v8 = vld [vmem:[#allocation39_spill] sm:$0xff] }
 0x347   : > { %1539 = vst [vmem:[%s6511_s13 + $0x70] sm:$0xff] %v1523_v42  ;;  %v5411_v43 = vpop.eup %5410  ;;  %v3490_v58 = vmul.f32 1.442695, %v3467_v48 }
 0x348   : > { %v3484_v0 = vmul.f32 1.442695, %v3464_v11  ;;  %3514 = vadd.xlane.f32.xlu0 %v6601_v41  ;;  %v3439_v39 = vpop.xlane.xlu0 %3438  ;;  %v1524_v29 = vmul.f32 %v5411_v43, %v7134_v63  ;;  %v7140_v43 = vld [vmem:[#allocation33_spill] sm:$0xff] }
 0x349   : > { %v3449_v10 = vpop.xlane.xlu1 %3448  ;;  %v3465_v44 = vsub.f32 %v7135_v19, %v3439_v39 }
 0x34a   : > { %v3470_v12 = vsub.f32 %v7136_v49, %v3449_v10  ;;  %5422 = vpow2.f32 %v3484_v0  ;;  %1540 = vst [vmem:[%s6511_s13 + $0x78] sm:$0xff] %v1524_v29  ;;  %v7141_v10 = vld [vmem:[#allocation40_spill] sm:$0xff]  ;;  %v1548_v49 = vpack.c.bf16 %v1524_v29, %v1523_v42 }
 0x34b   : > { %v6609_v13 = vpop.eup %5412  ;;  %v3486_v47 = vmul.f32 1.442695, %v3465_v44 }
 0x34c   : > { %v5415_v27 = vpop.eup %5414  ;;  %3508 = vadd.xlane.f32.xlu1 %v6609_v13  ;;  %v3451_v20 = vpop.xlane.xlu0 %3450  ;;  %v3496_v31 = vmul.f32 1.442695, %v3470_v12 }
 0x34d   : > { %v3445_v5 = vpop.xlane.xlu1 %3444  ;;  %v1521_v1 = vmul.f32 %v5415_v27, %v7137_v6  ;;  %5424 = vpow2.f32 %v3486_v47  ;;  %v3471_v60 = vsub.f32 %v7138_v61, %v3451_v20  ;;  %v7142_v20 = vld [vmem:[#allocation41_spill] sm:$0xff]  ;;  %v7143_v6 = vld [vmem:[#allocation42_spill] sm:$0xff] }
 0x34e   : > { %v3468_v34 = vsub.f32 %v7139_v8, %v3445_v5  ;;  %v6616_v59 = vpop.eup %5416  ;;  %5426 = vpow2.f32 %v3490_v58  ;;  %v7144_v8 = vld [vmem:[#allocation43_spill] sm:$0xff] }
 0x34f   : > { %1537 = vst [vmem:[%s6511_s13 + $0x60] sm:$0xff] %v1521_v1  ;;  %v5419_v11 = vpop.eup %5418  ;;  %3510 = vadd.xlane.f32.xlu0 %v6616_v59  ;;  %5428 = vpow2.f32 %v3496_v31  ;;  %v3498_v39 = vmul.f32 1.442695, %v3471_v60 }
 0x350   : > { %v3492_v46 = vmul.f32 1.442695, %v3468_v34  ;;  %v3447_v48 = vpop.xlane.xlu0 %3446  ;;  %v1522_v0 = vmul.f32 %v5419_v11, %v7140_v43 }
 0x351   : > { %v3469_v63 = vsub.f32 %v7141_v10, %v3447_v48 }
 0x352   : > { %5430 = vpow2.f32 %v3492_v46  ;;  %1538 = vst [vmem:[%s6511_s13 + $0x68] sm:$0xff] %v1522_v0  ;;  %v1547_v44 = vpack.c.bf16 %v1522_v0, %v1521_v1 }
 0x353   : > { %v6622_v19 = vpop.eup %5420  ;;  %5432 = vpow2.f32 %v3498_v39  ;;  %v3494_v58 = vmul.f32 1.442695, %v3469_v63 }
 0x354   : > { %3520 = vadd.xlane.f32.xlu1 %v6622_v19  ;;  %4939 = vmatprep.mubr.bf16.mxu0 %v1547_v44  ;;  %v3457_v12 = vpop.xlane.xlu0 %3456 }
 0x355   : > { %4940 = vmatmul.mubr.bf16.gmra.mxu0 %v1548_v49  ;;  %5434 = vpow2.f32 %v3494_v58  ;;  %v3474_v5 = vsub.f32 %v7142_v20, %v3457_v12 }
 0x357   : > { %v6626_v27 = vpop.eup %5422  ;;  %v3504_v60 = vmul.f32 1.442695, %v3474_v5 }
 0x358   : > { %3516 = vadd.xlane.f32.xlu1 %v6626_v27  ;;  %v3453_v47 = vpop.xlane.xlu0 %3452 }
 0x359   : > { %v3472_v31 = vsub.f32 %v7143_v6, %v3453_v47 }
 0x35a   : > { %v6631_v61 = vpop.eup %5424 }
 0x35b   : > { %v6633_v1 = vpop.eup %5426  ;;  %v3500_v42 = vmul.f32 1.442695, %v3472_v31  ;;  %3518 = vadd.xlane.f32.xlu0 %v6631_v61  ;;  %v5272_v31 = vld [vmem:[#allocation3 + $0x8] sm:$0xff]  }
 0x35c   : > { %3522 = vadd.xlane.f32.xlu1 %v6633_v1  ;;  %v3459_v29 = vpop.xlane.xlu0 %3458  ;;  %v6638_v11 = vpop.eup %5428 }
 0x35d   : > { %5436 = vpow2.f32 %v3500_v42  ;;  %v3475_v34 = vsub.f32 %v7144_v8, %v3459_v29 }
 0x35e   : > { %5438 = vpow2.f32 %v3504_v60 }
 0x35f   : > { %v6640_v46 = vpop.eup %5430  ;;  %3528 = vadd.xlane.f32.xlu0 %v6638_v11  ;;  %v3506_v48 = vmul.f32 1.442695, %v3475_v34 }
 0x360   : > { %3524 = vadd.xlane.f32.xlu1 %v6640_v46  ;;  %v6644_v43 = vpop.eup %5432  ;;  %v3455_v44 = vpop.xlane.xlu0 %3454 }
 0x361   : > { %5440 = vpow2.f32 %v3506_v48  ;;  %v5273_v48 = vld [vmem:[#allocation3] sm:$0xff]  }
 0x362   : > { %v6647_v0 = vpop.eup %5434 }
 0x363   : > { %3530 = vadd.xlane.f32.xlu0 %v6644_v43 }
 0x367   : > { %3526 = vadd.xlane.f32.xlu0 %v6647_v0 }
 0x36a   : > { %v6650_v39 = vpop.eup %5436 }
 0x36b   : > { %3532 = vadd.xlane.f32.xlu1 %v6650_v39  ;;  %v6653_v63 = vpop.eup %5438 }
 0x36e   : > { %v2105_v10 = vpop.xlane.xlu1 %2104  ;;  %v6656_v49 = vpop.eup %5440 }
 0x36f   : > { %5442 = vrcp.f32 %v2105_v10  ;;  %3536 = vadd.xlane.f32.xlu1 %v6653_v63 }
 0x372   : > { %v2101_v12 = vpop.xlane.xlu0 %2100 }
 0x373   : > { %5444 = vrcp.f32 %v2101_v12  ;;  %3538 = vadd.xlane.f32.xlu1 %v6656_v49 }
 0x376   : > { %v2107_v58 = vpop.xlane.xlu0 %2106 }
 0x377   : > { %v2113_v47 = vpop.xlane.xlu1 %2112  ;;  %5446 = vrcp.f32 %v2107_v58 }
 0x378   : > { %5448 = vrcp.f32 %v2113_v47  ;;  %v3473_v47 = vsub.f32 %v6418_v56, %v3455_v44 }
 0x37a   : > { %v2103_v20 = vpop.xlane.xlu0 %2102 }
 0x37b   : > { %v2109_v5 = vpop.xlane.xlu1 %2108  ;;  %5450 = vrcp.f32 %v2103_v20 }
 0x37c   : > { %v5443_v6 = vpop.eup %5442  ;;  %5452 = vrcp.f32 %v2109_v5 }
 0x37d   : > { %v2166_v42 = vmul.f32 %v5443_v6, %v6426_v15  ;;  %3671 = vrot.lane.b32.xlu0 %v5272_v31, %s5621_s28 }
 0x37e   : > { %v2111_v29 = vpop.xlane.xlu0 %2110 }
 0x37f   : > { %v2115_v60 = vpop.xlane.xlu1 %2114  ;;  %4422 = vst [vmem:[%s6511_s13 + $0x90] sm:$0xff] %v2166_v42  ;;  %5454 = vrcp.f32 %v2111_v29 }
 0x380   : > { %v5445_v8 = vpop.eup %5444  ;;  %5456 = vrcp.f32 %v2115_v60  ;;  %v3502_v60 = vmul.f32 1.442695, %v3473_v47 }
 0x381   : > { %v2164_v34 = vmul.f32 %v5445_v8, %v6429_v57 }
 0x383   : > { %4420 = vst [vmem:[%s6511_s13 + $0x80] sm:$0xff] %v2164_v34 }
 0x384   : > { %v2121_v10 = vpop.xlane.xlu0 %2120  ;;  %v5447_v12 = vpop.eup %5446  ;;  %3669 = vrot.lane.b32.xlu1 %v5273_v48, %s5621_s28  ;;  %s4148_s28 = sshll.u32 %s6511_s13, 4  ;;  %s6941_s28 = int_to_ptr.vmem [resolvable:$true] %s4148_s28 }
 0x385   : > { %5458 = vrcp.f32 %v2121_v10  ;;  %v5449_v15 = vpop.eup %5448  ;;  %v2167_v58 = vmul.f32 %v5447_v12, %v6433_v45 }
 0x386   : > { %v2170_v20 = vmul.f32 %v5449_v15, %v6435_v28 }
 0x387   : > { %4423 = vst [vmem:[%s6511_s13 + $0x98] sm:$0xff] %v2167_v58  ;;  %v2198_v44 = vpack.c.bf16 %v2167_v58, %v2166_v42 }
 0x388   : > { %v2123_v5 = vpop.xlane.xlu0 %2122  ;;  %v5451_v6 = vpop.eup %5450  ;;  %4426 = vst [vmem:[%s6511_s13 + $0xb0] sm:$0xff] %v2170_v20 }
 0x389   : > { %5460 = vrcp.f32 %v2123_v5  ;;  %v2117_v57 = vpop.xlane.xlu1 %2116  ;;  %v5453_v31 = vpop.eup %5452  ;;  %v2165_v29 = vmul.f32 %v5451_v6, %v6441_v3 }
 0x38a   : > { %5462 = vrcp.f32 %v2117_v57  ;;  %v2168_v8 = vmul.f32 %v5453_v31, %v6443_v52  ;;  %v7147_v31 = vld [vmem:[#allocation16_spill] sm:$0xff] }
 0x38b   : > { %4421 = vst [vmem:[%s6511_s13 + $0x88] sm:$0xff] %v2165_v29  ;;  %v2197_v56 = vpack.c.bf16 %v2165_v29, %v2164_v34  ;;  %v7145_v34 = vld [vmem:[#allocation10_spill] sm:$0xff] }
 0x38c   : > { %v2119_v48 = vpop.xlane.xlu0 %2118  ;;  %v5455_v45 = vpop.eup %5454  ;;  %4424 = vst [vmem:[%s6511_s13 + $0xa0] sm:$0xff] %v2168_v8 }
 0x38d   : > { %5464 = vrcp.f32 %v2119_v48  ;;  %v2129_v28 = vpop.xlane.xlu1 %2128  ;;  %v5457_v10 = vpop.eup %5456  ;;  %4977 = vmatprep.mubr.bf16.mxu0 %v2197_v56  ;;  %v2169_v12 = vmul.f32 %v5455_v45, %v6449_v62  ;;  %v7146_v62 = vld [vmem:[#allocation11_spill] sm:$0xff] }
 0x38e   : > { %5466 = vrcp.f32 %v2129_v28  ;;  %4978 = vmatmul.mubr.bf16.vlgmr.msra.gmra.mxu0 %v2198_v44  ;;  %v2171_v3 = vmul.f32 %v5457_v10, %v6451_v14 }
 0x38f   : > { %5468 = vpow2.f32 %v3502_v60  ;;  %5012 = vmatpush3.bf16.msra.mxu0 %v7130_v40  ;;  %4425 = vst [vmem:[%s6511_s13 + $0xa8] sm:$0xff] %v2169_v12  ;;  %v2199_v52 = vpack.c.bf16 %v2169_v12, %v2168_v8  ;;  %v7149_v12 = vld [vmem:[#allocation12_spill] sm:$0xff] }
 0x390   : > { %5013 = vmatprep.subr.bf16.mxu0 %v7145_v34  ;;  %4427 = vst [vmem:[%s6511_s13 + $0xb8] sm:$0xff] %v2171_v3  ;;  %v2200_v14 = vpack.c.bf16 %v2171_v3, %v2170_v20 }
 0x391   : > { %v2125_v42 = vpop.xlane.xlu1 %2124  ;;  %4981 = vmatprep.mubr.bf16.mxu0 %v2199_v52 }
 0x392   : > { %v5459_v15 = vpop.eup %5458  ;;  %5470 = vrcp.f32 %v2125_v42  ;;  %v7150_v42 = vld [vmem:[#allocation15_spill] sm:$0xff] }
 0x393   : > { %v2174_v58 = vmul.f32 %v5459_v15, %v6457_v38  ;;  %5014 = vmatpush3.bf16.msra.mxu0 %v7145_v34 }
 0x394   : > { %5015 = vmatprep.subr.bf16.mxu0 %v7146_v62  ;;  %v2127_v47 = vpop.xlane.xlu0 %2126 }
 0x395   : > { %4430 = vst [vmem:[%s6511_s13 + $0xd0] sm:$0xff] %v2174_v58  ;;  %5472 = vrcp.f32 %v2127_v47  ;;  %v2131_v5 = vpop.xlane.xlu1 %2130 }
 0x396   : > { %v5461_v40 = vpop.eup %5460  ;;  %5474 = vrcp.f32 %v2131_v5  ;;  %4982 = vmatmul.mubr.bf16.gmra.mxu0 %v2200_v14 }
 0x397   : > { %v5463_v6 = vpop.eup %5462  ;;  %v2175_v57 = vmul.f32 %v5461_v40, %v6462_v51  ;;  %5016 = vmatpush3.bf16.msra.mxu0 %v7146_v62 }
 0x398   : > { %v2172_v38 = vmul.f32 %v5463_v6, %v6466_v9  ;;  %5017 = vmatprep.subr.bf16.mxu0 %v7147_v31  ;;  %v2809_v29 = vpop.xlane.xlu0 %2808  ;;  %v7148_v9 = vld [vmem:[#allocation18_spill] sm:$0xff] }
 0x399   : > { %4431 = vst [vmem:[%s6511_s13 + $0xd8] sm:$0xff] %v2175_v57  ;;  %5476 = vrcp.f32 %v2809_v29  ;;  %v2805_v60 = vpop.xlane.xlu1 %2804  ;;  %v7152_v29 = vld [vmem:[#allocation22_spill] sm:$0xff] }
 0x39a   : > { %v5465_v20 = vpop.eup %5464  ;;  %4428 = vst [vmem:[%s6511_s13 + $0xc0] sm:$0xff] %v2172_v38  ;;  %5478 = vrcp.f32 %v2805_v60 }
 0x39b   : > { %v5467_v8 = vpop.eup %5466  ;;  %v2173_v48 = vmul.f32 %v5465_v20, %v6470_v16  ;;  %5018 = vmatpush3.bf16.msra.mxu0 %v7147_v31  ;;  %v2202_v16 = vpack.c.bf16 %v2175_v57, %v2174_v58 }
 0x39c   : > { %v6691_v56 = vpop.eup %5468  ;;  %v2178_v51 = vmul.f32 %v5467_v8, %v6474_v50  ;;  %5019 = vmatprep.subr.bf16.mxu0 %v7148_v9  ;;  %v2811_v45 = vpop.xlane.xlu0 %2810 }
 0x39d   : > { %3534 = vadd.xlane.f32.xlu0 %v6691_v56  ;;  %4429 = vst [vmem:[%s6511_s13 + $0xc8] sm:$0xff] %v2173_v48  ;;  %v2201_v28 = vpack.c.bf16 %v2173_v48, %v2172_v38  ;;  %5480 = vrcp.f32 %v2811_v45  ;;  %v2817_v44 = vpop.xlane.xlu1 %2816 }
 0x39e   : > { %4434 = vst [vmem:[%s6511_s13 + $0xf0] sm:$0xff] %v2178_v51  ;;  %5482 = vrcp.f32 %v2817_v44  ;;  %v7153_v44 = vld [vmem:[#allocation17_spill] sm:$0xff] }
 0x39f   : > { %4985 = vmatprep.mubr.bf16.mxu0 %v2201_v28  ;;  %v5471_v10 = vpop.eup %5470  ;;  %5020 = vmatpush3.bf16.msra.mxu0 %v7148_v9 }
 0x3a0   : > { %5021 = vmatprep.subr.bf16.mxu0 %v7149_v12  ;;  %v2807_v50 = vpop.xlane.xlu0 %2806  ;;  %4986 = vmatmul.mubr.bf16.gmra.mxu0 %v2202_v16  ;;  %v2176_v3 = vmul.f32 %v5471_v10, %v6478_v35 }
 0x3a1   : > { %5484 = vrcp.f32 %v2807_v50 }
 0x3a2   : > { %v5473_v52 = vpop.eup %5472  ;;  %4432 = vst [vmem:[%s6511_s13 + $0xe0] sm:$0xff] %v2176_v3 }
 0x3a3   : > { %v5475_v34 = vpop.eup %5474  ;;  %5022 = vmatpush3.bf16.msra.mxu0 %v7149_v12  ;;  %v2177_v15 = vmul.f32 %v5473_v52, %v6483_v32  ;;  %v7151_v32 = vld [vmem:[#allocation20_spill] sm:$0xff] }
 0x3a4   : > { %5023 = vmatprep.subr.bf16.mxu0 %v7150_v42  ;;  %v2179_v62 = vmul.f32 %v5475_v34, %v6485_v54 }
 0x3a5   : > { %v2813_v58 = vpop.xlane.xlu1 %2812  ;;  %4433 = vst [vmem:[%s6511_s13 + $0xe8] sm:$0xff] %v2177_v15  ;;  %v2203_v47 = vpack.c.bf16 %v2177_v15, %v2176_v3  ;;  %v7154_v3 = vld [vmem:[#allocation19_spill] sm:$0xff] }
 0x3a6   : > { %5486 = vrcp.f32 %v2813_v58  ;;  %v5477_v14 = vpop.eup %5476  ;;  %4435 = vst [vmem:[%s6511_s13 + $0xf8] sm:$0xff] %v2179_v62  ;;  %v2204_v35 = vpack.c.bf16 %v2179_v62, %v2178_v51  ;;  %v7156_v62 = vld [vmem:[#allocation24_spill] sm:$0xff] }
 0x3a7   : > { %v5479_v40 = vpop.eup %5478  ;;  %5024 = vmatpush3.bf16.msra.mxu0 %v7150_v42  ;;  %4989 = vmatprep.mubr.bf16.mxu0 %v2203_v47  ;;  %v2870_v5 = vmul.f32 %v5477_v14, %v6490_v55 }
 0x3a8   : > { %5025 = vmatprep.subr.bf16.mxu0 %v7151_v32  ;;  %v2815_v6 = vpop.xlane.xlu0 %2814  ;;  %4990 = vmatmul.mubr.bf16.gmra.mxu0 %v2204_v35  ;;  %v2868_v54 = vmul.f32 %v5479_v40, %v6493_v7  ;;  %v7157_v35 = vld [vmem:[#allocation21_spill] sm:$0xff] }
 0x3a9   : > { %v2819_v57 = vpop.xlane.xlu1 %2818  ;;  %5488 = vrcp.f32 %v2815_v6  ;;  %4478 = vst [vmem:[%s6511_s13 + $0x110] sm:$0xff] %v2870_v5 }
 0x3aa   : > { %v5481_v38 = vpop.eup %5480  ;;  %5490 = vrcp.f32 %v2819_v57  ;;  %4476 = vst [vmem:[%s6511_s13 + $0x100] sm:$0xff] %v2868_v54 }
 0x3ab   : > { %v5483_v31 = vpop.eup %5482  ;;  %5026 = vmatpush3.bf16.msra.mxu0 %v7151_v32  ;;  %v2871_v55 = vmul.f32 %v5481_v38, %v6500_v23 }
 0x3ac   : > { %5061 = vmatprep.subr.bf16.mxu0 %v7152_v29  ;;  %v2874_v60 = vmul.f32 %v5483_v31, %v6502_v2 }
 0x3ad   : > { %v2825_v20 = vpop.xlane.xlu0 %2824  ;;  %4479 = vst [vmem:[%s6511_s13 + $0x118] sm:$0xff] %v2871_v55  ;;  %v2902_v45 = vpack.c.bf16 %v2871_v55, %v2870_v5 }
 0x3ae   : > { %5492 = vrcp.f32 %v2825_v20  ;;  %v5485_v7 = vpop.eup %5484  ;;  %4482 = vst [vmem:[%s6511_s13 + $0x130] sm:$0xff] %v2874_v60 }
 0x3af   : > { %v2869_v8 = vmul.f32 %v5485_v7, %v6508_v33 }
 0x3b1   : > { %v2827_v48 = vpop.xlane.xlu0 %2826  ;;  %4477 = vst [vmem:[%s6511_s13 + $0x108] sm:$0xff] %v2869_v8  ;;  %v2901_v51 = vpack.c.bf16 %v2869_v8, %v2868_v54 }
 0x3b2   : > { %5494 = vrcp.f32 %v2827_v48 }
 0x3b3   : > { %v5487_v9 = vpop.eup %5486  ;;  %5027 = vmatprep.mubr.bf16.mxu0 %v2901_v51 }
 0x3b4   : > { %v2872_v23 = vmul.f32 %v5487_v9, %v6516_v30  ;;  %5028 = vmatmul.mubr.bf16.vlgmr.msra.gmra.mxu0 %v2902_v45 }
 0x3b5   : > { %v2821_v28 = vpop.xlane.xlu1 %2820  ;;  %5062 = vmatpush3.bf16.msra.mxu0 %v7152_v29 }
 0x3b6   : > { %5496 = vrcp.f32 %v2821_v28  ;;  %4480 = vst [vmem:[%s6511_s13 + $0x120] sm:$0xff] %v2872_v23  ;;  %v5489_v2 = vpop.eup %5488  ;;  %5063 = vmatprep.subr.bf16.mxu0 %v7153_v44 }
 0x3b7   : > { %v5491_v33 = vpop.eup %5490  ;;  %v2873_v16 = vmul.f32 %v5489_v2, %v6524_v17  ;;  %v7155_v17 = vld [vmem:[#allocation23_spill] sm:$0xff] }
 0x3b8   : > { %v2823_v10 = vpop.xlane.xlu0 %2822  ;;  %v2875_v12 = vmul.f32 %v5491_v33, %v6521_v25 }
 0x3b9   : > { %5498 = vrcp.f32 %v2823_v10  ;;  %5064 = vmatpush3.bf16.msra.mxu0 %v7153_v44  ;;  %4481 = vst [vmem:[%s6511_s13 + $0x128] sm:$0xff] %v2873_v16  ;;  %v2903_v30 = vpack.c.bf16 %v2873_v16, %v2872_v23 }
 0x3ba   : > { %5065 = vmatprep.subr.bf16.mxu0 %v7154_v3  ;;  %4483 = vst [vmem:[%s6511_s13 + $0x138] sm:$0xff] %v2875_v12  ;;  %v2904_v52 = vpack.c.bf16 %v2875_v12, %v2874_v60 }
 0x3bb   : > { %v5493_v50 = vpop.eup %5492  ;;  %5031 = vmatprep.mubr.bf16.mxu0 %v2903_v30 }
 0x3bc   : > { %v2878_v34 = vmul.f32 %v5493_v50, %v6531_v18  ;;  %5032 = vmatmul.mubr.bf16.gmra.mxu0 %v2904_v52 }
 0x3bd   : > { %v2833_v15 = vpop.xlane.xlu1 %2832  ;;  %5066 = vmatpush3.bf16.msra.mxu0 %v7154_v3 }
 0x3be   : > { %5500 = vrcp.f32 %v2833_v15  ;;  %4486 = vst [vmem:[%s6511_s13 + $0x150] sm:$0xff] %v2878_v34  ;;  %5067 = vmatprep.subr.bf16.mxu0 %v7155_v17 }
 0x3bf   : > { %v5495_v25 = vpop.eup %5494 }
 0x3c0   : > { %v2879_v42 = vmul.f32 %v5495_v25, %v6536_v4 }
 0x3c1   : > { %5068 = vmatpush3.bf16.msra.mxu0 %v7155_v17 }
 0x3c2   : > { %4487 = vst [vmem:[%s6511_s13 + $0x158] sm:$0xff] %v2879_v42  ;;  %5069 = vmatprep.subr.bf16.mxu0 %v7156_v62  ;;  %v2906_v6 = vpack.c.bf16 %v2879_v42, %v2878_v34 }
 0x3c3   : > { %v5497_v58 = vpop.eup %5496 }
 0x3c4   : > { %v2876_v18 = vmul.f32 %v5497_v58, %v6545_v53 }
 0x3c5   : > { %v2829_v47 = vpop.xlane.xlu1 %2828  ;;  %5070 = vmatpush3.bf16.msra.mxu0 %v7156_v62 }
 0x3c6   : > { %5502 = vrcp.f32 %v2829_v47  ;;  %4484 = vst [vmem:[%s6511_s13 + $0x140] sm:$0xff] %v2876_v18  ;;  %v5499_v14 = vpop.eup %5498  ;;  %5071 = vmatprep.subr.bf16.mxu0 %v7157_v35 }
 0x3c7   : > { %v2877_v4 = vmul.f32 %v5499_v14, %v6553_v26 }
 0x3c8   : > { %v2831_v40 = vpop.xlane.xlu0 %2830 }
 0x3c9   : > { %5504 = vrcp.f32 %v2831_v40  ;;  %v2835_v5 = vpop.xlane.xlu1 %2834  ;;  %5072 = vmatpush3.bf16.msra.mxu0 %v7157_v35  ;;  %4485 = vst [vmem:[%s6511_s13 + $0x148] sm:$0xff] %v2877_v4  ;;  %v2905_v32 = vpack.c.bf16 %v2877_v4, %v2876_v18 }
 0x3ca   : > { %5506 = vrcp.f32 %v2835_v5 }
 0x3cb   : > { %v5501_v53 = vpop.eup %5500  ;;  %5035 = vmatprep.mubr.bf16.mxu0 %v2905_v32 }
 0x3cc   : > { %v2882_v57 = vmul.f32 %v5501_v53, %v6561_v36  ;;  %5036 = vmatmul.mubr.bf16.gmra.mxu0 %v2906_v6 }
 0x3cd   : > { %v3513_v54 = vpop.xlane.xlu0 %3512 }
 0x3ce   : > { %5508 = vrcp.f32 %v3513_v54  ;;  %4490 = vst [vmem:[%s6511_s13 + $0x170] sm:$0xff] %v2882_v57 }
 0x3d1   : > { %v3515_v26 = vpop.xlane.xlu0 %3514 }
 0x3d2   : > { %5510 = vrcp.f32 %v3515_v26 }
 0x3d3   : > { %v5503_v38 = vpop.eup %5502 }
 0x3d4   : > { %v2880_v31 = vmul.f32 %v5503_v38, %v6574_v21 }
 0x3d5   : > { %v3509_v55 = vpop.xlane.xlu1 %3508 }
 0x3d6   : > { %5512 = vrcp.f32 %v3509_v55  ;;  %4488 = vst [vmem:[%s6511_s13 + $0x160] sm:$0xff] %v2880_v31  ;;  %v5505_v29 = vpop.eup %5504 }
 0x3d7   : > { %v5507_v20 = vpop.eup %5506  ;;  %v2881_v60 = vmul.f32 %v5505_v29, %v6584_v37 }
 0x3d8   : > { %v3511_v36 = vpop.xlane.xlu0 %3510  ;;  %v2883_v7 = vmul.f32 %v5507_v20, %v6581_v24 }
 0x3d9   : > { %5514 = vrcp.f32 %v3511_v36  ;;  %4489 = vst [vmem:[%s6511_s13 + $0x168] sm:$0xff] %v2881_v60  ;;  %v2907_v8 = vpack.c.bf16 %v2881_v60, %v2880_v31 }
 0x3da   : > { %4491 = vst [vmem:[%s6511_s13 + $0x178] sm:$0xff] %v2883_v7  ;;  %v2908_v51 = vpack.c.bf16 %v2883_v7, %v2882_v57 }
 0x3db   : > { %v5509_v48 = vpop.eup %5508  ;;  %5039 = vmatprep.mubr.bf16.mxu0 %v2907_v8 }
 0x3dc   : > { %v6757_v21 = vmul.f32 %v5509_v48, %v6593_v22  ;;  %5040 = vmatmul.mubr.bf16.gmra.mxu0 %v2908_v51 }
 0x3dd   : > { %v3521_v9 = vpop.xlane.xlu1 %3520 }
 0x3de   : > { %5516 = vrcp.f32 %v3521_v9  ;;  %4534 = vst [vmem:[%s6511_s13 + $0x190] sm:$0xff] %v6757_v21 }
 0x3df   : > { %v5511_v37 = vpop.eup %5510 }
 0x3e0   : > { %v6762_v24 = vmul.f32 %v5511_v37, %v6601_v41 }
 0x3e1   : > { %v3517_v45 = vpop.xlane.xlu1 %3516 }
 0x3e2   : > { %4535 = vst [vmem:[%s6511_s13 + $0x198] sm:$0xff] %v6762_v24  ;;  %5518 = vrcp.f32 %v3517_v45 }
 0x3e3   : > { %v5513_v23 = vpop.eup %5512 }
 0x3e4   : > { %v3572_v28 = vmul.f32 %v5513_v23, %v6609_v13  ;;  %v3519_v2 = vpop.xlane.xlu0 %3518 }
 0x3e5   : > { %5520 = vrcp.f32 %v3519_v2  ;;  %v3523_v22 = vpop.xlane.xlu1 %3522  ;;  %v4929_v44 = vpop.f32.mrf.mxu0 }
 0x3e6   : > { %4532 = vst [vmem:[%s6511_s13 + $0x180] sm:$0xff] %v3572_v28  ;;  %v5515_v33 = vpop.eup %5514  ;;  %5522 = vrcp.f32 %v3523_v22  ;;  %v4637_v16 = vpack.c.bf16 %v4929_v44, %v4929_v44 }
 0x3e7   : > { %v1647_v10 = vpop.f32.mrf.mxu0  ;;  %v3573_v41 = vmul.f32 %v5515_v33, %v6616_v59 }
 0x3e8   : > { %1777 = vst.msk [vmem:[#allocation5 + $0x8] sm:$0xf] %vm1774_vm5, %v4637_v16  ;;  %v4635_v12 = vpack.c.bf16 %v1647_v10, %v1647_v10  ;;  %v3529_v30 = vpop.xlane.xlu0 %3528 }
 0x3e9   : > { %5524 = vrcp.f32 %v3529_v30  ;;  %v3525_v13 = vpop.xlane.xlu1 %3524  ;;  %v4930_v50 = vpop.f32.mrf.mxu0  ;;  %4533 = vst [vmem:[%s6511_s13 + $0x188] sm:$0xff] %v3573_v41  ;;  %v3605_v3 = vpack.c.bf16 %v3573_v41, %v3572_v28 }
 0x3ea   : > { %1775 = vst.msk [vmem:[#allocation5] sm:$0xf] %vm1774_vm5, %v4635_v12  ;;  %5526 = vrcp.f32 %v3525_v13  ;;  %v4638_v34 = vpack.c.bf16 %v4930_v50, %v4930_v50 }
 0x3eb   : > { %v5517_v52 = vpop.eup %5516  ;;  %v1650_v15 = vpop.f32.mrf.mxu0  ;;  %5077 = vmatprep.mubr.bf16.mxu0 %v3605_v3 }
 0x3ec   : > { %v6773_v59 = vmul.f32 %v5517_v52, %v6622_v19  ;;  %1778 = vst.msk [vmem:[#allocation5 + $0xc] sm:$0xf] %vm1774_vm5, %v4638_v34  ;;  %v4636_v25 = vpack.c.bf16 %v1650_v15, %v1650_v15  ;;  %v3531_v17 = vpop.xlane.xlu0 %3530 }
 0x3ed   : > { %5528 = vrcp.f32 %v3531_v17 }
 0x3ee   : > { %4538 = vst [vmem:[%s6511_s13 + $0x1b0] sm:$0xff] %v6773_v59  ;;  %1776 = vst.msk [vmem:[#allocation5 + $0x4] sm:$0xf] %vm1774_vm5, %v4636_v25 }
 0x3ef   : > { %v5519_v42 = vpop.eup %5518 }
 0x3f0   : > { %v3527_v58 = vpop.xlane.xlu0 %3526  ;;  %v3576_v62 = vmul.f32 %v5519_v42, %v6626_v27 }
 0x3f1   : > { %5530 = vrcp.f32 %v3527_v58 }
 0x3f2   : > { %v5521_v18 = vpop.eup %5520  ;;  %4536 = vst [vmem:[%s6511_s13 + $0x1a0] sm:$0xff] %v3576_v62 }
 0x3f3   : > { %v5523_v19 = vpop.eup %5522  ;;  %v3577_v47 = vmul.f32 %v5521_v18, %v6631_v61 }
 0x3f4   : > { %v3672_v14 = vpop.permute.xlu0 %3671  ;;  %v3533_v35 = vpop.xlane.xlu1 %3532  ;;  %v3579_v4 = vmul.f32 %v5523_v19, %v6633_v1 }
 0x3f5   : > { %5532 = vrcp.f32 %v3533_v35  ;;  %v4933_v40 = vpop.f32.mrf.mxu0  ;;  %5073 = vmatprep.subr.bf16.mxu0 %v3672_v14  ;;  %4537 = vst [vmem:[%s6511_s13 + $0x1a8] sm:$0xff] %v3577_v47  ;;  %v3607_v8 = vpack.c.bf16 %v3577_v47, %v3576_v62 }
 0x3f6   : > { %v5525_v5 = vpop.eup %5524  ;;  %v4641_v32 = vpack.c.bf16 %v4933_v40, %v4933_v40  ;;  %5074 = vmatpush3.bf16.msra.mxu0 %v3672_v14  ;;  %4539 = vst [vmem:[%s6511_s13 + $0x1b8] sm:$0xff] %v3579_v4 }
 0x3f7   : > { %v5527_v27 = vpop.eup %5526  ;;  %v1663_v53 = vpop.f32.mrf.mxu0  ;;  %v3582_v6 = vmul.f32 %v5525_v5, %v6638_v11 }
 0x3f8   : > { %1781 = vst.msk [vmem:[#allocation5 + $0x18] sm:$0xf] %vm1774_vm5, %v4641_v32  ;;  %v4639_v61 = vpack.c.bf16 %v1663_v53, %v1663_v53  ;;  %v3537_v57 = vpop.xlane.xlu1 %3536  ;;  %v3580_v1 = vmul.f32 %v5527_v27, %v6640_v46 }
 0x3f9   : > { %5534 = vrcp.f32 %v3537_v57  ;;  %v4934_v54 = vpop.f32.mrf.mxu0  ;;  %4542 = vst [vmem:[%s6511_s13 + $0x1d0] sm:$0xff] %v3582_v6 }
 0x3fa   : > { %v5529_v26 = vpop.eup %5528  ;;  %1779 = vst.msk [vmem:[#allocation5 + $0x10] sm:$0xf] %vm1774_vm5, %v4639_v61  ;;  %v4642_v38 = vpack.c.bf16 %v4934_v54, %v4934_v54  ;;  %4540 = vst [vmem:[%s6511_s13 + $0x1c0] sm:$0xff] %v3580_v1 }
 0x3fb   : > { %v1666_v31 = vpop.f32.mrf.mxu0  ;;  %v3583_v55 = vmul.f32 %v5529_v26, %v6644_v43  ;;  %v3606_v43 = vpack.c.bf16 %v6762_v24, %v6757_v21  ;;  %v3608_v24 = vpack.c.bf16 %v3579_v4, %v6773_v59 }
 0x3fc   : > { %1782 = vst.msk [vmem:[#allocation5 + $0x1c] sm:$0xf] %vm1774_vm5, %v4642_v38  ;;  %v4640_v11 = vpack.c.bf16 %v1666_v31, %v1666_v31  ;;  %v3539_v29 = vpop.xlane.xlu1 %3538 }
 0x3fd   : > { %5536 = vrcp.f32 %v3539_v29  ;;  %4543 = vst [vmem:[%s6511_s13 + $0x1d8] sm:$0xff] %v3583_v55 }
 0x3fe   : > { %v5531_v46 = vpop.eup %5530  ;;  %1780 = vst.msk [vmem:[#allocation5 + $0x14] sm:$0xf] %vm1774_vm5, %v4640_v11 }
 0x3ff   : > { %v3581_v20 = vmul.f32 %v5531_v46, %v6647_v0 }
 0x400   : > { %v3670_v60 = vpop.permute.xlu1 %3669 }
 0x401   : > { %5075 = vmatprep.subr.bf16.mxu0 %v3670_v60  ;;  %4541 = vst [vmem:[%s6511_s13 + $0x1c8] sm:$0xff] %v3581_v20  ;;  %v3609_v44 = vpack.c.bf16 %v3581_v20, %v3580_v1 }
 0x402   : > { %v5533_v36 = vpop.eup %5532  ;;  %5076 = vmatpush3.bf16.msra.mxu0 %v3670_v60 }
 0x403   : > { %v3584_v7 = vmul.f32 %v5533_v36, %v6650_v39 }
 0x405   : > { %v4937_v48 = vpop.f32.mrf.mxu0  ;;  %5078 = vmatmul.mubr.bf16.vlgmr.msra.gmra.mxu0 %v3606_v43  ;;  %4544 = vst [vmem:[%s6511_s13 + $0x1e0] sm:$0xff] %v3584_v7 }
 0x406   : > { %v5535_v51 = vpop.eup %5534  ;;  %v4645_v9 = vpack.c.bf16 %v4937_v48, %v4937_v48  ;;  %5081 = vmatprep.mubr.bf16.mxu0 %v3607_v8 }
 0x407   : > { %v1679_v37 = vpop.f32.mrf.mxu0  ;;  %v3586_v0 = vmul.f32 %v5535_v51, %v6653_v63  ;;  %v3610_v63 = vpack.c.bf16 %v3583_v55, %v3582_v6 }
 0x408   : > { %1785 = vst.msk [vmem:[#allocation5 + $0x28] sm:$0xf] %vm1774_vm5, %v4645_v9  ;;  %v4643_v45 = vpack.c.bf16 %v1679_v37, %v1679_v37 }
 0x409   : > { %v4938_v23 = vpop.f32.mrf.mxu0  ;;  %4546 = vst [vmem:[%s6511_s13 + $0x1f0] sm:$0xff] %v3586_v0 }
 0x40a   : > { %v5537_v28 = vpop.eup %5536  ;;  %1783 = vst.msk [vmem:[#allocation5 + $0x20] sm:$0xf] %vm1774_vm5, %v4643_v45  ;;  %v4646_v39 = vpack.c.bf16 %v4938_v23, %v4938_v23 }
 0x40b   : > { %v1682_v21 = vpop.f32.mrf.mxu0  ;;  %v3587_v2 = vmul.f32 %v5537_v28, %v6656_v49 }
 0x40c   : > { %1786 = vst.msk [vmem:[#allocation5 + $0x2c] sm:$0xf] %vm1774_vm5, %v4646_v39  ;;  %v4644_v22 = vpack.c.bf16 %v1682_v21, %v1682_v21 }
 0x40d   : > { %5082 = vmatmul.mubr.bf16.gmra.mxu0 %v3608_v24  ;;  %4547 = vst [vmem:[%s6511_s13 + $0x1f8] sm:$0xff] %v3587_v2  ;;  %v3612_v15 = vpack.c.bf16 %v3587_v2, %v3586_v0 }
 0x40e   : > { %1784 = vst.msk [vmem:[#allocation5 + $0x24] sm:$0xf] %vm1774_vm5, %v4644_v22  ;;  %5085 = vmatprep.mubr.bf16.mxu0 %v3609_v44 }
 0x415   : > { %v4941_v33 = vpop.f32.mrf.mxu0  ;;  %5086 = vmatmul.mubr.bf16.gmra.mxu0 %v3610_v63 }
 0x416   : > { %v4649_v16 = vpack.c.bf16 %v4941_v33, %v4941_v33 }
 0x417   : > { %v1695_v10 = vpop.f32.mrf.mxu0 }
 0x418   : > { %1789 = vst.msk [vmem:[#allocation5 + $0x38] sm:$0xf] %vm1774_vm5, %v4649_v16  ;;  %v4647_v41 = vpack.c.bf16 %v1695_v10, %v1695_v10 }
 0x419   : > { %v4942_v12 = vpop.f32.mrf.mxu0 }
 0x41a   : > { %1787 = vst.msk [vmem:[#allocation5 + $0x30] sm:$0xf] %vm1774_vm5, %v4647_v41  ;;  %v4650_v49 = vpack.c.bf16 %v4942_v12, %v4942_v12 }
 0x41b   : > { %v1698_v30 = vpop.f32.mrf.mxu0 }
 0x41c   : > { %1790 = vst.msk [vmem:[#allocation5 + $0x3c] sm:$0xf] %vm1774_vm5, %v4650_v49  ;;  %v4648_v13 = vpack.c.bf16 %v1698_v30, %v1698_v30 }
 0x41e   : > { %1788 = vst.msk [vmem:[#allocation5 + $0x34] sm:$0xf] %vm1774_vm5, %v4648_v13 }
 0x426   : > { %v3535_v50 = vpop.xlane.xlu0 %3534 }
 0x427   : > { %5538 = vrcp.f32 %v3535_v50 }
 0x434   : > { %v5539_v3 = vpop.eup %5538 }
 0x435   : > { %v3585_v52 = vmul.f32 %v5539_v3, %v6691_v56 }
 0x437   : > { %4545 = vst [vmem:[%s6511_s13 + $0x1e8] sm:$0xff] %v3585_v52  ;;  %v3611_v34 = vpack.c.bf16 %v3585_v52, %v3584_v7 }
 0x439   : > { %5089 = vmatprep.mubr.bf16.mxu0 %v3611_v34 }
 0x43a   : > { %5090 = vmatmul.mubr.bf16.gmra.mxu0 %v3612_v15  ;;  %v5274_v15 = vld [vmem:[%s7040_s8 + $0x8] sm:$0xff]  }
 0x43b   : > { %5093 = vmatprep.subr.bf16.mxu1 %v5274_v15 }
 0x43c   : > { %5094 = vmatpush3.bf16.msra.mxu1 %v5274_v15 }
 0x44e   : > { %v4979_v59 = vpop.f32.mrf.mxu0 }
 0x44f   : > { %v4653_v25 = vpack.c.bf16 %v4979_v59, %v4979_v59 }
 0x450   : > { %v2319_v17 = vpop.f32.mrf.mxu0 }
 0x451   : > { %v4651_v42 = vpack.c.bf16 %v2319_v17, %v2319_v17  ;;  %2434 = vrot.lane.b32.xlu0 %v4653_v25, %s7079_s15 }
 0x452   : > { %v4980_v58 = vpop.f32.mrf.mxu0 }
 0x453   : > { %2430 = vrot.lane.b32.xlu1 %v4651_v42, %s7079_s15  ;;  %v4654_v18 = vpack.c.bf16 %v4980_v58, %v4980_v58  ;;  %v5275_v58 = vld [vmem:[%s7040_s8] sm:$0xff]  }
 0x454   : > { %v2322_v62 = vpop.f32.mrf.mxu0  ;;  %5095 = vmatprep.subr.bf16.mxu1 %v5275_v58 }
 0x455   : > { %v4652_v14 = vpack.c.bf16 %v2322_v62, %v2322_v62  ;;  %5096 = vmatpush3.bf16.msra.mxu1 %v5275_v58 }
 0x456   : > { %v4983_v19 = vpop.f32.mrf.mxu0 }
 0x457   : > { %v4657_v47 = vpack.c.bf16 %v4983_v19, %v4983_v19  ;;  %2436 = vrot.lane.b32.xlu1 %v4654_v18, %s7079_s15 }
 0x458   : > { %v2335_v56 = vpop.f32.mrf.mxu0 }
 0x459   : > { %2442 = vrot.lane.b32.xlu0 %v4657_v47, %s7079_s15  ;;  %v4655_v4 = vpack.c.bf16 %v2335_v56, %v2335_v56 }
 0x45a   : > { %v4984_v35 = vpop.f32.mrf.mxu0 }
 0x45b   : > { %2432 = vrot.lane.b32.xlu1 %v4652_v14, %s7079_s15  ;;  %v4658_v40 = vpack.c.bf16 %v4984_v35, %v4984_v35 }
 0x45c   : > { %v2338_v5 = vpop.f32.mrf.mxu0 }
 0x45d   : > { %2438 = vrot.lane.b32.xlu0 %v4655_v4, %s7079_s15  ;;  %v4656_v27 = vpack.c.bf16 %v2338_v5, %v2338_v5 }
 0x45f   : > { %2444 = vrot.lane.b32.xlu1 %v4658_v40, %s7079_s15 }
 0x460   : > { %v4987_v32 = vpop.f32.mrf.mxu0 }
 0x461   : > { %v4661_v53 = vpack.c.bf16 %v4987_v32, %v4987_v32 }
 0x462   : > { %v2351_v6 = vpop.f32.mrf.mxu0 }
 0x463   : > { %2440 = vrot.lane.b32.xlu1 %v4656_v27, %s7079_s15  ;;  %2450 = vrot.lane.b32.xlu0 %v4661_v53, %s7079_s15  ;;  %v4659_v57 = vpack.c.bf16 %v2351_v6, %v2351_v6 }
 0x464   : > { %v4988_v61 = vpop.f32.mrf.mxu0 }
 0x465   : > { %v4662_v1 = vpack.c.bf16 %v4988_v61, %v4988_v61 }
 0x466   : > { %v2354_v54 = vpop.f32.mrf.mxu0 }
 0x467   : > { %2446 = vrot.lane.b32.xlu0 %v4659_v57, %s7079_s15  ;;  %2452 = vrot.lane.b32.xlu1 %v4662_v1, %s7079_s15  ;;  %v4660_v38 = vpack.c.bf16 %v2354_v54, %v2354_v54 }
 0x468   : > { %v4991_v26 = vpop.f32.mrf.mxu0 }
 0x469   : > { %v4665_v31 = vpack.c.bf16 %v4991_v26, %v4991_v26 }
 0x46a   : > { %v2367_v55 = vpop.f32.mrf.mxu0 }
 0x46b   : > { %2448 = vrot.lane.b32.xlu1 %v4660_v38, %s7079_s15  ;;  %2458 = vrot.lane.b32.xlu0 %v4665_v31, %s7079_s15  ;;  %v4663_v29 = vpack.c.bf16 %v2367_v55, %v2367_v55 }
 0x46c   : > { %v4992_v11 = vpop.f32.mrf.mxu0 }
 0x46d   : > { %v4666_v46 = vpack.c.bf16 %v4992_v11, %v4992_v11 }
 0x46e   : > { %v2370_v20 = vpop.f32.mrf.mxu0 }
 0x46f   : > { %2454 = vrot.lane.b32.xlu0 %v4663_v29, %s7079_s15  ;;  %2460 = vrot.lane.b32.xlu1 %v4666_v46, %s7079_s15  ;;  %v4664_v60 = vpack.c.bf16 %v2370_v20, %v2370_v20 }
 0x473   : > { %2456 = vrot.lane.b32.xlu1 %v4664_v60, %s7079_s15  ;;  %s5540_s15 = scalar_lea.vmem %s6941_s28, 8192 }
 0x474   : > { %v5029_v36 = vpop.f32.mrf.mxu0  ;;  %p5541_p12 = scmp.ne.s32.totalorder %s6941_s28, %s5540_s15 }
 0x475   : > { %v4669_v43 = vpack.c.bf16 %v5029_v36, %v5029_v36 }
 0x476   : > { %v3023_v7 = vpop.f32.mrf.mxu0  ;;  %p5542_p13 = pnand %p5541_p12, %p5727_p4 }
 0x477   : > { %3138 = vrot.lane.b32.xlu1 %v4669_v43, %s5623_s23  ;;  %v4667_v48 = vpack.c.bf16 %v3023_v7, %v3023_v7 }
 0x478   : > { %v5030_v8 = vpop.f32.mrf.mxu0  ;;  %p5543_p0 = pneg %p5542_p13 }
 0x479   : > { %v4670_v37 = vpack.c.bf16 %v5030_v8, %v5030_v8 }
 0x47a   : > { %v3026_v51 = vpop.f32.mrf.mxu0 }
 0x47b   : > { %3134 = vrot.lane.b32.xlu1 %v4667_v48, %s5623_s23  ;;  %v4668_v23 = vpack.c.bf16 %v3026_v51, %v3026_v51 }
 0x47c   : > { %v5033_v9 = vpop.f32.mrf.mxu0 }
 0x47d   : > { %v4673_v0 = vpack.c.bf16 %v5033_v9, %v5033_v9 }
 0x47e   : > { %v3039_v45 = vpop.f32.mrf.mxu0 }
 0x47f   : > { %3146 = vrot.lane.b32.xlu0 %v4673_v0, %s5623_s23  ;;  %3140 = vrot.lane.b32.xlu1 %v4670_v37, %s5623_s23  ;;  %v4671_v28 = vpack.c.bf16 %v3039_v45, %v3039_v45 }
 0x480   : > { %v5034_v39 = vpop.f32.mrf.mxu0 }
 0x481   : > { %v4674_v21 = vpack.c.bf16 %v5034_v39, %v5034_v39 }
 0x482   : > { %v3042_v24 = vpop.f32.mrf.mxu0 }
 0x483   : > { %3142 = vrot.lane.b32.xlu0 %v4671_v28, %s5623_s23  ;;  %3136 = vrot.lane.b32.xlu1 %v4668_v23, %s5623_s23  ;;  %v4672_v2 = vpack.c.bf16 %v3042_v24, %v3042_v24 }
 0x487   : > { %3148 = vrot.lane.b32.xlu1 %v4674_v21, %s5623_s23 }
 0x48b   : > { %3144 = vrot.lane.b32.xlu1 %v4672_v2, %s5623_s23 }
 0x48c   : > { %v5037_v22 = vpop.f32.mrf.mxu0 }
 0x48d   : > { %v4677_v44 = vpack.c.bf16 %v5037_v22, %v5037_v22 }
 0x48e   : > { %v3055_v63 = vpop.f32.mrf.mxu0 }
 0x48f   : > { %3154 = vrot.lane.b32.xlu0 %v4677_v44, %s5623_s23  ;;  %v4675_v16 = vpack.c.bf16 %v3055_v63, %v3055_v63 }
 0x490   : > { %v5038_v33 = vpop.f32.mrf.mxu0 }
 0x491   : > { %v4678_v10 = vpack.c.bf16 %v5038_v33, %v5038_v33 }
 0x492   : > { %v3058_v41 = vpop.f32.mrf.mxu0 }
 0x493   : > { %3150 = vrot.lane.b32.xlu0 %v4675_v16, %s5623_s23  ;;  %3156 = vrot.lane.b32.xlu1 %v4678_v10, %s5623_s23  ;;  %v4676_v12 = vpack.c.bf16 %v3058_v41, %v3058_v41 }
 0x497   : > { %3152 = vrot.lane.b32.xlu1 %v4676_v12, %s5623_s23 }
 0x49c   : > { %v6844_v49 = vpop.f32.mrf.mxu0 }
 0x49d   : > { %v4681_v48 = vpack.c.bf16 %v6844_v49, %v6844_v49 }
 0x49e   : > { %v3071_v30 = vpop.f32.mrf.mxu0 }
 0x49f   : > { %v4679_v13 = vpack.c.bf16 %v3071_v30, %v3071_v30 }
 0x4a0   : > { %v6846_v50 = vpop.f32.mrf.mxu0 }
 0x4a1   : > { %3158 = vrot.lane.b32.xlu0 %v4679_v13, %s5623_s23  ;;  %v4682_v0 = vpack.c.bf16 %v6846_v50, %v6846_v50 }
 0x4a2   : > { %v3074_v3 = vpop.f32.mrf.mxu0 }
 0x4a3   : > { %v4680_v52 = vpack.c.bf16 %v3074_v3, %v3074_v3 }
 0x4a5   : > { %3160 = vrot.lane.b32.xlu1 %v4680_v52, %s5623_s23 }
 0x4c3   : > { %v2435_v34 = vpop.permute.xlu0 %2434 }
 0x4c4   : > { %2481 = vst.msk [vmem:[#allocation5 + $0x8] sm:$0xf] %vm2478_vm6, %v2435_v34 }
 0x4c5   : > { %v2431_v59 = vpop.permute.xlu1 %2430  ;;  %v5079_v25 = vpop.f32.mrf.mxu0 }
 0x4c6   : > { %2479 = vst.msk [vmem:[#allocation5] sm:$0xf] %vm2478_vm6, %v2431_v59  ;;  %v4685_v17 = vpack.c.bf16 %v5079_v25, %v5079_v25 }
 0x4c7   : > { %v3727_v42 = vpop.f32.mrf.mxu0 }
 0x4c8   : > { %3842 = vrot.lane.b32.xlu0 %v4685_v17, %s5624_s12  ;;  %v4683_v19 = vpack.c.bf16 %v3727_v42, %v3727_v42 }
 0x4c9   : > { %v2437_v62 = vpop.permute.xlu1 %2436  ;;  %v5080_v18 = vpop.f32.mrf.mxu0 }
 0x4ca   : > { %2482 = vst.msk [vmem:[#allocation5 + $0xc] sm:$0xf] %vm2478_vm6, %v2437_v62  ;;  %v4686_v47 = vpack.c.bf16 %v5080_v18, %v5080_v18 }
 0x4cb   : > { %v2443_v56 = vpop.permute.xlu0 %2442  ;;  %v3730_v14 = vpop.f32.mrf.mxu0 }
 0x4cc   : > { %2485 = vst.msk [vmem:[#allocation5 + $0x18] sm:$0xf] %vm2478_vm6, %v2443_v56  ;;  %3838 = vrot.lane.b32.xlu0 %v4683_v19, %s5624_s12  ;;  %3844 = vrot.lane.b32.xlu1 %v4686_v47, %s5624_s12  ;;  %v4684_v40 = vpack.c.bf16 %v3730_v14, %v3730_v14 }
 0x4cd   : > { %v2433_v35 = vpop.permute.xlu1 %2432  ;;  %v5083_v4 = vpop.f32.mrf.mxu0 }
 0x4ce   : > { %2480 = vst.msk [vmem:[#allocation5 + $0x4] sm:$0xf] %vm2478_vm6, %v2433_v35  ;;  %v4689_v5 = vpack.c.bf16 %v5083_v4, %v5083_v4 }
 0x4cf   : > { %v2439_v32 = vpop.permute.xlu0 %2438  ;;  %v3743_v27 = vpop.f32.mrf.mxu0 }
 0x4d0   : > { %2483 = vst.msk [vmem:[#allocation5 + $0x10] sm:$0xf] %vm2478_vm6, %v2439_v32  ;;  %3850 = vrot.lane.b32.xlu0 %v4689_v5, %s5624_s12  ;;  %3840 = vrot.lane.b32.xlu1 %v4684_v40, %s5624_s12  ;;  %v4687_v61 = vpack.c.bf16 %v3743_v27, %v3743_v27 }
 0x4d1   : > { %v2445_v53 = vpop.permute.xlu1 %2444  ;;  %v5084_v6 = vpop.f32.mrf.mxu0 }
 0x4d2   : > { %2486 = vst.msk [vmem:[#allocation5 + $0x1c] sm:$0xf] %vm2478_vm6, %v2445_v53  ;;  %v4690_v57 = vpack.c.bf16 %v5084_v6, %v5084_v6 }
 0x4d3   : > { %v3746_v1 = vpop.f32.mrf.mxu0 }
 0x4d4   : > { %3846 = vrot.lane.b32.xlu0 %v4687_v61, %s5624_s12  ;;  %3852 = vrot.lane.b32.xlu1 %v4690_v57, %s5624_s12  ;;  %v4688_v38 = vpack.c.bf16 %v3746_v1, %v3746_v1 }
 0x4d5   : > { %v2441_v54 = vpop.permute.xlu1 %2440  ;;  %v2451_v26 = vpop.permute.xlu0 %2450 }
 0x4d6   : > { %2484 = vst.msk [vmem:[#allocation5 + $0x14] sm:$0xf] %vm2478_vm6, %v2441_v54  ;;  %2489 = vst.msk [vmem:[#allocation5 + $0x28] sm:$0xf] %vm2478_vm6, %v2451_v26  ;;  %v5087_v31 = vpop.f32.mrf.mxu0 }
 0x4d7   : > { %v4693_v55 = vpack.c.bf16 %v5087_v31, %v5087_v31 }
 0x4d8   : > { %v3759_v11 = vpop.f32.mrf.mxu0  ;;  %3848 = vrot.lane.b32.xlu1 %v4688_v38, %s5624_s12 }
 0x4d9   : > { %3858 = vrot.lane.b32.xlu0 %v4693_v55, %s5624_s12  ;;  %v2447_v29 = vpop.permute.xlu0 %2446  ;;  %v2453_v46 = vpop.permute.xlu1 %2452  ;;  %v4691_v60 = vpack.c.bf16 %v3759_v11, %v3759_v11 }
 0x4da   : > { %2487 = vst.msk [vmem:[#allocation5 + $0x20] sm:$0xf] %vm2478_vm6, %v2447_v29  ;;  %2490 = vst.msk [vmem:[#allocation5 + $0x2c] sm:$0xf] %vm2478_vm6, %v2453_v46  ;;  %v5088_v20 = vpop.f32.mrf.mxu0 }
 0x4db   : > { %v4694_v36 = vpack.c.bf16 %v5088_v20, %v5088_v20 }
 0x4dc   : > { %v3762_v43 = vpop.f32.mrf.mxu0 }
 0x4dd   : > { %3854 = vrot.lane.b32.xlu0 %v4691_v60, %s5624_s12  ;;  %3860 = vrot.lane.b32.xlu1 %v4694_v36, %s5624_s12  ;;  %v2449_v7 = vpop.permute.xlu1 %2448  ;;  %v2459_v8 = vpop.permute.xlu0 %2458  ;;  %v4692_v51 = vpack.c.bf16 %v3762_v43, %v3762_v43 }
 0x4de   : > { %2488 = vst.msk [vmem:[#allocation5 + $0x24] sm:$0xf] %vm2478_vm6, %v2449_v7  ;;  %2493 = vst.msk [vmem:[#allocation5 + $0x38] sm:$0xf] %vm2478_vm6, %v2459_v8 }
 0x4e1   : > { %3162 = vrot.lane.b32.xlu0 %v4681_v48, %s5623_s23  ;;  %3856 = vrot.lane.b32.xlu1 %v4692_v51, %s5624_s12  ;;  %v2455_v9 = vpop.permute.xlu0 %2454  ;;  %v2461_v37 = vpop.permute.xlu1 %2460 }
 0x4e2   : > { %2491 = vst.msk [vmem:[#allocation5 + $0x30] sm:$0xf] %vm2478_vm6, %v2455_v9  ;;  %2494 = vst.msk [vmem:[#allocation5 + $0x3c] sm:$0xf] %vm2478_vm6, %v2461_v37 }
 0x4e5   : > { %3164 = vrot.lane.b32.xlu1 %v4682_v0, %s5623_s23  ;;  %v2457_v45 = vpop.permute.xlu1 %2456  ;;  %s4699_s23 = sshll.u32 %s5608_s20, 13  ;;  %s5625_s20 = smov [#allocation6]  }
 0x4e6   : > { %2492 = vst.msk [vmem:[#allocation5 + $0x34] sm:$0xf] %vm2478_vm6, %v2457_v45  ;;  %s6938_s26 = scalar_lea.hbm %s7043_s11, %s4699_s23  ;;  %s5544_s0 = sshll.u32 %s5625_s20, 4  ;;  %s5545_s0 = int_to_ptr.vmem [resolvable:$false] %s5544_s0 }
 0x4e7   : > { %s5546_s4 = scalar_lea.vmem %s5545_s0, 16384  ;;  %p5547_p1 = scmp.lt.s32.totalorder %s6941_s28, %s5545_s0 }
 0x4e8   : > { %p5548_p2 = scmp.lt.s32.totalorder %s5546_s4, %s5540_s15 }
 0x4e9   : > { %v3139_v23 = vpop.permute.xlu1 %3138 }
 0x4ea   : > { %3185 = vst.msk [vmem:[#allocation5 + $0x8] sm:$0xf] %vm3182_vm7, %v3139_v23  ;;  %p5549_p3 = por %p5548_p2, %p5547_p1 }
 0x4ec   : > { %p5550_p5 = pnand %p5549_p3, %p5543_p0 }
 0x4ed   : > { %v3135_v28 = vpop.permute.xlu1 %3134 }
 0x4ee   : > { %3183 = vst.msk [vmem:[#allocation5] sm:$0xf] %vm3182_vm7, %v3135_v28 }
 0x4f1   : > { %v3147_v39 = vpop.permute.xlu0 %3146  ;;  %v3141_v21 = vpop.permute.xlu1 %3140 }
 0x4f2   : > { %3189 = vst.msk [vmem:[#allocation5 + $0x18] sm:$0xf] %vm3182_vm7, %v3147_v39  ;;  %3186 = vst.msk [vmem:[#allocation5 + $0xc] sm:$0xf] %vm3182_vm7, %v3141_v21 }
 0x4f5   : > { %v3143_v24 = vpop.permute.xlu0 %3142  ;;  %v3137_v2 = vpop.permute.xlu1 %3136 }
 0x4f6   : > { %3187 = vst.msk [vmem:[#allocation5 + $0x10] sm:$0xf] %vm3182_vm7, %v3143_v24  ;;  %3184 = vst.msk [vmem:[#allocation5 + $0x4] sm:$0xf] %vm3182_vm7, %v3137_v2 }
 0x4f9   : > { %v3149_v44 = vpop.permute.xlu1 %3148 }
 0x4fa   : > { %v5091_v22 = vpop.f32.mrf.mxu0  ;;  %3190 = vst.msk [vmem:[#allocation5 + $0x1c] sm:$0xf] %vm3182_vm7, %v3149_v44 }
 0x4fb   : > { %v4697_v12 = vpack.c.bf16 %v5091_v22, %v5091_v22 }
 0x4fc   : > { %v3775_v63 = vpop.f32.mrf.mxu0 }
 0x4fd   : > { %v4695_v33 = vpack.c.bf16 %v3775_v63, %v3775_v63  ;;  %v3145_v10 = vpop.permute.xlu1 %3144 }
 0x4fe   : > { %v5092_v16 = vpop.f32.mrf.mxu0  ;;  %3188 = vst.msk [vmem:[#allocation5 + $0x14] sm:$0xf] %vm3182_vm7, %v3145_v10 }
 0x4ff   : > { %3862 = vrot.lane.b32.xlu0 %v4695_v33, %s5624_s12  ;;  %v4698_v13 = vpack.c.bf16 %v5092_v16, %v5092_v16 }
 0x500   : > { %v3778_v41 = vpop.f32.mrf.mxu0 }
 0x501   : > { %v4696_v49 = vpack.c.bf16 %v3778_v41, %v3778_v41  ;;  %v3155_v30 = vpop.permute.xlu0 %3154 }
 0x502   : > { %3193 = vst.msk [vmem:[#allocation5 + $0x28] sm:$0xf] %vm3182_vm7, %v3155_v30 }
 0x503   : > { %3866 = vrot.lane.b32.xlu0 %v4697_v12, %s5624_s12  ;;  %3864 = vrot.lane.b32.xlu1 %v4696_v49, %s5624_s12 }
 0x505   : > { %v3151_v50 = vpop.permute.xlu0 %3150  ;;  %v3157_v3 = vpop.permute.xlu1 %3156 }
 0x506   : > { %3191 = vst.msk [vmem:[#allocation5 + $0x20] sm:$0xf] %vm3182_vm7, %v3151_v50  ;;  %3194 = vst.msk [vmem:[#allocation5 + $0x2c] sm:$0xf] %vm3182_vm7, %v3157_v3 }
 0x507   : > { %3868 = vrot.lane.b32.xlu1 %v4698_v13, %s5624_s12  ;;  %s6945_s12 = scalar_lea.sflag [#allocation7], %s420_s14 }
 0x509   : > { %v3153_v52 = vpop.permute.xlu1 %3152 }
 0x50a   : > { %3192 = vst.msk [vmem:[#allocation5 + $0x24] sm:$0xf] %vm3182_vm7, %v3153_v52 }
 0x513   : > { %v3159_v34 = vpop.permute.xlu0 %3158 }
 0x514   : > { %3195 = vst.msk [vmem:[#allocation5 + $0x30] sm:$0xf] %vm3182_vm7, %v3159_v34 }
 0x517   : > { %v3161_v15 = vpop.permute.xlu1 %3160 }
 0x518   : > { %3196 = vst.msk [vmem:[#allocation5 + $0x34] sm:$0xf] %vm3182_vm7, %v3161_v15 }
 0x53a   : > { %v3843_v59 = vpop.permute.xlu0 %3842 }
 0x53b   : > { %3889 = vst.msk [vmem:[#allocation5 + $0x8] sm:$0xf] %vm3886_vm8, %v3843_v59 }
 0x53e   : > { %v3839_v25 = vpop.permute.xlu0 %3838  ;;  %v3845_v17 = vpop.permute.xlu1 %3844 }
 0x53f   : > { %3887 = vst.msk [vmem:[#allocation5] sm:$0xf] %vm3886_vm8, %v3839_v25  ;;  %3890 = vst.msk [vmem:[#allocation5 + $0xc] sm:$0xf] %vm3886_vm8, %v3845_v17 }
 0x542   : > { %v3851_v42 = vpop.permute.xlu0 %3850  ;;  %v3841_v58 = vpop.permute.xlu1 %3840 }
 0x543   : > { %3893 = vst.msk [vmem:[#allocation5 + $0x18] sm:$0xf] %vm3886_vm8, %v3851_v42  ;;  %3888 = vst.msk [vmem:[#allocation5 + $0x4] sm:$0xf] %vm3886_vm8, %v3841_v58 }
 0x546   : > { %v3847_v62 = vpop.permute.xlu0 %3846  ;;  %v3853_v18 = vpop.permute.xlu1 %3852  ;;  %v5277_v14 = vld [vmem:[#allocation5 + $0x8] sm:$0xff]  }
 0x547   : > { %3891 = vst.msk [vmem:[#allocation5 + $0x10] sm:$0xf] %vm3886_vm8, %v3847_v62  ;;  %3894 = vst.msk [vmem:[#allocation5 + $0x1c] sm:$0xf] %vm3886_vm8, %v3853_v18 }
 0x54a   : > { %v3849_v19 = vpop.permute.xlu1 %3848  ;;  %v5276_v47 = vld [vmem:[#allocation5] sm:$0xff]  }
 0x54b   : > { %v3859_v56 = vpop.permute.xlu0 %3858  ;;  %3892 = vst.msk [vmem:[#allocation5 + $0x14] sm:$0xf] %vm3886_vm8, %v3849_v19  ;;  %5097 = vmatprep.mubr.msk.bf16.mxu1 %vm503_vm0, %v5276_v47 }
 0x54c   : > { %3897 = vst.msk [vmem:[#allocation5 + $0x28] sm:$0xf] %vm3886_vm8, %v3859_v56  ;;  %5098 = vmatmul.mubr.msk.bf16.vlgmr.msra.gmra.mxu1 %vm503_vm0, %v5277_v14 }
 0x54e   : > { %v5279_v27 = vld [vmem:[#allocation5 + $0x18] sm:$0xff]  }
 0x54f   : > { %v3855_v35 = vpop.permute.xlu0 %3854  ;;  %v3861_v4 = vpop.permute.xlu1 %3860 }
 0x550   : > { %3895 = vst.msk [vmem:[#allocation5 + $0x20] sm:$0xf] %vm3886_vm8, %v3855_v35  ;;  %3898 = vst.msk [vmem:[#allocation5 + $0x2c] sm:$0xf] %vm3886_vm8, %v3861_v4 }
 0x552   : > { %v5278_v40 = vld [vmem:[#allocation5 + $0x10] sm:$0xff]  }
 0x553   : > { %v3163_v5 = vpop.permute.xlu0 %3162  ;;  %v3857_v32 = vpop.permute.xlu1 %3856  ;;  %5101 = vmatprep.mubr.msk.bf16.mxu1 %vm503_vm0, %v5278_v40 }
 0x554   : > { %3197 = vst.msk [vmem:[#allocation5 + $0x38] sm:$0xf] %vm3182_vm7, %v3163_v5  ;;  %5102 = vmatmul.mubr.msk.bf16.gmra.mxu1 %vm503_vm0, %v5279_v27 }
 0x555   : > { %3896 = vst.msk [vmem:[#allocation5 + $0x24] sm:$0xf] %vm3886_vm8, %v3857_v32 }
 0x557   : > { %v3165_v53 = vpop.permute.xlu1 %3164  ;;  %v5281_v61 = vld [vmem:[#allocation5 + $0x28] sm:$0xff]  }
 0x558   : > { %3198 = vst.msk [vmem:[#allocation5 + $0x3c] sm:$0xf] %vm3182_vm7, %v3165_v53 }
 0x55c   : > { %v5280_v6 = vld [vmem:[#allocation5 + $0x20] sm:$0xff]  }
 0x55d   : > { %5105 = vmatprep.mubr.msk.bf16.mxu1 %vm503_vm0, %v5280_v6 }
 0x55e   : > { %5106 = vmatmul.mubr.msk.bf16.gmra.mxu1 %vm503_vm0, %v5281_v61 }
 0x571   : > { %v3863_v57 = vpop.permute.xlu0 %3862 }
 0x572   : > { %3899 = vst.msk [vmem:[#allocation5 + $0x30] sm:$0xf] %vm3886_vm8, %v3863_v57 }
 0x575   : > { %v3867_v1 = vpop.permute.xlu0 %3866  ;;  %v3865_v54 = vpop.permute.xlu1 %3864 }
 0x576   : > { %3901 = vst.msk [vmem:[#allocation5 + $0x38] sm:$0xf] %vm3886_vm8, %v3867_v1  ;;  %3900 = vst.msk [vmem:[#allocation5 + $0x34] sm:$0xf] %vm3886_vm8, %v3865_v54 }
 0x579   : > { %v3869_v26 = vpop.permute.xlu1 %3868 }
 0x57a   : > { %3902 = vst.msk [vmem:[#allocation5 + $0x3c] sm:$0xf] %vm3886_vm8, %v3869_v26 }
 0x57d   : > { %v5282_v38 = vld [vmem:[#allocation5 + $0x30] sm:$0xff]  }
 0x57e   : > { %5109 = vmatprep.mubr.msk.bf16.mxu1 %vm503_vm0, %v5282_v38 }
 0x581   : > { %v5283_v31 = vld [vmem:[#allocation5 + $0x38] sm:$0xff]  }
 0x582   : > { %5110 = vmatmul.mubr.msk.bf16.gmra.mxu1 %vm503_vm0, %v5283_v31 }
 0x583   : > { %5553 = shalt.err (!%p5550_p5)
}
 0x584   : > { %s5554_s14 = scalar_lea.hbm %s6938_s26, 8192  ;;  %s5558_s24 = scalar_lea.hbm %s7043_s11, 16384 }
 0x585   : > { %p5555_p6 = scmp.ne.s32.totalorder %s6938_s26, %s5554_s14  ;;  %p5559_p10 = scmp.lt.s32.totalorder %s6938_s26, %s7043_s11 }
 0x586   : > { %p5560_p11 = scmp.lt.s32.totalorder %s5558_s24, %s5554_s14 }
 0x587   : > { %p5556_p7 = pnand %p5555_p6, %p5727_p4 }
 0x588   : > { %p5561_p12 = por %p5560_p11, %p5559_p10 }
 0x589   : > { %p5557_p9 = pneg %p5556_p7 }
 0x58b   : > { %p5562_p13 = pnand %p5561_p12, %p5557_p9 }
 0x58d   : > { %5565 = shalt.err (!%p5562_p13)
}
 0x58e   : > { %s5626_s0 = smov 128   ;;  %s7158_s15 = smov 8   ;;  %v4572_v55 = vld [vmem:[%s7041_s9] ss:$0 sm:$0xff] }
 0x58f   : > { %5121 = dma.vmem_to_hbm [thread:$0]  (%p5727_p4), %s6941_s28, 8192, %s6938_s26, %s6945_s12, %s5626_s0, %s5626_s0, %s7158_s15  }
 0x590   : > { %s4598_s4 = sshll.u32 %s5750_s16, 7 }
 0x591   : > { %s6976_s14 = scalar_lea.vmem %s7042_s10, %s4598_s4 }
 0x60c   : > { %v5099_v11 = vpop.f32.mrf.mxu1 }
 0x60d   : > { %v4049_v29 = vadd.f32 %v5099_v11, %v4572_v55 }
 0x60e   : > { %v4040_v46 = vpop.f32.mrf.mxu1 }
 0x60f   : > { %4105 = vst.msk [vmem:[%s6976_s14 + $0x10] sm:$0xff] %vm503_vm0, %v4049_v29  ;;  %v4041_v20 = vadd.f32 %v4572_v55, %v4040_v46 }
 0x610   : > { %v5100_v60 = vpop.f32.mrf.mxu1 }
 0x611   : > { %4103 = vst.msk [vmem:[%s6976_s14] sm:$0xff] %vm503_vm0, %v4041_v20  ;;  %v4052_v36 = vadd.f32 %v5100_v60, %v4572_v55 }
 0x612   : > { %v4043_v43 = vpop.f32.mrf.mxu1 }
 0x613   : > { %4106 = vst.msk [vmem:[%s6976_s14 + $0x18] sm:$0xff] %vm503_vm0, %v4052_v36  ;;  %v4044_v7 = vadd.f32 %v4572_v55, %v4043_v43 }
 0x614   : > { %v5103_v8 = vpop.f32.mrf.mxu1 }
 0x615   : > { %4104 = vst.msk [vmem:[%s6976_s14 + $0x8] sm:$0xff] %vm503_vm0, %v4044_v7  ;;  %v4065_v48 = vadd.f32 %v5103_v8, %v4572_v55 }
 0x616   : > { %v4056_v51 = vpop.f32.mrf.mxu1 }
 0x617   : > { %4109 = vst.msk [vmem:[%s6976_s14 + $0x30] sm:$0xff] %vm503_vm0, %v4065_v48  ;;  %v4057_v9 = vadd.f32 %v4572_v55, %v4056_v51 }
 0x618   : > { %v5104_v37 = vpop.f32.mrf.mxu1 }
 0x619   : > { %4107 = vst.msk [vmem:[%s6976_s14 + $0x20] sm:$0xff] %vm503_vm0, %v4057_v9  ;;  %v4068_v0 = vadd.f32 %v5104_v37, %v4572_v55 }
 0x61a   : > { %v4059_v45 = vpop.f32.mrf.mxu1 }
 0x61b   : > { %4110 = vst.msk [vmem:[%s6976_s14 + $0x38] sm:$0xff] %vm503_vm0, %v4068_v0  ;;  %v4060_v23 = vadd.f32 %v4572_v55, %v4059_v45 }
 0x61d   : > { %4108 = vst.msk [vmem:[%s6976_s14 + $0x28] sm:$0xff] %vm503_vm0, %v4060_v23 }
 0x61e   : > { %v5107_v28 = vpop.f32.mrf.mxu1 }
 0x61f   : > { %v4081_v39 = vadd.f32 %v5107_v28, %v4572_v55 }
 0x620   : > { %v4072_v21 = vpop.f32.mrf.mxu1 }
 0x621   : > { %4113 = vst.msk [vmem:[%s6976_s14 + $0x50] sm:$0xff] %vm503_vm0, %v4081_v39  ;;  %v4073_v24 = vadd.f32 %v4572_v55, %v4072_v21 }
 0x622   : > { %v5108_v2 = vpop.f32.mrf.mxu1 }
 0x623   : > { %4111 = vst.msk [vmem:[%s6976_s14 + $0x40] sm:$0xff] %vm503_vm0, %v4073_v24  ;;  %v4084_v22 = vadd.f32 %v5108_v2, %v4572_v55 }
 0x624   : > { %v4075_v44 = vpop.f32.mrf.mxu1 }
 0x625   : > { %4114 = vst.msk [vmem:[%s6976_s14 + $0x58] sm:$0xff] %vm503_vm0, %v4084_v22  ;;  %v4076_v63 = vadd.f32 %v4572_v55, %v4075_v44 }
 0x627   : > { %4112 = vst.msk [vmem:[%s6976_s14 + $0x48] sm:$0xff] %vm503_vm0, %v4076_v63 }
 0x642   : > { %v5111_v33 = vpop.f32.mrf.mxu1 }
 0x643   : > { %v4097_v16 = vadd.f32 %v5111_v33, %v4572_v55 }
 0x644   : > { %v4088_v10 = vpop.f32.mrf.mxu1 }
 0x645   : > { %4117 = vst.msk [vmem:[%s6976_s14 + $0x70] sm:$0xff] %vm503_vm0, %v4097_v16  ;;  %v4089_v41 = vadd.f32 %v4572_v55, %v4088_v10 }
 0x646   : > { %v5112_v12 = vpop.f32.mrf.mxu1 }
 0x647   : > { %4115 = vst.msk [vmem:[%s6976_s14 + $0x60] sm:$0xff] %vm503_vm0, %v4089_v41  ;;  %v4100_v49 = vadd.f32 %v5112_v12, %v4572_v55 }
 0x648   : > { %v4091_v30 = vpop.f32.mrf.mxu1 }
 0x649   : > { %4118 = vst.msk [vmem:[%s6976_s14 + $0x78] sm:$0xff] %vm503_vm0, %v4100_v49  ;;  %v4092_v13 = vadd.f32 %v4572_v55, %v4091_v30 }
 0x64b   : > { %4116 = vst.msk [vmem:[%s6976_s14 + $0x68] sm:$0xff] %vm503_vm0, %v4092_v13 }
 0x64c PF: > { %p5127_p4 = scmp.ge.s32.totalorder %s5616_s22, 2  ;;  %s4175_s27 = sand.u32 1, %s5596_s17  }
 0x64d   : > { %s4176_s16 = scalar_lea.sflag [#allocation7], %s4175_s27 }
 0x64e   : > { %p5124_p0 = pnand %p5127_p4, %p5734_p8 }
 0x650   : > { %p5125_p1 = pneg %p5124_p0 }
 0x652   : > { %5591 = dma.done.wait (%p5125_p1), %s4176_s16, 8192  }
 0x653   : > { %5593 = vsyncadd (%p5125_p1), %s4176_s16, 4294959104  ;;  %s25_s22 = sadd.s32 1, %s5616_s22   ;;  %s7159_s17 = smov %s5600_s18 }
 0x654   : > { %p22_p2 = scmp.ge.s32.totalorder %s25_s22, 4   ;;  %s7160_s18 = smov %s5604_s19 }
 0x655   : > { %s7161_s19 = smov %s5740_s30  ;;  %s7162_s20 = smov %s5612_s21 }
 0x656   : > { %s7163_s21 = smov %s7165_s25  ;;  %24 = sbr.rel (!%p22_p2) target bundleno = 8 (0x8), region = 118 }
 0x65b   :  { %4181 = vsyncpa [#allocation7], 1 }
 0x65c   :  { %4183 = vsyncpa [#allocation7 + $0x1], 1 }

</bundles_post_ra>
